<compile_context>
chip_gen: v5e
topology: v5e:2x2
jax: 0.10.0
libtpu: 0.0.40
codegen_flags: <defaults>
</compile_context>

<pallas_src>
import functools

import jax
import jax.numpy as jnp
from jax.experimental import pallas as pl
from jax.experimental.pallas import tpu as pltpu


def _lesion_attention_kernel(x_ref, w1t_ref, w2t_ref, tapw_ref, o_ref,
                             *, H, W, K, Bblk):
    # x_ref    : (Bblk, C, HW) f32 VMEM  -- batch block, C on sublanes, flat spatial on lanes
    # w1t_ref  : (C, Cr)  VMEM           -- shared-MLP conv1 weight, pre-transposed
    # w2t_ref  : (Cr, C)  VMEM           -- shared-MLP conv2 weight, pre-transposed
    # tapw_ref : (2*K*K, HW) f32 VMEM    -- per-tap (zero-pad mask * conv weight);
    #                                       rows [0, K*K) = avg channel, [K*K, 2*K*K) = max channel
    # o_ref    : (Bblk, C, HW) VMEM
    P = (K - 1) // 2
    KK = K * K
    HW = H * W

    x = x_ref[...]                                        # (Bblk, C, HW)

    # ---------------- channel attention (batched over the whole block) ----------
    avg_p = jnp.mean(x, axis=2)                           # (Bblk, C)  AdaptiveAvgPool2d(1)
    max_p = jnp.max(x, axis=2)                            # (Bblk, C)  AdaptiveMaxPool2d(1)
    pooled = jnp.concatenate([avg_p, max_p], axis=0)      # (2*Bblk, C)
    # One fused MXU matmul covers both pooling branches of the shared MLP.
    h = jnp.maximum(
        jnp.dot(pooled, w1t_ref[...], preferred_element_type=jnp.float32), 0.0)
    hsum = h[:Bblk] + h[Bblk:]                            # relu(W1@avg) + relu(W1@max), (Bblk, Cr)
    ca = jax.nn.sigmoid(
        jnp.dot(hsum, w2t_ref[...], preferred_element_type=jnp.float32))  # (Bblk, C)
    xc = x * ca[:, :, None]                               # (Bblk, C, HW)

    # ---------------- spatial attention -----------------------------------------
    sp_a = jnp.mean(xc, axis=1)                           # (Bblk, HW) mean over channels
    sp_m = jnp.max(xc, axis=1)                            # (Bblk, HW) max  over channels

    # K x K zero-padded SAME conv on the flat maps.  Each tap: one XLU lane-roll per
    # avg/max stack covering all batches + one FMA against a precomputed
    # (mask * weight) row.  Four accumulators keep the FMA chains short (ILP).
    acc0 = jnp.zeros((Bblk, HW), jnp.float32)
    acc1 = jnp.zeros((Bblk, HW), jnp.float32)
    acc2 = jnp.zeros((Bblk, HW), jnp.float32)
    acc3 = jnp.zeros((Bblk, HW), jnp.float32)
    for ky in range(K):
        dy = ky - P
        for kx in range(K):
            dx = kx - P
            tap = ky * K + kx
            s = dy * W + dx
            shift = (-s) % HW                             # rolled[i] == sp[(i + s) % HW]
            ra = sp_a if shift == 0 else pltpu.roll(sp_a, shift, axis=1)
            rm = sp_m if shift == 0 else pltpu.roll(sp_m, shift, axis=1)
            wa = tapw_ref[tap:tap + 1, :]                 # (1, HW) masked avg-channel weight
            wm = tapw_ref[KK + tap:KK + tap + 1, :]       # (1, HW) masked max-channel weight
            if tap % 2 == 0:
                acc0 = acc0 + ra * wa
                acc1 = acc1 + rm * wm
            else:
                acc2 = acc2 + ra * wa
                acc3 = acc3 + rm * wm
    conv = (acc0 + acc2) + (acc1 + acc3)                  # (Bblk, HW)
    satt = jax.nn.sigmoid(conv)                           # (Bblk, HW)

    o_ref[...] = (xc * satt[:, None, :]).astype(o_ref.dtype)


def _device_info():
    """(vmem_capacity_bytes, num_tensorcores) with conservative fallbacks."""
    vmem_bytes, num_cores = 128 << 20, 1                  # v5e / v6e: 128 MiB, 1 TC
    try:
        kind = jax.devices()[0].device_kind.lower()
        if "v7" in kind:
            vmem_bytes, num_cores = 64 << 20, 2           # v7x: 64 MiB per TC, 2 TCs
    except Exception:
        pass
    return vmem_bytes, num_cores


def _pick_block_batch(B, bytes_per_batch, vmem_bytes, num_cores):
    """Largest divisor of B such that one x/out block stays near ~VMEM/10 (so the
    double-buffered in+out blocks plus temporaries fit comfortably).  Only force
    >= num_cores grid steps on multi-TensorCore chips."""
    target = max(vmem_bytes // 10, 4 << 20)
    cap = max(1, target // max(bytes_per_batch, 1))
    cap = min(cap, 64)                     # per-step code size no longer scales with Bblk
    if num_cores > 1:
        cap = min(cap, max(1, B // num_cores))
    cap = int(max(1, min(cap, B)))
    for d in range(cap, 0, -1):
        if B % d == 0:
            return d
    return 1


def _const_spec(shape):
    """BlockSpec for a grid-invariant input; single-buffered when supported."""
    index_map = lambda i: (0,) * len(shape)
    try:
        return pl.BlockSpec(shape, index_map, pipeline_mode=pl.Buffered(1))
    except (AttributeError, TypeError):
        return pl.BlockSpec(shape, index_map)


def lesion_attention(x, w1, w2, w_spatial, *, kernel_size=7, block_batch=None):
    """x: (B, C, H, W) f32 NCHW.  w1: (C//r, C), w2: (C, C//r), w_spatial: (1, 2, K, K)."""
    B, C, H, W = x.shape
    HW = H * W
    K = kernel_size
    P = (K - 1) // 2
    KK = K * K
    Cr = w1.shape[0]

    xf = x.reshape(B, C, HW)
    w1t = jnp.transpose(w1)                               # (C, Cr)
    w2t = jnp.transpose(w2)                               # (Cr, C)

    # Per-tap masked weights, precomputed once in the wrapper (constant for fixed
    # H, W, K, weights).  The validity mask reproduces zero 'SAME' padding for the
    # flat-index lane-roll trick (kills both out-of-image taps and row wrap-around).
    pos = jnp.arange(HW, dtype=jnp.int32)
    row, col = pos // W, pos % W
    row_ok = jnp.stack(
        [(row + (ky - P) >= 0) & (row + (ky - P) < H) for ky in range(K)])
    col_ok = jnp.stack(
        [(col + (kx - P) >= 0) & (col + (kx - P) < W) for kx in range(K)])
    mask = (row_ok[:, None, :] & col_ok[None, :, :]).reshape(KK, HW).astype(jnp.float32)
    w_sp = w_spatial.reshape(2, KK)                       # [channel (avg, max), ky*K + kx]
    tapw = jnp.concatenate([mask * w_sp[0][:, None], mask * w_sp[1][:, None]], axis=0)
    # TODO(synk): for very large H*W, replace the (2*K*K, HW) tapw table with the shared
    # (K*K, HW) mask plus SMEM scalar weights to respect v7x's 64 MiB VMEM per TC.

    vmem_bytes, num_cores = _device_info()
    itemsize = x.dtype.itemsize
    if block_batch is None:
        block_batch = _pick_block_batch(B, C * HW * itemsize, vmem_bytes, num_cores)
    Bblk = int(block_batch)
    assert B % Bblk == 0, "block_batch must divide the batch size"

    block_bytes = Bblk * C * HW * itemsize
    aux_bytes = (2 * KK * HW + 2 * C * Cr) * 4
    vmem_limit = int(min(max(6 * block_bytes + 2 * aux_bytes + (8 << 20), 32 << 20),
                         (3 * vmem_bytes) // 4))

    kern = functools.partial(_lesion_attention_kernel, H=H, W=W, K=K, Bblk=Bblk)
    out_flat = pl.pallas_call(
        kern,
        out_shape=jax.ShapeDtypeStruct((B, C, HW), x.dtype),
        grid=(B // Bblk,),
        in_specs=[
            pl.BlockSpec((Bblk, C, HW), lambda i: (i, 0, 0)),
            _const_spec((C, Cr)),
            _const_spec((Cr, C)),
            _const_spec((2 * KK, HW)),
        ],
        out_specs=pl.BlockSpec((Bblk, C, HW), lambda i: (i, 0, 0)),
        compiler_params=pltpu.CompilerParams(
            dimension_semantics=("parallel",),
            vmem_limit_bytes=vmem_limit),
    )(xf, w1t, w2t, tapw)
    # TODO(synk): for very large H*W additionally tile the spatial axis (with a +/-P
    # row halo for the conv) so blocks also fit v7x's 64 MiB VMEM per TensorCore.
    return out_flat.reshape(B, C, H, W)


def reference(x, w1, w2, w_spatial):
    """Pure-JAX reference matching the PyTorch forward exactly."""
    avg_p = jnp.mean(x, axis=(2, 3))                      # (B, C)
    max_p = jnp.max(x, axis=(2, 3))                       # (B, C)

    def mlp(p):
        h = jax.nn.relu(p @ w1.T)                         # (B, Cr)
        return h @ w2.T                                   # (B, C)

    ca = jax.nn.sigmoid(mlp(avg_p) + mlp(max_p))          # (B, C)
    xc = x * ca[:, :, None, None]
    avg_sp = jnp.mean(xc, axis=1, keepdims=True)
    max_sp = jnp.max(xc, axis=1, keepdims=True)
    sp_in = jnp.concatenate([avg_sp, max_sp], axis=1)     # (B, 2, H, W)
    conv = jax.lax.conv_general_dilated(
        sp_in, w_spatial, window_strides=(1, 1), padding="SAME",
        dimension_numbers=("NCHW", "OIHW", "NCHW"))
    satt = jax.nn.sigmoid(conv)
    return xc * satt


if __name__ == "__main__":
    key = jax.random.PRNGKey(0)
    B, C, H, W = 2, 16, 16, 16
    reduction_ratio, K = 8, 7
    Cr = C // reduction_ratio

    k1, k2, k3, k4 = jax.random.split(key, 4)
    x = jax.random.normal(k1, (B, C, H, W), jnp.float32)
    # Deterministic synthetic params (shapes from the Conv2d defs, bias=False everywhere).
    w1 = jax.random.normal(k2, (Cr, C), jnp.float32) * 0.2              # Conv2d(C, C//r, 1)
    w2 = jax.random.normal(k3, (C, Cr), jnp.float32) * 0.2              # Conv2d(C//r, C, 1)
    w_spatial = jax.random.normal(k4, (1, 2, K, K), jnp.float32) * 0.1  # Conv2d(2, 1, 7, pad=3)

    out = lesion_attention(x, w1, w2, w_spatial, kernel_size=K)
    out = jax.block_until_ready(out)

    ref = reference(x, w1, w2, w_spatial)
    if out.shape != ref.shape or not jnp.allclose(out, ref, atol=1e-4, rtol=1e-4):
        raise AssertionError("Pallas kernel does not match JAX reference")
    print("KERNEL_OK")
</pallas_src>

<mosaic_0001>
module attributes {stable_mosaic.version = 11 : i64} {
  func.func @_lesion_attention_kernel(%arg0: i32, %arg1: memref<2x16x256xf32, #tpu.memory_space<vmem>>, %arg2: memref<16x2xf32, #tpu.memory_space<vmem>>, %arg3: memref<2x16xf32, #tpu.memory_space<vmem>>, %arg4: memref<98x256xf32, #tpu.memory_space<vmem>>, %arg5: memref<2x16x256xf32, #tpu.memory_space<vmem>>) attributes {dimension_semantics = [#tpu.dimension_semantics<parallel>], iteration_bounds = array<i64: 1>, scalar_prefetch = 0 : i64, scratch_operands = 0 : i64, tpu.core_type = #tpu.core_type<tc>, window_params = [{transform_indices = @transform_0, window_bounds = array<i64: 2, 16, 256>}, {pipeline_mode = #tpu.pipeline_mode<synchronous>, transform_indices = @transform_1, window_bounds = array<i64: 16, 2>}, {pipeline_mode = #tpu.pipeline_mode<synchronous>, transform_indices = @transform_2, window_bounds = array<i64: 2, 16>}, {pipeline_mode = #tpu.pipeline_mode<synchronous>, transform_indices = @transform_3, window_bounds = array<i64: 98, 256>}, {transform_indices = @transform_4, window_bounds = array<i64: 2, 16, 256>}]} {
    %c0 = arith.constant 0 : index
    %c0_0 = arith.constant 0 : index
    %c0_1 = arith.constant 0 : index
    %0 = vector.load %arg1[%c0, %c0_0, %c0_1] : memref<2x16x256xf32, #tpu.memory_space<vmem>>, vector<2x16x256xf32>
    %cst = arith.constant dense<0.000000e+00> : vector<2x16xf32>
    %1 = vector.multi_reduction <add>, %0, %cst [2] : vector<2x16x256xf32> to vector<2x16xf32>
    %cst_2 = arith.constant 2.560000e+02 : f32
    %2 = vector.broadcast %cst_2 : f32 to vector<2x16xf32>
    %3 = arith.divf %1, %2 : vector<2x16xf32>
    %cst_3 = arith.constant dense<0xFF800000> : vector<2x16xf32>
    %4 = vector.multi_reduction <maximumf>, %0, %cst_3 [2] : vector<2x16x256xf32> to vector<2x16xf32>
    %5 = tpu.concatenate %3, %4 in 0 : vector<2x16xf32>, vector<2x16xf32> -> vector<4x16xf32>
    %c0_4 = arith.constant 0 : index
    %c0_5 = arith.constant 0 : index
    %6 = vector.load %arg2[%c0_4, %c0_5] : memref<16x2xf32, #tpu.memory_space<vmem>>, vector<16x2xf32>
    %cst_6 = arith.constant dense<0.000000e+00> : vector<4x2xf32>
    %7 = tpu.matmul %5, %6, %cst_6 {dimension_numbers = #tpu.dot_dimension_numbers<[1], [0], [0], [1], [0, 0, 1, 1], [], []>} : vector<4x16xf32>, vector<16x2xf32>, vector<4x2xf32> -> vector<4x2xf32>
    %cst_7 = arith.constant 0.000000e+00 : f32
    %8 = vector.broadcast %cst_7 : f32 to vector<4x2xf32>
    %9 = arith.maximumf %7, %8 : vector<4x2xf32>
    %10 = vector.extract_strided_slice %9 {offsets = [0, 0], sizes = [2, 2], strides = [1, 1]} : vector<4x2xf32> to vector<2x2xf32>
    %11 = vector.extract_strided_slice %9 {offsets = [2, 0], sizes = [2, 2], strides = [1, 1]} : vector<4x2xf32> to vector<2x2xf32>
    %12 = arith.addf %10, %11 : vector<2x2xf32>
    %c0_8 = arith.constant 0 : index
    %c0_9 = arith.constant 0 : index
    %13 = vector.load %arg3[%c0_8, %c0_9] : memref<2x16xf32, #tpu.memory_space<vmem>>, vector<2x16xf32>
    %cst_10 = arith.constant dense<0.000000e+00> : vector<2x16xf32>
    %14 = tpu.matmul %12, %13, %cst_10 {dimension_numbers = #tpu.dot_dimension_numbers<[1], [0], [0], [1], [0, 0, 1, 1], [], []>} : vector<2x2xf32>, vector<2x16xf32>, vector<2x16xf32> -> vector<2x16xf32>
    %15 = arith.negf %14 : vector<2x16xf32>
    %16 = math.exp %15 : vector<2x16xf32>
    %cst_11 = arith.constant 1.000000e+00 : f32
    %17 = vector.broadcast %cst_11 : f32 to vector<2x16xf32>
    %18 = arith.addf %17, %16 : vector<2x16xf32>
    %19 = arith.divf %17, %18 : vector<2x16xf32>
    %20 = vector.shape_cast %19 : vector<2x16xf32> to vector<2x16x1xf32>
    %21 = vector.broadcast %20 : vector<2x16x1xf32> to vector<2x16x256xf32>
    %22 = arith.mulf %0, %21 : vector<2x16x256xf32>
    %cst_12 = arith.constant dense<0.000000e+00> : vector<2x256xf32>
    %23 = vector.multi_reduction <add>, %22, %cst_12 [1] : vector<2x16x256xf32> to vector<2x256xf32>
    %cst_13 = arith.constant 1.600000e+01 : f32
    %24 = vector.broadcast %cst_13 : f32 to vector<2x256xf32>
    %25 = arith.divf %23, %24 : vector<2x256xf32>
    %cst_14 = arith.constant dense<0xFF800000> : vector<2x256xf32>
    %26 = vector.multi_reduction <maximumf>, %22, %cst_14 [1] : vector<2x16x256xf32> to vector<2x256xf32>
    %cst_15 = arith.constant 0.000000e+00 : f32
    %27 = vector.broadcast %cst_15 : f32 to vector<2x256xf32>
    %cst_16 = arith.constant 0.000000e+00 : f32
    %28 = vector.broadcast %cst_16 : f32 to vector<2x256xf32>
    %cst_17 = arith.constant 0.000000e+00 : f32
    %29 = vector.broadcast %cst_17 : f32 to vector<2x256xf32>
    %cst_18 = arith.constant 0.000000e+00 : f32
    %30 = vector.broadcast %cst_18 : f32 to vector<2x256xf32>
    %c51_i32 = arith.constant 51 : i32
    %31 = tpu.dynamic_rotate %25 by %c51_i32 dim 1 : vector<2x256xf32>, i32 -> vector<2x256xf32>
    %c51_i32_19 = arith.constant 51 : i32
    %32 = tpu.dynamic_rotate %26 by %c51_i32_19 dim 1 : vector<2x256xf32>, i32 -> vector<2x256xf32>
    %c0_20 = arith.constant 0 : index
    %c0_21 = arith.constant 0 : index
    %33 = vector.load %arg4[%c0_20, %c0_21] : memref<98x256xf32, #tpu.memory_space<vmem>>, vector<1x256xf32>
    %c49 = arith.constant 49 : index
    %c0_22 = arith.constant 0 : index
    %34 = vector.load %arg4[%c49, %c0_22] : memref<98x256xf32, #tpu.memory_space<vmem>>, vector<1x256xf32>
    %35 = vector.broadcast %33 : vector<1x256xf32> to vector<2x256xf32>
    %36 = arith.mulf %31, %35 : vector<2x256xf32>
    %37 = arith.addf %27, %36 : vector<2x256xf32>
    %38 = vector.broadcast %34 : vector<1x256xf32> to vector<2x256xf32>
    %39 = arith.mulf %32, %38 : vector<2x256xf32>
    %40 = arith.addf %28, %39 : vector<2x256xf32>
    %c50_i32 = arith.constant 50 : i32
    %41 = tpu.dynamic_rotate %25 by %c50_i32 dim 1 : vector<2x256xf32>, i32 -> vector<2x256xf32>
    %c50_i32_23 = arith.constant 50 : i32
    %42 = tpu.dynamic_rotate %26 by %c50_i32_23 dim 1 : vector<2x256xf32>, i32 -> vector<2x256xf32>
    %c1 = arith.constant 1 : index
    %c0_24 = arith.constant 0 : index
    %43 = vector.load %arg4[%c1, %c0_24] : memref<98x256xf32, #tpu.memory_space<vmem>>, vector<1x256xf32>
    %c50 = arith.constant 50 : index
    %c0_25 = arith.constant 0 : index
    %44 = vector.load %arg4[%c50, %c0_25] : memref<98x256xf32, #tpu.memory_space<vmem>>, vector<1x256xf32>
    %45 = vector.broadcast %43 : vector<1x256xf32> to vector<2x256xf32>
    %46 = arith.mulf %41, %45 : vector<2x256xf32>
    %47 = arith.addf %29, %46 : vector<2x256xf32>
    %48 = vector.broadcast %44 : vector<1x256xf32> to vector<2x256xf32>
    %49 = arith.mulf %42, %48 : vector<2x256xf32>
    %50 = arith.addf %30, %49 : vector<2x256xf32>
    %c49_i32 = arith.constant 49 : i32
    %51 = tpu.dynamic_rotate %25 by %c49_i32 dim 1 : vector<2x256xf32>, i32 -> vector<2x256xf32>
    %c49_i32_26 = arith.constant 49 : i32
    %52 = tpu.dynamic_rotate %26 by %c49_i32_26 dim 1 : vector<2x256xf32>, i32 -> vector<2x256xf32>
    %c2 = arith.constant 2 : index
    %c0_27 = arith.constant 0 : index
    %53 = vector.load %arg4[%c2, %c0_27] : memref<98x256xf32, #tpu.memory_space<vmem>>, vector<1x256xf32>
    %c51 = arith.constant 51 : index
    %c0_28 = arith.constant 0 : index
    %54 = vector.load %arg4[%c51, %c0_28] : memref<98x256xf32, #tpu.memory_space<vmem>>, vector<1x256xf32>
    %55 = vector.broadcast %53 : vector<1x256xf32> to vector<2x256xf32>
    %56 = arith.mulf %51, %55 : vector<2x256xf32>
    %57 = arith.addf %37, %56 : vector<2x256xf32>
    %58 = vector.broadcast %54 : vector<1x256xf32> to vector<2x256xf32>
    %59 = arith.mulf %52, %58 : vector<2x256xf32>
    %60 = arith.addf %40, %59 : vector<2x256xf32>
    %c48_i32 = arith.constant 48 : i32
    %61 = tpu.dynamic_rotate %25 by %c48_i32 dim 1 : vector<2x256xf32>, i32 -> vector<2x256xf32>
    %c48_i32_29 = arith.constant 48 : i32
    %62 = tpu.dynamic_rotate %26 by %c48_i32_29 dim 1 : vector<2x256xf32>, i32 -> vector<2x256xf32>
    %c3 = arith.constant 3 : index
    %c0_30 = arith.constant 0 : index
    %63 = vector.load %arg4[%c3, %c0_30] : memref<98x256xf32, #tpu.memory_space<vmem>>, vector<1x256xf32>
    %c52 = arith.constant 52 : index
    %c0_31 = arith.constant 0 : index
    %64 = vector.load %arg4[%c52, %c0_31] : memref<98x256xf32, #tpu.memory_space<vmem>>, vector<1x256xf32>
    %65 = vector.broadcast %63 : vector<1x256xf32> to vector<2x256xf32>
    %66 = arith.mulf %61, %65 : vector<2x256xf32>
    %67 = arith.addf %47, %66 : vector<2x256xf32>
    %68 = vector.broadcast %64 : vector<1x256xf32> to vector<2x256xf32>
    %69 = arith.mulf %62, %68 : vector<2x256xf32>
    %70 = arith.addf %50, %69 : vector<2x256xf32>
    %c47_i32 = arith.constant 47 : i32
    %71 = tpu.dynamic_rotate %25 by %c47_i32 dim 1 : vector<2x256xf32>, i32 -> vector<2x256xf32>
    %c47_i32_32 = arith.constant 47 : i32
    %72 = tpu.dynamic_rotate %26 by %c47_i32_32 dim 1 : vector<2x256xf32>, i32 -> vector<2x256xf32>
    %c4 = arith.constant 4 : index
    %c0_33 = arith.constant 0 : index
    %73 = vector.load %arg4[%c4, %c0_33] : memref<98x256xf32, #tpu.memory_space<vmem>>, vector<1x256xf32>
    %c53 = arith.constant 53 : index
    %c0_34 = arith.constant 0 : index
    %74 = vector.load %arg4[%c53, %c0_34] : memref<98x256xf32, #tpu.memory_space<vmem>>, vector<1x256xf32>
    %75 = vector.broadcast %73 : vector<1x256xf32> to vector<2x256xf32>
    %76 = arith.mulf %71, %75 : vector<2x256xf32>
    %77 = arith.addf %57, %76 : vector<2x256xf32>
    %78 = vector.broadcast %74 : vector<1x256xf32> to vector<2x256xf32>
    %79 = arith.mulf %72, %78 : vector<2x256xf32>
    %80 = arith.addf %60, %79 : vector<2x256xf32>
    %c46_i32 = arith.constant 46 : i32
    %81 = tpu.dynamic_rotate %25 by %c46_i32 dim 1 : vector<2x256xf32>, i32 -> vector<2x256xf32>
    %c46_i32_35 = arith.constant 46 : i32
    %82 = tpu.dynamic_rotate %26 by %c46_i32_35 dim 1 : vector<2x256xf32>, i32 -> vector<2x256xf32>
    %c5 = arith.constant 5 : index
    %c0_36 = arith.constant 0 : index
    %83 = vector.load %arg4[%c5, %c0_36] : memref<98x256xf32, #tpu.memory_space<vmem>>, vector<1x256xf32>
    %c54 = arith.constant 54 : index
    %c0_37 = arith.constant 0 : index
    %84 = vector.load %arg4[%c54, %c0_37] : memref<98x256xf32, #tpu.memory_space<vmem>>, vector<1x256xf32>
    %85 = vector.broadcast %83 : vector<1x256xf32> to vector<2x256xf32>
    %86 = arith.mulf %81, %85 : vector<2x256xf32>
    %87 = arith.addf %67, %86 : vector<2x256xf32>
    %88 = vector.broadcast %84 : vector<1x256xf32> to vector<2x256xf32>
    %89 = arith.mulf %82, %88 : vector<2x256xf32>
    %90 = arith.addf %70, %89 : vector<2x256xf32>
    %c45_i32 = arith.constant 45 : i32
    %91 = tpu.dynamic_rotate %25 by %c45_i32 dim 1 : vector<2x256xf32>, i32 -> vector<2x256xf32>
    %c45_i32_38 = arith.constant 45 : i32
    %92 = tpu.dynamic_rotate %26 by %c45_i32_38 dim 1 : vector<2x256xf32>, i32 -> vector<2x256xf32>
    %c6 = arith.constant 6 : index
    %c0_39 = arith.constant 0 : index
    %93 = vector.load %arg4[%c6, %c0_39] : memref<98x256xf32, #tpu.memory_space<vmem>>, vector<1x256xf32>
    %c55 = arith.constant 55 : index
    %c0_40 = arith.constant 0 : index
    %94 = vector.load %arg4[%c55, %c0_40] : memref<98x256xf32, #tpu.memory_space<vmem>>, vector<1x256xf32>
    %95 = vector.broadcast %93 : vector<1x256xf32> to vector<2x256xf32>
    %96 = arith.mulf %91, %95 : vector<2x256xf32>
    %97 = arith.addf %77, %96 : vector<2x256xf32>
    %98 = vector.broadcast %94 : vector<1x256xf32> to vector<2x256xf32>
    %99 = arith.mulf %92, %98 : vector<2x256xf32>
    %100 = arith.addf %80, %99 : vector<2x256xf32>
    %c35_i32 = arith.constant 35 : i32
    %101 = tpu.dynamic_rotate %25 by %c35_i32 dim 1 : vector<2x256xf32>, i32 -> vector<2x256xf32>
    %c35_i32_41 = arith.constant 35 : i32
    %102 = tpu.dynamic_rotate %26 by %c35_i32_41 dim 1 : vector<2x256xf32>, i32 -> vector<2x256xf32>
    %c7 = arith.constant 7 : index
    %c0_42 = arith.constant 0 : index
    %103 = vector.load %arg4[%c7, %c0_42] : memref<98x256xf32, #tpu.memory_space<vmem>>, vector<1x256xf32>
    %c56 = arith.constant 56 : index
    %c0_43 = arith.constant 0 : index
    %104 = vector.load %arg4[%c56, %c0_43] : memref<98x256xf32, #tpu.memory_space<vmem>>, vector<1x256xf32>
    %105 = vector.broadcast %103 : vector<1x256xf32> to vector<2x256xf32>
    %106 = arith.mulf %101, %105 : vector<2x256xf32>
    %107 = arith.addf %87, %106 : vector<2x256xf32>
    %108 = vector.broadcast %104 : vector<1x256xf32> to vector<2x256xf32>
    %109 = arith.mulf %102, %108 : vector<2x256xf32>
    %110 = arith.addf %90, %109 : vector<2x256xf32>
    %c34_i32 = arith.constant 34 : i32
    %111 = tpu.dynamic_rotate %25 by %c34_i32 dim 1 : vector<2x256xf32>, i32 -> vector<2x256xf32>
    %c34_i32_44 = arith.constant 34 : i32
    %112 = tpu.dynamic_rotate %26 by %c34_i32_44 dim 1 : vector<2x256xf32>, i32 -> vector<2x256xf32>
    %c8 = arith.constant 8 : index
    %c0_45 = arith.constant 0 : index
    %113 = vector.load %arg4[%c8, %c0_45] : memref<98x256xf32, #tpu.memory_space<vmem>>, vector<1x256xf32>
    %c57 = arith.constant 57 : index
    %c0_46 = arith.constant 0 : index
    %114 = vector.load %arg4[%c57, %c0_46] : memref<98x256xf32, #tpu.memory_space<vmem>>, vector<1x256xf32>
    %115 = vector.broadcast %113 : vector<1x256xf32> to vector<2x256xf32>
    %116 = arith.mulf %111, %115 : vector<2x256xf32>
    %117 = arith.addf %97, %116 : vector<2x256xf32>
    %118 = vector.broadcast %114 : vector<1x256xf32> to vector<2x256xf32>
    %119 = arith.mulf %112, %118 : vector<2x256xf32>
    %120 = arith.addf %100, %119 : vector<2x256xf32>
    %c33_i32 = arith.constant 33 : i32
    %121 = tpu.dynamic_rotate %25 by %c33_i32 dim 1 : vector<2x256xf32>, i32 -> vector<2x256xf32>
    %c33_i32_47 = arith.constant 33 : i32
    %122 = tpu.dynamic_rotate %26 by %c33_i32_47 dim 1 : vector<2x256xf32>, i32 -> vector<2x256xf32>
    %c9 = arith.constant 9 : index
    %c0_48 = arith.constant 0 : index
    %123 = vector.load %arg4[%c9, %c0_48] : memref<98x256xf32, #tpu.memory_space<vmem>>, vector<1x256xf32>
    %c58 = arith.constant 58 : index
    %c0_49 = arith.constant 0 : index
    %124 = vector.load %arg4[%c58, %c0_49] : memref<98x256xf32, #tpu.memory_space<vmem>>, vector<1x256xf32>
    %125 = vector.broadcast %123 : vector<1x256xf32> to vector<2x256xf32>
    %126 = arith.mulf %121, %125 : vector<2x256xf32>
    %127 = arith.addf %107, %126 : vector<2x256xf32>
    %128 = vector.broadcast %124 : vector<1x256xf32> to vector<2x256xf32>
    %129 = arith.mulf %122, %128 : vector<2x256xf32>
    %130 = arith.addf %110, %129 : vector<2x256xf32>
    %c32_i32 = arith.constant 32 : i32
    %131 = tpu.dynamic_rotate %25 by %c32_i32 dim 1 : vector<2x256xf32>, i32 -> vector<2x256xf32>
    %c32_i32_50 = arith.constant 32 : i32
    %132 = tpu.dynamic_rotate %26 by %c32_i32_50 dim 1 : vector<2x256xf32>, i32 -> vector<2x256xf32>
    %c10 = arith.constant 10 : index
    %c0_51 = arith.constant 0 : index
    %133 = vector.load %arg4[%c10, %c0_51] : memref<98x256xf32, #tpu.memory_space<vmem>>, vector<1x256xf32>
    %c59 = arith.constant 59 : index
    %c0_52 = arith.constant 0 : index
    %134 = vector.load %arg4[%c59, %c0_52] : memref<98x256xf32, #tpu.memory_space<vmem>>, vector<1x256xf32>
    %135 = vector.broadcast %133 : vector<1x256xf32> to vector<2x256xf32>
    %136 = arith.mulf %131, %135 : vector<2x256xf32>
    %137 = arith.addf %117, %136 : vector<2x256xf32>
    %138 = vector.broadcast %134 : vector<1x256xf32> to vector<2x256xf32>
    %139 = arith.mulf %132, %138 : vector<2x256xf32>
    %140 = arith.addf %120, %139 : vector<2x256xf32>
    %c31_i32 = arith.constant 31 : i32
    %141 = tpu.dynamic_rotate %25 by %c31_i32 dim 1 : vector<2x256xf32>, i32 -> vector<2x256xf32>
    %c31_i32_53 = arith.constant 31 : i32
    %142 = tpu.dynamic_rotate %26 by %c31_i32_53 dim 1 : vector<2x256xf32>, i32 -> vector<2x256xf32>
    %c11 = arith.constant 11 : index
    %c0_54 = arith.constant 0 : index
    %143 = vector.load %arg4[%c11, %c0_54] : memref<98x256xf32, #tpu.memory_space<vmem>>, vector<1x256xf32>
    %c60 = arith.constant 60 : index
    %c0_55 = arith.constant 0 : index
    %144 = vector.load %arg4[%c60, %c0_55] : memref<98x256xf32, #tpu.memory_space<vmem>>, vector<1x256xf32>
    %145 = vector.broadcast %143 : vector<1x256xf32> to vector<2x256xf32>
    %146 = arith.mulf %141, %145 : vector<2x256xf32>
    %147 = arith.addf %127, %146 : vector<2x256xf32>
    %148 = vector.broadcast %144 : vector<1x256xf32> to vector<2x256xf32>
    %149 = arith.mulf %142, %148 : vector<2x256xf32>
    %150 = arith.addf %130, %149 : vector<2x256xf32>
    %c30_i32 = arith.constant 30 : i32
    %151 = tpu.dynamic_rotate %25 by %c30_i32 dim 1 : vector<2x256xf32>, i32 -> vector<2x256xf32>
    %c30_i32_56 = arith.constant 30 : i32
    %152 = tpu.dynamic_rotate %26 by %c30_i32_56 dim 1 : vector<2x256xf32>, i32 -> vector<2x256xf32>
    %c12 = arith.constant 12 : index
    %c0_57 = arith.constant 0 : index
    %153 = vector.load %arg4[%c12, %c0_57] : memref<98x256xf32, #tpu.memory_space<vmem>>, vector<1x256xf32>
    %c61 = arith.constant 61 : index
    %c0_58 = arith.constant 0 : index
    %154 = vector.load %arg4[%c61, %c0_58] : memref<98x256xf32, #tpu.memory_space<vmem>>, vector<1x256xf32>
    %155 = vector.broadcast %153 : vector<1x256xf32> to vector<2x256xf32>
    %156 = arith.mulf %151, %155 : vector<2x256xf32>
    %157 = arith.addf %137, %156 : vector<2x256xf32>
    %158 = vector.broadcast %154 : vector<1x256xf32> to vector<2x256xf32>
    %159 = arith.mulf %152, %158 : vector<2x256xf32>
    %160 = arith.addf %140, %159 : vector<2x256xf32>
    %c29_i32 = arith.constant 29 : i32
    %161 = tpu.dynamic_rotate %25 by %c29_i32 dim 1 : vector<2x256xf32>, i32 -> vector<2x256xf32>
    %c29_i32_59 = arith.constant 29 : i32
    %162 = tpu.dynamic_rotate %26 by %c29_i32_59 dim 1 : vector<2x256xf32>, i32 -> vector<2x256xf32>
    %c13 = arith.constant 13 : index
    %c0_60 = arith.constant 0 : index
    %163 = vector.load %arg4[%c13, %c0_60] : memref<98x256xf32, #tpu.memory_space<vmem>>, vector<1x256xf32>
    %c62 = arith.constant 62 : index
    %c0_61 = arith.constant 0 : index
    %164 = vector.load %arg4[%c62, %c0_61] : memref<98x256xf32, #tpu.memory_space<vmem>>, vector<1x256xf32>
    %165 = vector.broadcast %163 : vector<1x256xf32> to vector<2x256xf32>
    %166 = arith.mulf %161, %165 : vector<2x256xf32>
    %167 = arith.addf %147, %166 : vector<2x256xf32>
    %168 = vector.broadcast %164 : vector<1x256xf32> to vector<2x256xf32>
    %169 = arith.mulf %162, %168 : vector<2x256xf32>
    %170 = arith.addf %150, %169 : vector<2x256xf32>
    %c19_i32 = arith.constant 19 : i32
    %171 = tpu.dynamic_rotate %25 by %c19_i32 dim 1 : vector<2x256xf32>, i32 -> vector<2x256xf32>
    %c19_i32_62 = arith.constant 19 : i32
    %172 = tpu.dynamic_rotate %26 by %c19_i32_62 dim 1 : vector<2x256xf32>, i32 -> vector<2x256xf32>
    %c14 = arith.constant 14 : index
    %c0_63 = arith.constant 0 : index
    %173 = vector.load %arg4[%c14, %c0_63] : memref<98x256xf32, #tpu.memory_space<vmem>>, vector<1x256xf32>
    %c63 = arith.constant 63 : index
    %c0_64 = arith.constant 0 : index
    %174 = vector.load %arg4[%c63, %c0_64] : memref<98x256xf32, #tpu.memory_space<vmem>>, vector<1x256xf32>
    %175 = vector.broadcast %173 : vector<1x256xf32> to vector<2x256xf32>
    %176 = arith.mulf %171, %175 : vector<2x256xf32>
    %177 = arith.addf %157, %176 : vector<2x256xf32>
    %178 = vector.broadcast %174 : vector<1x256xf32> to vector<2x256xf32>
    %179 = arith.mulf %172, %178 : vector<2x256xf32>
    %180 = arith.addf %160, %179 : vector<2x256xf32>
    %c18_i32 = arith.constant 18 : i32
    %181 = tpu.dynamic_rotate %25 by %c18_i32 dim 1 : vector<2x256xf32>, i32 -> vector<2x256xf32>
    %c18_i32_65 = arith.constant 18 : i32
    %182 = tpu.dynamic_rotate %26 by %c18_i32_65 dim 1 : vector<2x256xf32>, i32 -> vector<2x256xf32>
    %c15 = arith.constant 15 : index
    %c0_66 = arith.constant 0 : index
    %183 = vector.load %arg4[%c15, %c0_66] : memref<98x256xf32, #tpu.memory_space<vmem>>, vector<1x256xf32>
    %c64 = arith.constant 64 : index
    %c0_67 = arith.constant 0 : index
    %184 = vector.load %arg4[%c64, %c0_67] : memref<98x256xf32, #tpu.memory_space<vmem>>, vector<1x256xf32>
    %185 = vector.broadcast %183 : vector<1x256xf32> to vector<2x256xf32>
    %186 = arith.mulf %181, %185 : vector<2x256xf32>
    %187 = arith.addf %167, %186 : vector<2x256xf32>
    %188 = vector.broadcast %184 : vector<1x256xf32> to vector<2x256xf32>
    %189 = arith.mulf %182, %188 : vector<2x256xf32>
    %190 = arith.addf %170, %189 : vector<2x256xf32>
    %c17_i32 = arith.constant 17 : i32
    %191 = tpu.dynamic_rotate %25 by %c17_i32 dim 1 : vector<2x256xf32>, i32 -> vector<2x256xf32>
    %c17_i32_68 = arith.constant 17 : i32
    %192 = tpu.dynamic_rotate %26 by %c17_i32_68 dim 1 : vector<2x256xf32>, i32 -> vector<2x256xf32>
    %c16 = arith.constant 16 : index
    %c0_69 = arith.constant 0 : index
    %193 = vector.load %arg4[%c16, %c0_69] : memref<98x256xf32, #tpu.memory_space<vmem>>, vector<1x256xf32>
    %c65 = arith.constant 65 : index
    %c0_70 = arith.constant 0 : index
    %194 = vector.load %arg4[%c65, %c0_70] : memref<98x256xf32, #tpu.memory_space<vmem>>, vector<1x256xf32>
    %195 = vector.broadcast %193 : vector<1x256xf32> to vector<2x256xf32>
    %196 = arith.mulf %191, %195 : vector<2x256xf32>
    %197 = arith.addf %177, %196 : vector<2x256xf32>
    %198 = vector.broadcast %194 : vector<1x256xf32> to vector<2x256xf32>
    %199 = arith.mulf %192, %198 : vector<2x256xf32>
    %200 = arith.addf %180, %199 : vector<2x256xf32>
    %c16_i32 = arith.constant 16 : i32
    %201 = tpu.dynamic_rotate %25 by %c16_i32 dim 1 : vector<2x256xf32>, i32 -> vector<2x256xf32>
    %c16_i32_71 = arith.constant 16 : i32
    %202 = tpu.dynamic_rotate %26 by %c16_i32_71 dim 1 : vector<2x256xf32>, i32 -> vector<2x256xf32>
    %c17 = arith.constant 17 : index
    %c0_72 = arith.constant 0 : index
    %203 = vector.load %arg4[%c17, %c0_72] : memref<98x256xf32, #tpu.memory_space<vmem>>, vector<1x256xf32>
    %c66 = arith.constant 66 : index
    %c0_73 = arith.constant 0 : index
    %204 = vector.load %arg4[%c66, %c0_73] : memref<98x256xf32, #tpu.memory_space<vmem>>, vector<1x256xf32>
    %205 = vector.broadcast %203 : vector<1x256xf32> to vector<2x256xf32>
    %206 = arith.mulf %201, %205 : vector<2x256xf32>
    %207 = arith.addf %187, %206 : vector<2x256xf32>
    %208 = vector.broadcast %204 : vector<1x256xf32> to vector<2x256xf32>
    %209 = arith.mulf %202, %208 : vector<2x256xf32>
    %210 = arith.addf %190, %209 : vector<2x256xf32>
    %c15_i32 = arith.constant 15 : i32
    %211 = tpu.dynamic_rotate %25 by %c15_i32 dim 1 : vector<2x256xf32>, i32 -> vector<2x256xf32>
    %c15_i32_74 = arith.constant 15 : i32
    %212 = tpu.dynamic_rotate %26 by %c15_i32_74 dim 1 : vector<2x256xf32>, i32 -> vector<2x256xf32>
    %c18 = arith.constant 18 : index
    %c0_75 = arith.constant 0 : index
    %213 = vector.load %arg4[%c18, %c0_75] : memref<98x256xf32, #tpu.memory_space<vmem>>, vector<1x256xf32>
    %c67 = arith.constant 67 : index
    %c0_76 = arith.constant 0 : index
    %214 = vector.load %arg4[%c67, %c0_76] : memref<98x256xf32, #tpu.memory_space<vmem>>, vector<1x256xf32>
    %215 = vector.broadcast %213 : vector<1x256xf32> to vector<2x256xf32>
    %216 = arith.mulf %211, %215 : vector<2x256xf32>
    %217 = arith.addf %197, %216 : vector<2x256xf32>
    %218 = vector.broadcast %214 : vector<1x256xf32> to vector<2x256xf32>
    %219 = arith.mulf %212, %218 : vector<2x256xf32>
    %220 = arith.addf %200, %219 : vector<2x256xf32>
    %c14_i32 = arith.constant 14 : i32
    %221 = tpu.dynamic_rotate %25 by %c14_i32 dim 1 : vector<2x256xf32>, i32 -> vector<2x256xf32>
    %c14_i32_77 = arith.constant 14 : i32
    %222 = tpu.dynamic_rotate %26 by %c14_i32_77 dim 1 : vector<2x256xf32>, i32 -> vector<2x256xf32>
    %c19 = arith.constant 19 : index
    %c0_78 = arith.constant 0 : index
    %223 = vector.load %arg4[%c19, %c0_78] : memref<98x256xf32, #tpu.memory_space<vmem>>, vector<1x256xf32>
    %c68 = arith.constant 68 : index
    %c0_79 = arith.constant 0 : index
    %224 = vector.load %arg4[%c68, %c0_79] : memref<98x256xf32, #tpu.memory_space<vmem>>, vector<1x256xf32>
    %225 = vector.broadcast %223 : vector<1x256xf32> to vector<2x256xf32>
    %226 = arith.mulf %221, %225 : vector<2x256xf32>
    %227 = arith.addf %207, %226 : vector<2x256xf32>
    %228 = vector.broadcast %224 : vector<1x256xf32> to vector<2x256xf32>
    %229 = arith.mulf %222, %228 : vector<2x256xf32>
    %230 = arith.addf %210, %229 : vector<2x256xf32>
    %c13_i32 = arith.constant 13 : i32
    %231 = tpu.dynamic_rotate %25 by %c13_i32 dim 1 : vector<2x256xf32>, i32 -> vector<2x256xf32>
    %c13_i32_80 = arith.constant 13 : i32
    %232 = tpu.dynamic_rotate %26 by %c13_i32_80 dim 1 : vector<2x256xf32>, i32 -> vector<2x256xf32>
    %c20 = arith.constant 20 : index
    %c0_81 = arith.constant 0 : index
    %233 = vector.load %arg4[%c20, %c0_81] : memref<98x256xf32, #tpu.memory_space<vmem>>, vector<1x256xf32>
    %c69 = arith.constant 69 : index
    %c0_82 = arith.constant 0 : index
    %234 = vector.load %arg4[%c69, %c0_82] : memref<98x256xf32, #tpu.memory_space<vmem>>, vector<1x256xf32>
    %235 = vector.broadcast %233 : vector<1x256xf32> to vector<2x256xf32>
    %236 = arith.mulf %231, %235 : vector<2x256xf32>
    %237 = arith.addf %217, %236 : vector<2x256xf32>
    %238 = vector.broadcast %234 : vector<1x256xf32> to vector<2x256xf32>
    %239 = arith.mulf %232, %238 : vector<2x256xf32>
    %240 = arith.addf %220, %239 : vector<2x256xf32>
    %c3_i32 = arith.constant 3 : i32
    %241 = tpu.dynamic_rotate %25 by %c3_i32 dim 1 : vector<2x256xf32>, i32 -> vector<2x256xf32>
    %c3_i32_83 = arith.constant 3 : i32
    %242 = tpu.dynamic_rotate %26 by %c3_i32_83 dim 1 : vector<2x256xf32>, i32 -> vector<2x256xf32>
    %c21 = arith.constant 21 : index
    %c0_84 = arith.constant 0 : index
    %243 = vector.load %arg4[%c21, %c0_84] : memref<98x256xf32, #tpu.memory_space<vmem>>, vector<1x256xf32>
    %c70 = arith.constant 70 : index
    %c0_85 = arith.constant 0 : index
    %244 = vector.load %arg4[%c70, %c0_85] : memref<98x256xf32, #tpu.memory_space<vmem>>, vector<1x256xf32>
    %245 = vector.broadcast %243 : vector<1x256xf32> to vector<2x256xf32>
    %246 = arith.mulf %241, %245 : vector<2x256xf32>
    %247 = arith.addf %227, %246 : vector<2x256xf32>
    %248 = vector.broadcast %244 : vector<1x256xf32> to vector<2x256xf32>
    %249 = arith.mulf %242, %248 : vector<2x256xf32>
    %250 = arith.addf %230, %249 : vector<2x256xf32>
    %c2_i32 = arith.constant 2 : i32
    %251 = tpu.dynamic_rotate %25 by %c2_i32 dim 1 : vector<2x256xf32>, i32 -> vector<2x256xf32>
    %c2_i32_86 = arith.constant 2 : i32
    %252 = tpu.dynamic_rotate %26 by %c2_i32_86 dim 1 : vector<2x256xf32>, i32 -> vector<2x256xf32>
    %c22 = arith.constant 22 : index
    %c0_87 = arith.constant 0 : index
    %253 = vector.load %arg4[%c22, %c0_87] : memref<98x256xf32, #tpu.memory_space<vmem>>, vector<1x256xf32>
    %c71 = arith.constant 71 : index
    %c0_88 = arith.constant 0 : index
    %254 = vector.load %arg4[%c71, %c0_88] : memref<98x256xf32, #tpu.memory_space<vmem>>, vector<1x256xf32>
    %255 = vector.broadcast %253 : vector<1x256xf32> to vector<2x256xf32>
    %256 = arith.mulf %251, %255 : vector<2x256xf32>
    %257 = arith.addf %237, %256 : vector<2x256xf32>
    %258 = vector.broadcast %254 : vector<1x256xf32> to vector<2x256xf32>
    %259 = arith.mulf %252, %258 : vector<2x256xf32>
    %260 = arith.addf %240, %259 : vector<2x256xf32>
    %c1_i32 = arith.constant 1 : i32
    %261 = tpu.dynamic_rotate %25 by %c1_i32 dim 1 : vector<2x256xf32>, i32 -> vector<2x256xf32>
    %c1_i32_89 = arith.constant 1 : i32
    %262 = tpu.dynamic_rotate %26 by %c1_i32_89 dim 1 : vector<2x256xf32>, i32 -> vector<2x256xf32>
    %c23 = arith.constant 23 : index
    %c0_90 = arith.constant 0 : index
    %263 = vector.load %arg4[%c23, %c0_90] : memref<98x256xf32, #tpu.memory_space<vmem>>, vector<1x256xf32>
    %c72 = arith.constant 72 : index
    %c0_91 = arith.constant 0 : index
    %264 = vector.load %arg4[%c72, %c0_91] : memref<98x256xf32, #tpu.memory_space<vmem>>, vector<1x256xf32>
    %265 = vector.broadcast %263 : vector<1x256xf32> to vector<2x256xf32>
    %266 = arith.mulf %261, %265 : vector<2x256xf32>
    %267 = arith.addf %247, %266 : vector<2x256xf32>
    %268 = vector.broadcast %264 : vector<1x256xf32> to vector<2x256xf32>
    %269 = arith.mulf %262, %268 : vector<2x256xf32>
    %270 = arith.addf %250, %269 : vector<2x256xf32>
    %c24 = arith.constant 24 : index
    %c0_92 = arith.constant 0 : index
    %271 = vector.load %arg4[%c24, %c0_92] : memref<98x256xf32, #tpu.memory_space<vmem>>, vector<1x256xf32>
    %c73 = arith.constant 73 : index
    %c0_93 = arith.constant 0 : index
    %272 = vector.load %arg4[%c73, %c0_93] : memref<98x256xf32, #tpu.memory_space<vmem>>, vector<1x256xf32>
    %273 = vector.broadcast %271 : vector<1x256xf32> to vector<2x256xf32>
    %274 = arith.mulf %25, %273 : vector<2x256xf32>
    %275 = arith.addf %257, %274 : vector<2x256xf32>
    %276 = vector.broadcast %272 : vector<1x256xf32> to vector<2x256xf32>
    %277 = arith.mulf %26, %276 : vector<2x256xf32>
    %278 = arith.addf %260, %277 : vector<2x256xf32>
    %c255_i32 = arith.constant 255 : i32
    %279 = tpu.dynamic_rotate %25 by %c255_i32 dim 1 : vector<2x256xf32>, i32 -> vector<2x256xf32>
    %c255_i32_94 = arith.constant 255 : i32
    %280 = tpu.dynamic_rotate %26 by %c255_i32_94 dim 1 : vector<2x256xf32>, i32 -> vector<2x256xf32>
    %c25 = arith.constant 25 : index
    %c0_95 = arith.constant 0 : index
    %281 = vector.load %arg4[%c25, %c0_95] : memref<98x256xf32, #tpu.memory_space<vmem>>, vector<1x256xf32>
    %c74 = arith.constant 74 : index
    %c0_96 = arith.constant 0 : index
    %282 = vector.load %arg4[%c74, %c0_96] : memref<98x256xf32, #tpu.memory_space<vmem>>, vector<1x256xf32>
    %283 = vector.broadcast %281 : vector<1x256xf32> to vector<2x256xf32>
    %284 = arith.mulf %279, %283 : vector<2x256xf32>
    %285 = arith.addf %267, %284 : vector<2x256xf32>
    %286 = vector.broadcast %282 : vector<1x256xf32> to vector<2x256xf32>
    %287 = arith.mulf %280, %286 : vector<2x256xf32>
    %288 = arith.addf %270, %287 : vector<2x256xf32>
    %c254_i32 = arith.constant 254 : i32
    %289 = tpu.dynamic_rotate %25 by %c254_i32 dim 1 : vector<2x256xf32>, i32 -> vector<2x256xf32>
    %c254_i32_97 = arith.constant 254 : i32
    %290 = tpu.dynamic_rotate %26 by %c254_i32_97 dim 1 : vector<2x256xf32>, i32 -> vector<2x256xf32>
    %c26 = arith.constant 26 : index
    %c0_98 = arith.constant 0 : index
    %291 = vector.load %arg4[%c26, %c0_98] : memref<98x256xf32, #tpu.memory_space<vmem>>, vector<1x256xf32>
    %c75 = arith.constant 75 : index
    %c0_99 = arith.constant 0 : index
    %292 = vector.load %arg4[%c75, %c0_99] : memref<98x256xf32, #tpu.memory_space<vmem>>, vector<1x256xf32>
    %293 = vector.broadcast %291 : vector<1x256xf32> to vector<2x256xf32>
    %294 = arith.mulf %289, %293 : vector<2x256xf32>
    %295 = arith.addf %275, %294 : vector<2x256xf32>
    %296 = vector.broadcast %292 : vector<1x256xf32> to vector<2x256xf32>
    %297 = arith.mulf %290, %296 : vector<2x256xf32>
    %298 = arith.addf %278, %297 : vector<2x256xf32>
    %c253_i32 = arith.constant 253 : i32
    %299 = tpu.dynamic_rotate %25 by %c253_i32 dim 1 : vector<2x256xf32>, i32 -> vector<2x256xf32>
    %c253_i32_100 = arith.constant 253 : i32
    %300 = tpu.dynamic_rotate %26 by %c253_i32_100 dim 1 : vector<2x256xf32>, i32 -> vector<2x256xf32>
    %c27 = arith.constant 27 : index
    %c0_101 = arith.constant 0 : index
    %301 = vector.load %arg4[%c27, %c0_101] : memref<98x256xf32, #tpu.memory_space<vmem>>, vector<1x256xf32>
    %c76 = arith.constant 76 : index
    %c0_102 = arith.constant 0 : index
    %302 = vector.load %arg4[%c76, %c0_102] : memref<98x256xf32, #tpu.memory_space<vmem>>, vector<1x256xf32>
    %303 = vector.broadcast %301 : vector<1x256xf32> to vector<2x256xf32>
    %304 = arith.mulf %299, %303 : vector<2x256xf32>
    %305 = arith.addf %285, %304 : vector<2x256xf32>
    %306 = vector.broadcast %302 : vector<1x256xf32> to vector<2x256xf32>
    %307 = arith.mulf %300, %306 : vector<2x256xf32>
    %308 = arith.addf %288, %307 : vector<2x256xf32>
    %c243_i32 = arith.constant 243 : i32
    %309 = tpu.dynamic_rotate %25 by %c243_i32 dim 1 : vector<2x256xf32>, i32 -> vector<2x256xf32>
    %c243_i32_103 = arith.constant 243 : i32
    %310 = tpu.dynamic_rotate %26 by %c243_i32_103 dim 1 : vector<2x256xf32>, i32 -> vector<2x256xf32>
    %c28 = arith.constant 28 : index
    %c0_104 = arith.constant 0 : index
    %311 = vector.load %arg4[%c28, %c0_104] : memref<98x256xf32, #tpu.memory_space<vmem>>, vector<1x256xf32>
    %c77 = arith.constant 77 : index
    %c0_105 = arith.constant 0 : index
    %312 = vector.load %arg4[%c77, %c0_105] : memref<98x256xf32, #tpu.memory_space<vmem>>, vector<1x256xf32>
    %313 = vector.broadcast %311 : vector<1x256xf32> to vector<2x256xf32>
    %314 = arith.mulf %309, %313 : vector<2x256xf32>
    %315 = arith.addf %295, %314 : vector<2x256xf32>
    %316 = vector.broadcast %312 : vector<1x256xf32> to vector<2x256xf32>
    %317 = arith.mulf %310, %316 : vector<2x256xf32>
    %318 = arith.addf %298, %317 : vector<2x256xf32>
    %c242_i32 = arith.constant 242 : i32
    %319 = tpu.dynamic_rotate %25 by %c242_i32 dim 1 : vector<2x256xf32>, i32 -> vector<2x256xf32>
    %c242_i32_106 = arith.constant 242 : i32
    %320 = tpu.dynamic_rotate %26 by %c242_i32_106 dim 1 : vector<2x256xf32>, i32 -> vector<2x256xf32>
    %c29 = arith.constant 29 : index
    %c0_107 = arith.constant 0 : index
    %321 = vector.load %arg4[%c29, %c0_107] : memref<98x256xf32, #tpu.memory_space<vmem>>, vector<1x256xf32>
    %c78 = arith.constant 78 : index
    %c0_108 = arith.constant 0 : index
    %322 = vector.load %arg4[%c78, %c0_108] : memref<98x256xf32, #tpu.memory_space<vmem>>, vector<1x256xf32>
    %323 = vector.broadcast %321 : vector<1x256xf32> to vector<2x256xf32>
    %324 = arith.mulf %319, %323 : vector<2x256xf32>
    %325 = arith.addf %305, %324 : vector<2x256xf32>
    %326 = vector.broadcast %322 : vector<1x256xf32> to vector<2x256xf32>
    %327 = arith.mulf %320, %326 : vector<2x256xf32>
    %328 = arith.addf %308, %327 : vector<2x256xf32>
    %c241_i32 = arith.constant 241 : i32
    %329 = tpu.dynamic_rotate %25 by %c241_i32 dim 1 : vector<2x256xf32>, i32 -> vector<2x256xf32>
    %c241_i32_109 = arith.constant 241 : i32
    %330 = tpu.dynamic_rotate %26 by %c241_i32_109 dim 1 : vector<2x256xf32>, i32 -> vector<2x256xf32>
    %c30 = arith.constant 30 : index
    %c0_110 = arith.constant 0 : index
    %331 = vector.load %arg4[%c30, %c0_110] : memref<98x256xf32, #tpu.memory_space<vmem>>, vector<1x256xf32>
    %c79 = arith.constant 79 : index
    %c0_111 = arith.constant 0 : index
    %332 = vector.load %arg4[%c79, %c0_111] : memref<98x256xf32, #tpu.memory_space<vmem>>, vector<1x256xf32>
    %333 = vector.broadcast %331 : vector<1x256xf32> to vector<2x256xf32>
    %334 = arith.mulf %329, %333 : vector<2x256xf32>
    %335 = arith.addf %315, %334 : vector<2x256xf32>
    %336 = vector.broadcast %332 : vector<1x256xf32> to vector<2x256xf32>
    %337 = arith.mulf %330, %336 : vector<2x256xf32>
    %338 = arith.addf %318, %337 : vector<2x256xf32>
    %c240_i32 = arith.constant 240 : i32
    %339 = tpu.dynamic_rotate %25 by %c240_i32 dim 1 : vector<2x256xf32>, i32 -> vector<2x256xf32>
    %c240_i32_112 = arith.constant 240 : i32
    %340 = tpu.dynamic_rotate %26 by %c240_i32_112 dim 1 : vector<2x256xf32>, i32 -> vector<2x256xf32>
    %c31 = arith.constant 31 : index
    %c0_113 = arith.constant 0 : index
    %341 = vector.load %arg4[%c31, %c0_113] : memref<98x256xf32, #tpu.memory_space<vmem>>, vector<1x256xf32>
    %c80 = arith.constant 80 : index
    %c0_114 = arith.constant 0 : index
    %342 = vector.load %arg4[%c80, %c0_114] : memref<98x256xf32, #tpu.memory_space<vmem>>, vector<1x256xf32>
    %343 = vector.broadcast %341 : vector<1x256xf32> to vector<2x256xf32>
    %344 = arith.mulf %339, %343 : vector<2x256xf32>
    %345 = arith.addf %325, %344 : vector<2x256xf32>
    %346 = vector.broadcast %342 : vector<1x256xf32> to vector<2x256xf32>
    %347 = arith.mulf %340, %346 : vector<2x256xf32>
    %348 = arith.addf %328, %347 : vector<2x256xf32>
    %c239_i32 = arith.constant 239 : i32
    %349 = tpu.dynamic_rotate %25 by %c239_i32 dim 1 : vector<2x256xf32>, i32 -> vector<2x256xf32>
    %c239_i32_115 = arith.constant 239 : i32
    %350 = tpu.dynamic_rotate %26 by %c239_i32_115 dim 1 : vector<2x256xf32>, i32 -> vector<2x256xf32>
    %c32 = arith.constant 32 : index
    %c0_116 = arith.constant 0 : index
    %351 = vector.load %arg4[%c32, %c0_116] : memref<98x256xf32, #tpu.memory_space<vmem>>, vector<1x256xf32>
    %c81 = arith.constant 81 : index
    %c0_117 = arith.constant 0 : index
    %352 = vector.load %arg4[%c81, %c0_117] : memref<98x256xf32, #tpu.memory_space<vmem>>, vector<1x256xf32>
    %353 = vector.broadcast %351 : vector<1x256xf32> to vector<2x256xf32>
    %354 = arith.mulf %349, %353 : vector<2x256xf32>
    %355 = arith.addf %335, %354 : vector<2x256xf32>
    %356 = vector.broadcast %352 : vector<1x256xf32> to vector<2x256xf32>
    %357 = arith.mulf %350, %356 : vector<2x256xf32>
    %358 = arith.addf %338, %357 : vector<2x256xf32>
    %c238_i32 = arith.constant 238 : i32
    %359 = tpu.dynamic_rotate %25 by %c238_i32 dim 1 : vector<2x256xf32>, i32 -> vector<2x256xf32>
    %c238_i32_118 = arith.constant 238 : i32
    %360 = tpu.dynamic_rotate %26 by %c238_i32_118 dim 1 : vector<2x256xf32>, i32 -> vector<2x256xf32>
    %c33 = arith.constant 33 : index
    %c0_119 = arith.constant 0 : index
    %361 = vector.load %arg4[%c33, %c0_119] : memref<98x256xf32, #tpu.memory_space<vmem>>, vector<1x256xf32>
    %c82 = arith.constant 82 : index
    %c0_120 = arith.constant 0 : index
    %362 = vector.load %arg4[%c82, %c0_120] : memref<98x256xf32, #tpu.memory_space<vmem>>, vector<1x256xf32>
    %363 = vector.broadcast %361 : vector<1x256xf32> to vector<2x256xf32>
    %364 = arith.mulf %359, %363 : vector<2x256xf32>
    %365 = arith.addf %345, %364 : vector<2x256xf32>
    %366 = vector.broadcast %362 : vector<1x256xf32> to vector<2x256xf32>
    %367 = arith.mulf %360, %366 : vector<2x256xf32>
    %368 = arith.addf %348, %367 : vector<2x256xf32>
    %c237_i32 = arith.constant 237 : i32
    %369 = tpu.dynamic_rotate %25 by %c237_i32 dim 1 : vector<2x256xf32>, i32 -> vector<2x256xf32>
    %c237_i32_121 = arith.constant 237 : i32
    %370 = tpu.dynamic_rotate %26 by %c237_i32_121 dim 1 : vector<2x256xf32>, i32 -> vector<2x256xf32>
    %c34 = arith.constant 34 : index
    %c0_122 = arith.constant 0 : index
    %371 = vector.load %arg4[%c34, %c0_122] : memref<98x256xf32, #tpu.memory_space<vmem>>, vector<1x256xf32>
    %c83 = arith.constant 83 : index
    %c0_123 = arith.constant 0 : index
    %372 = vector.load %arg4[%c83, %c0_123] : memref<98x256xf32, #tpu.memory_space<vmem>>, vector<1x256xf32>
    %373 = vector.broadcast %371 : vector<1x256xf32> to vector<2x256xf32>
    %374 = arith.mulf %369, %373 : vector<2x256xf32>
    %375 = arith.addf %355, %374 : vector<2x256xf32>
    %376 = vector.broadcast %372 : vector<1x256xf32> to vector<2x256xf32>
    %377 = arith.mulf %370, %376 : vector<2x256xf32>
    %378 = arith.addf %358, %377 : vector<2x256xf32>
    %c227_i32 = arith.constant 227 : i32
    %379 = tpu.dynamic_rotate %25 by %c227_i32 dim 1 : vector<2x256xf32>, i32 -> vector<2x256xf32>
    %c227_i32_124 = arith.constant 227 : i32
    %380 = tpu.dynamic_rotate %26 by %c227_i32_124 dim 1 : vector<2x256xf32>, i32 -> vector<2x256xf32>
    %c35 = arith.constant 35 : index
    %c0_125 = arith.constant 0 : index
    %381 = vector.load %arg4[%c35, %c0_125] : memref<98x256xf32, #tpu.memory_space<vmem>>, vector<1x256xf32>
    %c84 = arith.constant 84 : index
    %c0_126 = arith.constant 0 : index
    %382 = vector.load %arg4[%c84, %c0_126] : memref<98x256xf32, #tpu.memory_space<vmem>>, vector<1x256xf32>
    %383 = vector.broadcast %381 : vector<1x256xf32> to vector<2x256xf32>
    %384 = arith.mulf %379, %383 : vector<2x256xf32>
    %385 = arith.addf %365, %384 : vector<2x256xf32>
    %386 = vector.broadcast %382 : vector<1x256xf32> to vector<2x256xf32>
    %387 = arith.mulf %380, %386 : vector<2x256xf32>
    %388 = arith.addf %368, %387 : vector<2x256xf32>
    %c226_i32 = arith.constant 226 : i32
    %389 = tpu.dynamic_rotate %25 by %c226_i32 dim 1 : vector<2x256xf32>, i32 -> vector<2x256xf32>
    %c226_i32_127 = arith.constant 226 : i32
    %390 = tpu.dynamic_rotate %26 by %c226_i32_127 dim 1 : vector<2x256xf32>, i32 -> vector<2x256xf32>
    %c36 = arith.constant 36 : index
    %c0_128 = arith.constant 0 : index
    %391 = vector.load %arg4[%c36, %c0_128] : memref<98x256xf32, #tpu.memory_space<vmem>>, vector<1x256xf32>
    %c85 = arith.constant 85 : index
    %c0_129 = arith.constant 0 : index
    %392 = vector.load %arg4[%c85, %c0_129] : memref<98x256xf32, #tpu.memory_space<vmem>>, vector<1x256xf32>
    %393 = vector.broadcast %391 : vector<1x256xf32> to vector<2x256xf32>
    %394 = arith.mulf %389, %393 : vector<2x256xf32>
    %395 = arith.addf %375, %394 : vector<2x256xf32>
    %396 = vector.broadcast %392 : vector<1x256xf32> to vector<2x256xf32>
    %397 = arith.mulf %390, %396 : vector<2x256xf32>
    %398 = arith.addf %378, %397 : vector<2x256xf32>
    %c225_i32 = arith.constant 225 : i32
    %399 = tpu.dynamic_rotate %25 by %c225_i32 dim 1 : vector<2x256xf32>, i32 -> vector<2x256xf32>
    %c225_i32_130 = arith.constant 225 : i32
    %400 = tpu.dynamic_rotate %26 by %c225_i32_130 dim 1 : vector<2x256xf32>, i32 -> vector<2x256xf32>
    %c37 = arith.constant 37 : index
    %c0_131 = arith.constant 0 : index
    %401 = vector.load %arg4[%c37, %c0_131] : memref<98x256xf32, #tpu.memory_space<vmem>>, vector<1x256xf32>
    %c86 = arith.constant 86 : index
    %c0_132 = arith.constant 0 : index
    %402 = vector.load %arg4[%c86, %c0_132] : memref<98x256xf32, #tpu.memory_space<vmem>>, vector<1x256xf32>
    %403 = vector.broadcast %401 : vector<1x256xf32> to vector<2x256xf32>
    %404 = arith.mulf %399, %403 : vector<2x256xf32>
    %405 = arith.addf %385, %404 : vector<2x256xf32>
    %406 = vector.broadcast %402 : vector<1x256xf32> to vector<2x256xf32>
    %407 = arith.mulf %400, %406 : vector<2x256xf32>
    %408 = arith.addf %388, %407 : vector<2x256xf32>
    %c224_i32 = arith.constant 224 : i32
    %409 = tpu.dynamic_rotate %25 by %c224_i32 dim 1 : vector<2x256xf32>, i32 -> vector<2x256xf32>
    %c224_i32_133 = arith.constant 224 : i32
    %410 = tpu.dynamic_rotate %26 by %c224_i32_133 dim 1 : vector<2x256xf32>, i32 -> vector<2x256xf32>
    %c38 = arith.constant 38 : index
    %c0_134 = arith.constant 0 : index
    %411 = vector.load %arg4[%c38, %c0_134] : memref<98x256xf32, #tpu.memory_space<vmem>>, vector<1x256xf32>
    %c87 = arith.constant 87 : index
    %c0_135 = arith.constant 0 : index
    %412 = vector.load %arg4[%c87, %c0_135] : memref<98x256xf32, #tpu.memory_space<vmem>>, vector<1x256xf32>
    %413 = vector.broadcast %411 : vector<1x256xf32> to vector<2x256xf32>
    %414 = arith.mulf %409, %413 : vector<2x256xf32>
    %415 = arith.addf %395, %414 : vector<2x256xf32>
    %416 = vector.broadcast %412 : vector<1x256xf32> to vector<2x256xf32>
    %417 = arith.mulf %410, %416 : vector<2x256xf32>
    %418 = arith.addf %398, %417 : vector<2x256xf32>
    %c223_i32 = arith.constant 223 : i32
    %419 = tpu.dynamic_rotate %25 by %c223_i32 dim 1 : vector<2x256xf32>, i32 -> vector<2x256xf32>
    %c223_i32_136 = arith.constant 223 : i32
    %420 = tpu.dynamic_rotate %26 by %c223_i32_136 dim 1 : vector<2x256xf32>, i32 -> vector<2x256xf32>
    %c39 = arith.constant 39 : index
    %c0_137 = arith.constant 0 : index
    %421 = vector.load %arg4[%c39, %c0_137] : memref<98x256xf32, #tpu.memory_space<vmem>>, vector<1x256xf32>
    %c88 = arith.constant 88 : index
    %c0_138 = arith.constant 0 : index
    %422 = vector.load %arg4[%c88, %c0_138] : memref<98x256xf32, #tpu.memory_space<vmem>>, vector<1x256xf32>
    %423 = vector.broadcast %421 : vector<1x256xf32> to vector<2x256xf32>
    %424 = arith.mulf %419, %423 : vector<2x256xf32>
    %425 = arith.addf %405, %424 : vector<2x256xf32>
    %426 = vector.broadcast %422 : vector<1x256xf32> to vector<2x256xf32>
    %427 = arith.mulf %420, %426 : vector<2x256xf32>
    %428 = arith.addf %408, %427 : vector<2x256xf32>
    %c222_i32 = arith.constant 222 : i32
    %429 = tpu.dynamic_rotate %25 by %c222_i32 dim 1 : vector<2x256xf32>, i32 -> vector<2x256xf32>
    %c222_i32_139 = arith.constant 222 : i32
    %430 = tpu.dynamic_rotate %26 by %c222_i32_139 dim 1 : vector<2x256xf32>, i32 -> vector<2x256xf32>
    %c40 = arith.constant 40 : index
    %c0_140 = arith.constant 0 : index
    %431 = vector.load %arg4[%c40, %c0_140] : memref<98x256xf32, #tpu.memory_space<vmem>>, vector<1x256xf32>
    %c89 = arith.constant 89 : index
    %c0_141 = arith.constant 0 : index
    %432 = vector.load %arg4[%c89, %c0_141] : memref<98x256xf32, #tpu.memory_space<vmem>>, vector<1x256xf32>
    %433 = vector.broadcast %431 : vector<1x256xf32> to vector<2x256xf32>
    %434 = arith.mulf %429, %433 : vector<2x256xf32>
    %435 = arith.addf %415, %434 : vector<2x256xf32>
    %436 = vector.broadcast %432 : vector<1x256xf32> to vector<2x256xf32>
    %437 = arith.mulf %430, %436 : vector<2x256xf32>
    %438 = arith.addf %418, %437 : vector<2x256xf32>
    %c221_i32 = arith.constant 221 : i32
    %439 = tpu.dynamic_rotate %25 by %c221_i32 dim 1 : vector<2x256xf32>, i32 -> vector<2x256xf32>
    %c221_i32_142 = arith.constant 221 : i32
    %440 = tpu.dynamic_rotate %26 by %c221_i32_142 dim 1 : vector<2x256xf32>, i32 -> vector<2x256xf32>
    %c41 = arith.constant 41 : index
    %c0_143 = arith.constant 0 : index
    %441 = vector.load %arg4[%c41, %c0_143] : memref<98x256xf32, #tpu.memory_space<vmem>>, vector<1x256xf32>
    %c90 = arith.constant 90 : index
    %c0_144 = arith.constant 0 : index
    %442 = vector.load %arg4[%c90, %c0_144] : memref<98x256xf32, #tpu.memory_space<vmem>>, vector<1x256xf32>
    %443 = vector.broadcast %441 : vector<1x256xf32> to vector<2x256xf32>
    %444 = arith.mulf %439, %443 : vector<2x256xf32>
    %445 = arith.addf %425, %444 : vector<2x256xf32>
    %446 = vector.broadcast %442 : vector<1x256xf32> to vector<2x256xf32>
    %447 = arith.mulf %440, %446 : vector<2x256xf32>
    %448 = arith.addf %428, %447 : vector<2x256xf32>
    %c211_i32 = arith.constant 211 : i32
    %449 = tpu.dynamic_rotate %25 by %c211_i32 dim 1 : vector<2x256xf32>, i32 -> vector<2x256xf32>
    %c211_i32_145 = arith.constant 211 : i32
    %450 = tpu.dynamic_rotate %26 by %c211_i32_145 dim 1 : vector<2x256xf32>, i32 -> vector<2x256xf32>
    %c42 = arith.constant 42 : index
    %c0_146 = arith.constant 0 : index
    %451 = vector.load %arg4[%c42, %c0_146] : memref<98x256xf32, #tpu.memory_space<vmem>>, vector<1x256xf32>
    %c91 = arith.constant 91 : index
    %c0_147 = arith.constant 0 : index
    %452 = vector.load %arg4[%c91, %c0_147] : memref<98x256xf32, #tpu.memory_space<vmem>>, vector<1x256xf32>
    %453 = vector.broadcast %451 : vector<1x256xf32> to vector<2x256xf32>
    %454 = arith.mulf %449, %453 : vector<2x256xf32>
    %455 = arith.addf %435, %454 : vector<2x256xf32>
    %456 = vector.broadcast %452 : vector<1x256xf32> to vector<2x256xf32>
    %457 = arith.mulf %450, %456 : vector<2x256xf32>
    %458 = arith.addf %438, %457 : vector<2x256xf32>
    %c210_i32 = arith.constant 210 : i32
    %459 = tpu.dynamic_rotate %25 by %c210_i32 dim 1 : vector<2x256xf32>, i32 -> vector<2x256xf32>
    %c210_i32_148 = arith.constant 210 : i32
    %460 = tpu.dynamic_rotate %26 by %c210_i32_148 dim 1 : vector<2x256xf32>, i32 -> vector<2x256xf32>
    %c43 = arith.constant 43 : index
    %c0_149 = arith.constant 0 : index
    %461 = vector.load %arg4[%c43, %c0_149] : memref<98x256xf32, #tpu.memory_space<vmem>>, vector<1x256xf32>
    %c92 = arith.constant 92 : index
    %c0_150 = arith.constant 0 : index
    %462 = vector.load %arg4[%c92, %c0_150] : memref<98x256xf32, #tpu.memory_space<vmem>>, vector<1x256xf32>
    %463 = vector.broadcast %461 : vector<1x256xf32> to vector<2x256xf32>
    %464 = arith.mulf %459, %463 : vector<2x256xf32>
    %465 = arith.addf %445, %464 : vector<2x256xf32>
    %466 = vector.broadcast %462 : vector<1x256xf32> to vector<2x256xf32>
    %467 = arith.mulf %460, %466 : vector<2x256xf32>
    %468 = arith.addf %448, %467 : vector<2x256xf32>
    %c209_i32 = arith.constant 209 : i32
    %469 = tpu.dynamic_rotate %25 by %c209_i32 dim 1 : vector<2x256xf32>, i32 -> vector<2x256xf32>
    %c209_i32_151 = arith.constant 209 : i32
    %470 = tpu.dynamic_rotate %26 by %c209_i32_151 dim 1 : vector<2x256xf32>, i32 -> vector<2x256xf32>
    %c44 = arith.constant 44 : index
    %c0_152 = arith.constant 0 : index
    %471 = vector.load %arg4[%c44, %c0_152] : memref<98x256xf32, #tpu.memory_space<vmem>>, vector<1x256xf32>
    %c93 = arith.constant 93 : index
    %c0_153 = arith.constant 0 : index
    %472 = vector.load %arg4[%c93, %c0_153] : memref<98x256xf32, #tpu.memory_space<vmem>>, vector<1x256xf32>
    %473 = vector.broadcast %471 : vector<1x256xf32> to vector<2x256xf32>
    %474 = arith.mulf %469, %473 : vector<2x256xf32>
    %475 = arith.addf %455, %474 : vector<2x256xf32>
    %476 = vector.broadcast %472 : vector<1x256xf32> to vector<2x256xf32>
    %477 = arith.mulf %470, %476 : vector<2x256xf32>
    %478 = arith.addf %458, %477 : vector<2x256xf32>
    %c208_i32 = arith.constant 208 : i32
    %479 = tpu.dynamic_rotate %25 by %c208_i32 dim 1 : vector<2x256xf32>, i32 -> vector<2x256xf32>
    %c208_i32_154 = arith.constant 208 : i32
    %480 = tpu.dynamic_rotate %26 by %c208_i32_154 dim 1 : vector<2x256xf32>, i32 -> vector<2x256xf32>
    %c45 = arith.constant 45 : index
    %c0_155 = arith.constant 0 : index
    %481 = vector.load %arg4[%c45, %c0_155] : memref<98x256xf32, #tpu.memory_space<vmem>>, vector<1x256xf32>
    %c94 = arith.constant 94 : index
    %c0_156 = arith.constant 0 : index
    %482 = vector.load %arg4[%c94, %c0_156] : memref<98x256xf32, #tpu.memory_space<vmem>>, vector<1x256xf32>
    %483 = vector.broadcast %481 : vector<1x256xf32> to vector<2x256xf32>
    %484 = arith.mulf %479, %483 : vector<2x256xf32>
    %485 = arith.addf %465, %484 : vector<2x256xf32>
    %486 = vector.broadcast %482 : vector<1x256xf32> to vector<2x256xf32>
    %487 = arith.mulf %480, %486 : vector<2x256xf32>
    %488 = arith.addf %468, %487 : vector<2x256xf32>
    %c207_i32 = arith.constant 207 : i32
    %489 = tpu.dynamic_rotate %25 by %c207_i32 dim 1 : vector<2x256xf32>, i32 -> vector<2x256xf32>
    %c207_i32_157 = arith.constant 207 : i32
    %490 = tpu.dynamic_rotate %26 by %c207_i32_157 dim 1 : vector<2x256xf32>, i32 -> vector<2x256xf32>
    %c46 = arith.constant 46 : index
    %c0_158 = arith.constant 0 : index
    %491 = vector.load %arg4[%c46, %c0_158] : memref<98x256xf32, #tpu.memory_space<vmem>>, vector<1x256xf32>
    %c95 = arith.constant 95 : index
    %c0_159 = arith.constant 0 : index
    %492 = vector.load %arg4[%c95, %c0_159] : memref<98x256xf32, #tpu.memory_space<vmem>>, vector<1x256xf32>
    %493 = vector.broadcast %491 : vector<1x256xf32> to vector<2x256xf32>
    %494 = arith.mulf %489, %493 : vector<2x256xf32>
    %495 = arith.addf %475, %494 : vector<2x256xf32>
    %496 = vector.broadcast %492 : vector<1x256xf32> to vector<2x256xf32>
    %497 = arith.mulf %490, %496 : vector<2x256xf32>
    %498 = arith.addf %478, %497 : vector<2x256xf32>
    %c206_i32 = arith.constant 206 : i32
    %499 = tpu.dynamic_rotate %25 by %c206_i32 dim 1 : vector<2x256xf32>, i32 -> vector<2x256xf32>
    %c206_i32_160 = arith.constant 206 : i32
    %500 = tpu.dynamic_rotate %26 by %c206_i32_160 dim 1 : vector<2x256xf32>, i32 -> vector<2x256xf32>
    %c47 = arith.constant 47 : index
    %c0_161 = arith.constant 0 : index
    %501 = vector.load %arg4[%c47, %c0_161] : memref<98x256xf32, #tpu.memory_space<vmem>>, vector<1x256xf32>
    %c96 = arith.constant 96 : index
    %c0_162 = arith.constant 0 : index
    %502 = vector.load %arg4[%c96, %c0_162] : memref<98x256xf32, #tpu.memory_space<vmem>>, vector<1x256xf32>
    %503 = vector.broadcast %501 : vector<1x256xf32> to vector<2x256xf32>
    %504 = arith.mulf %499, %503 : vector<2x256xf32>
    %505 = arith.addf %485, %504 : vector<2x256xf32>
    %506 = vector.broadcast %502 : vector<1x256xf32> to vector<2x256xf32>
    %507 = arith.mulf %500, %506 : vector<2x256xf32>
    %508 = arith.addf %488, %507 : vector<2x256xf32>
    %c205_i32 = arith.constant 205 : i32
    %509 = tpu.dynamic_rotate %25 by %c205_i32 dim 1 : vector<2x256xf32>, i32 -> vector<2x256xf32>
    %c205_i32_163 = arith.constant 205 : i32
    %510 = tpu.dynamic_rotate %26 by %c205_i32_163 dim 1 : vector<2x256xf32>, i32 -> vector<2x256xf32>
    %c48 = arith.constant 48 : index
    %c0_164 = arith.constant 0 : index
    %511 = vector.load %arg4[%c48, %c0_164] : memref<98x256xf32, #tpu.memory_space<vmem>>, vector<1x256xf32>
    %c97 = arith.constant 97 : index
    %c0_165 = arith.constant 0 : index
    %512 = vector.load %arg4[%c97, %c0_165] : memref<98x256xf32, #tpu.memory_space<vmem>>, vector<1x256xf32>
    %513 = vector.broadcast %511 : vector<1x256xf32> to vector<2x256xf32>
    %514 = arith.mulf %509, %513 : vector<2x256xf32>
    %515 = arith.addf %495, %514 : vector<2x256xf32>
    %516 = vector.broadcast %512 : vector<1x256xf32> to vector<2x256xf32>
    %517 = arith.mulf %510, %516 : vector<2x256xf32>
    %518 = arith.addf %498, %517 : vector<2x256xf32>
    %519 = arith.addf %515, %505 : vector<2x256xf32>
    %520 = arith.addf %518, %508 : vector<2x256xf32>
    %521 = arith.addf %519, %520 : vector<2x256xf32>
    %522 = arith.negf %521 : vector<2x256xf32>
    %523 = math.exp %522 : vector<2x256xf32>
    %cst_166 = arith.constant 1.000000e+00 : f32
    %524 = vector.broadcast %cst_166 : f32 to vector<2x256xf32>
    %525 = arith.addf %524, %523 : vector<2x256xf32>
    %526 = arith.divf %524, %525 : vector<2x256xf32>
    %527 = vector.shape_cast %526 : vector<2x256xf32> to vector<2x1x256xf32>
    %528 = vector.broadcast %527 : vector<2x1x256xf32> to vector<2x16x256xf32>
    %529 = arith.mulf %22, %528 : vector<2x16x256xf32>
    %c0_167 = arith.constant 0 : index
    %c0_168 = arith.constant 0 : index
    %c0_169 = arith.constant 0 : index
    %530 = vector.load %arg5[%c0_167, %c0_168, %c0_169] : memref<2x16x256xf32, #tpu.memory_space<vmem>>, vector<2x16x256xf32>
    tpu.vector_store %arg5[%c0_167, %c0_168, %c0_169], %529 {strides = array<i32>} : memref<2x16x256xf32, #tpu.memory_space<vmem>>, vector<2x16x256xf32>,
    return
  }
  func.func @transform_0(%arg0: i32) -> (i32, i32, i32) {
    %c0_i32 = arith.constant 0 : i32
    %c0_i32_0 = arith.constant 0 : i32
    %c0_i32_1 = arith.constant 0 : i32
    return %arg0, %c0_i32, %c0_i32_0 : i32, i32, i32
  }
  func.func @transform_1(%arg0: i32) -> (i32, i32) {
    %c0_i32 = arith.constant 0 : i32
    %c0_i32_0 = arith.constant 0 : i32
    %c0_i32_1 = arith.constant 0 : i32
    return %c0_i32, %c0_i32_0 : i32, i32
  }
  func.func @transform_2(%arg0: i32) -> (i32, i32) {
    %c0_i32 = arith.constant 0 : i32
    %c0_i32_0 = arith.constant 0 : i32
    %c0_i32_1 = arith.constant 0 : i32
    return %c0_i32, %c0_i32_0 : i32, i32
  }
  func.func @transform_3(%arg0: i32) -> (i32, i32) {
    %c0_i32 = arith.constant 0 : i32
    %c0_i32_0 = arith.constant 0 : i32
    %c0_i32_1 = arith.constant 0 : i32
    return %c0_i32, %c0_i32_0 : i32, i32
  }
  func.func @transform_4(%arg0: i32) -> (i32, i32, i32) {
    %c0_i32 = arith.constant 0 : i32
    %c0_i32_0 = arith.constant 0 : i32
    %c0_i32_1 = arith.constant 0 : i32
    return %arg0, %c0_i32, %c0_i32_0 : i32, i32, i32
  }
}

</mosaic_0001>

<bundles_post_ra>
// kernel: tpu_custom_call.1
= control target key start
LH: loop header
LB: loop body
LE: loop exit
PB: predicated region body
PF: predicated region fallthrough
CT: control target
= control target key end

     0   :  { %9 = vsyncpa [#allocation3], 0  ;;  %s3725_s0 = inlined_call_operand.hbm [shape: f32[2,16,256], index: 0, kind: input, shape index: {}]   ;;  %s3726_s1 = inlined_call_operand.vmem [shape: f32[16,2], index: 1, kind: input, shape index: {}]   ;;  %s3727_s2 = inlined_call_operand.vmem [shape: f32[2,16], index: 2, kind: input, shape index: {}]   ;;  %s3728_s3 = inlined_call_operand.hbm [shape: f32[98,256], index: 3, kind: input, shape index: {}]   ;;  %s3729_s4 = inlined_call_operand.hbm [shape: f32[2,16,256], index: 4, kind: output, shape index: {}]  }
   0x1   :  { %10 = vsyncpa [#allocation6], 0 }
   0x2   :  { %11 = vsyncpa [#allocation4], 0  ;;  %s16_s17 = sshll.u32 %s3725_s0, 4  ;;  %s2298_s18 = smov [#allocation2]   ;;  %s17_s17 = int_to_ptr.hbm [resolvable:$true] %s16_s17 }
   0x3   :  { %s18_s19 = sshll.u32 %s2298_s18, 4  ;;  %s33_s22 = sshll.u32 %s3728_s3, 4  ;;  %s19_s19 = int_to_ptr.vmem [resolvable:$true] %s18_s19  ;;  %s34_s22 = int_to_ptr.hbm [resolvable:$true] %s33_s22 }
   0x4   :  { %s3730_s23 = smov 256   ;;  %s2300_s24 = smov 16  }
   0x5   :  { %24 = dma.hbm_to_vmem [thread:$0]  %s17_s17, 1024, %s19_s19, [#allocation3], %s3730_s23, %s3730_s23, %s2300_s24  }
   0x6   :  { %s2301_s25 = smov [#allocation5]  }
   0x7   :  { %s35_s26 = sshll.u32 %s2301_s25, 4  ;;  %s36_s26 = int_to_ptr.vmem [resolvable:$true] %s35_s26 }
   0x8   :  { %41 = dma.hbm_to_vmem [thread:$0]  %s34_s22, 3328, %s36_s26, [#allocation6], %s3730_s23, %s3730_s23, %s2300_s24  }
   0x9   :  { %2292 = dma.done.wait [#allocation3], 1024  }
   0xa   :  { %2293 = vsyncadd [#allocation3], 4294966272 }
   0xb   :  { %2294 = dma.done.wait [#allocation6], 3328  }
   0xc   :  { %2295 = vsyncadd [#allocation6], 4294963968  ;;  %v2389_v0 = vld [vmem:[#allocation2 + $0x20] sm:$0xff]  ;;  %v2391_v1 = vld [vmem:[#allocation2 + $0x28] sm:$0xff]  ;;  %v2302_v16 = vmov 256.0   ;;  %v97_v27 = vlaneseq  ;;  %vm102_vm1 = vcmask 130112  }
   0xd   :  { %v2393_v2 = vld [vmem:[#allocation2] sm:$0xff]  ;;  %v64_v3 = vadd.f32 %v2391_v1, %v2389_v0  ;;  %v2397_v4 = vld [vmem:[#allocation2 + $0x8] sm:$0xff]  ;;  %v2403_v7 = vld [vmem:[#allocation2 + $0x30] sm:$0xff]  ;;  %v87_v15 = vmax.f32 %v2389_v0, %v2391_v1  ;;  %2204 = vrcp.f32 %v2302_v16  ;;  %vm3790_vm2 = vcmask 1041409   ;;  %s2305_s30 = smov 51   ;;  %s2306_s5 = smov 49  }
   0xe   :  { %v81_v5 = vmax.f32 %v2393_v2, %v2397_v4  ;;  %v58_v6 = vadd.f32 %v2397_v4, %v2393_v2  ;;  %v2405_v8 = vld [vmem:[#allocation2 + $0x38] sm:$0xff]  ;;  %v2407_v9 = vld [vmem:[#allocation2 + $0x10] sm:$0xff]  ;;  %v126_v17 = vld [vmem:[%s3726_s1 + $0x8] sm:$0xff]  ;;  %v2427_v31 = vand.u32 127, %v97_v27  ;;  %vm120_vm3 = vcmask 1043459   ;;  %s2307_s6 = smov 47  }
   0xf   :  { %65 = vadd.xlane.f32.xlu1 %v64_v3  ;;  %v2409_v10 = vld [vmem:[#allocation2 + $0x18] sm:$0xff]  ;;  %v67_v11 = vadd.f32 %v2405_v8, %v2403_v7  ;;  %v90_v14 = vmax.f32 %v2403_v7, %v2405_v8  ;;  %v125_v18 = vld [vmem:[%s3726_s1] sm:$0xff]  ;;  %145 = vmatpush.msra.mxu0 %v126_v17  ;;  %vm123_vm4 = vcmask 1041408   ;;  %vm127_vm5 = vcmask 130048   ;;  %s2308_s7 = smov 48   ;;  %s2309_s8 = smov 46  }
  0x10   :  { %82 = vmax.xlane.f32.xlu2 %v81_v5  ;;  %59 = vadd.xlane.f32.xlu0 %v58_v6  ;;  %v84_v12 = vmax.f32 %v2407_v9, %v2409_v10  ;;  %v61_v13 = vadd.f32 %v2409_v10, %v2407_v9  ;;  %v100_v36 = vadd.s32 4294967288, %v2427_v31  ;;  %v156_v55 = vld [vmem:[%s3727_s2] sm:$0x3]  ;;  %vm157_vm6 = vcmask 15360   ;;  %s2304_s2 = smov 50   ;;  %s2310_s9 = smov 35  }
  0x11   :  { %146 = vmatpush.msra.mxu0 %v125_v18  ;;  %2141 = vmatpush.msk.msra.mxu1 %vm123_vm4, %v156_v55  ;;  %v205_v60 = vshrl.u32 %v97_v27, 7  ;;  %s2311_s10 = smov 45   ;;  %s2312_s11 = smov 34   ;;  %vm316_vm12 = vcmp.lt.s32.totalorder %v2427_v31, 51  ;;  %vm393_vm13 = vcmp.lt.s32.totalorder %v2427_v31, 49  ;;  %vm358_vm14 = vcmp.lt.s32.totalorder %v2427_v31, 50 }
  0x12   :  { %s2313_s12 = smov 32   ;;  %s2314_s13 = smov 33   ;;  %vm428_vm15 = vcmp.lt.s32.totalorder %v2427_v31, 48 }
  0x13   :  { %v2205_v19 = vpop.eup %2204  ;;  %2202 = vset.pattern.permute.xlu1 %v205_v60  ;;  %2200 = vset.pattern.permute.xlu2 %v205_v60  ;;  %v212_v61 = vadd.s32 8, %v205_v60  ;;  %s2315_s14 = smov 31   ;;  %s2316_s15 = smov 29  }
  0x14   :  { %v71_v20 = vmul.f32 256.0, %v2205_v19  ;;  %vm75_vm0 = vweird.f32 %v2205_v19  ;;  %s2317_s16 = smov 30   ;;  %s2318_s17 = smov 19  }
  0x15   :  { %2201 = vset.pattern.permute.xlu0 %v212_v61  ;;  %s2319_s18 = smov 17   ;;  %s2320_s19 = smov 18  }
  0x16   :  { %v72_v21 = vsub.f32 1.0, %v71_v20  ;;  %s2321_s20 = smov 14   ;;  %s2322_s21 = smov 15  }
  0x17   :  { %68 = vadd.xlane.f32.xlu1 %v67_v11  ;;  %s2323_s22 = smov 13   ;;  %s2324_s25 = smov 2  }
  0x18   :  { %85 = vmax.xlane.f32.xlu2 %v84_v12  ;;  %62 = vadd.xlane.f32.xlu0 %v61_v13  ;;  %v73_v23 = vmul.f32 %v2205_v19, %v72_v21  ;;  %s2325_s26 = smov 3   ;;  %s2326_s0 = smov 1  }
  0x19   :  { %s2327_s3 = smov 126   ;;  %s2328_s27 = smov 127  }
  0x1a   :  { %v74_v26 = vadd.f32 %v2205_v19, %v73_v23  ;;  %s3731_s28 = smov 125   ;;  %s3739_s1 = smov 114  }
  0x1b   :  { %s3733_s29 = smov 115   ;;  %s3735_s23 = smov 113  }
  0x1c   :  { %v76_v29 = vsel %vm75_vm0, %v2205_v19, %v74_v26  ;;  %vm498_vm0 = vcmp.lt.s32.totalorder %v2427_v31, 46 }
  0x1f   :  { %91 = vmax.xlane.f32.xlu1 %v90_v14 }
  0x20   :  { %88 = vmax.xlane.f32.xlu0 %v87_v15 }
  0x82   :  { %v66_v22 = vpop.xlane.xlu1 %65 }
  0x83   :  { %v60_v24 = vpop.xlane.xlu0 %59  ;;  %v83_v25 = vpop.xlane.xlu2 %82  ;;  %v79_v34 = vmul.f32 %v76_v29, %v66_v22  ;;  %v2303_v22 = vmov 16.0  }
  0x84   :  { %v77_v35 = vmul.f32 %v76_v29, %v60_v24  ;;  %v114_v41 = vperm.slane %v83_v25, %v2427_v31 }
  0x85   :  { %v104_v40 = vperm.slane %v79_v34, %v2427_v31 }
  0x86   :  { %v99_v42 = vperm.slane %v77_v35, %v2427_v31 }
  0x8a   :  { %v69_v28 = vpop.xlane.xlu1 %68 }
  0x8b   :  { %v63_v30 = vpop.xlane.xlu0 %62  ;;  %v80_v32 = vmul.f32 %v76_v29, %v69_v28  ;;  %v86_v37 = vpop.xlane.xlu2 %85 }
  0x8c   :  { %v78_v33 = vmul.f32 %v76_v29, %v63_v30  ;;  %v115_v43 = vperm.slane %v86_v37, %v100_v36 }
  0x8d   :  { %v105_v38 = vperm.slane %v80_v32, %v100_v36  ;;  %v2441_v32 = vld [vmem:[#allocation5 + $0x91] ss:$8 sm:$0x3] }
  0x8e   :  { %v101_v39 = vperm.slane %v78_v33, %v100_v36  ;;  %v116_v50 = vsel %vm102_vm1, %v115_v43, %v114_v41  ;;  %v2443_v33 = vld [vmem:[#allocation5 + $0x30] ss:$8 sm:$0x3] }
  0x8f   :  { %v106_v49 = vsel %vm102_vm1, %v105_v38, %v104_v40  ;;  %v1165_v43 = vperm.slane %v2443_v33, 1 }
  0x90   :  { %v103_v48 = vsel %vm102_vm1, %v101_v39, %v99_v42  ;;  %v1164_v42 = vperm.slane %v2443_v33, 0 }
  0x91   :  { %v108_v52 = vsel %vm3790_vm2, %v106_v49, %v103_v48 }
  0x92   :  { %v92_v44 = vpop.xlane.xlu1 %91 }
  0x93   :  { %v118_v45 = vperm.slane %v92_v44, %v100_v36  ;;  %v89_v46 = vpop.xlane.xlu0 %88 }
  0x94   :  { %v117_v47 = vperm.slane %v89_v46, %v2427_v31 }
  0x96   :  { %v119_v51 = vsel %vm102_vm1, %v118_v45, %v117_v47  ;;  %vm463_vm1 = vcmp.lt.s32.totalorder %v2427_v31, 47 }
  0x97   :  { %v121_v53 = vsel %vm120_vm3, %v119_v51, %v116_v50  ;;  %vm533_vm3 = vcmp.lt.s32.totalorder %v2427_v31, 45 }
  0x98   :  { %v124_v54 = vsel %vm123_vm4, %v108_v52, %v121_v53  ;;  %vm603_vm4 = vcmp.lt.s32.totalorder %v2427_v31, 34 }
  0x99   :  { %2140 = vmatmul.msk.f32.vlgmr.msra.gmra.mxu0 %vm127_vm5, %v124_v54  ;;  %vm568_vm5 = vcmp.lt.s32.totalorder %v2427_v31, 35 }
 0x116   :  { %v148_v56 = vpop.f32.mrf.mxu0 }
 0x117   :  { %v151_v57 = vmax.f32 %v148_v56, 0.0 }
 0x119   :  { %v153_v58 = vrot.slane %v151_v57, 2 }
 0x11b   :  { %v155_v59 = vadd.f32 %v153_v58, %v151_v57 }
 0x11d   :  { %2142 = vmatmul.msk.f32.vlgmr.msra.gmra.mxu1 %vm157_vm6, %v155_v59  ;;  %vm3765_vm6 = vcmp.lt.s32.totalorder %v2427_v31, 33 }
 0x19a   :  { %v181_v62 = vpop.f32.mrf.mxu1 }
 0x19b   :  { %v2143_v63 = vmul.f32 -1.442695, %v181_v62 }
 0x19d   :  { %2206 = vpow2.f32 %v2143_v63 }
 0x1a3   :  { %v2207_v3 = vpop.eup %2206 }
 0x1a4   :  { %v187_v5 = vadd.f32 1.0, %v2207_v3 }
 0x1a6   :  { %2208 = vrcp.f32 %v187_v5  ;;  %v199_v13 = vand.u32 2147483648, %v187_v5  ;;  %v197_v15 = vand.u32 2147483647, %v187_v5  ;;  %vm193_vm8 = vweird.f32 %v187_v5 }
 0x1a7   :  { %2210 = vrcp.f32 %v2303_v22 }
 0x1a8   :  { %v200_v17 = vor.u32 1.1754944e-38, %v199_v13  ;;  %vm198_vm10 = vcmp.eq.f32.partialorder %v197_v15, 8.507059e+37 }
 0x1ac   :  { %v2209_v6 = vpop.eup %2208 }
 0x1ad   :  { %v189_v11 = vmul.f32 %v2209_v6, %v187_v5  ;;  %vm194_vm7 = vweird.f32 %v2209_v6  ;;  %v2211_v23 = vpop.eup %2210 }
 0x1ae   :  { %vm195_vm9 = vmor %vm193_vm8, %vm194_vm7  ;;  %v266_v24 = vmul.f32 16.0, %v2211_v23  ;;  %vm270_vm11 = vweird.f32 %v2211_v23  ;;  %vm3769_vm7 = vcmp.lt.s32.totalorder %v2427_v31, 31  ;;  %vm3770_vm8 = vcmp.lt.s32.totalorder %v2427_v31, 32 }
 0x1af   :  { %v190_v12 = vsub.f32 1.0, %v189_v11 }
 0x1b0   :  { %v267_v25 = vsub.f32 1.0, %v266_v24 }
 0x1b1   :  { %v191_v14 = vmul.f32 %v2209_v6, %v190_v12 }
 0x1b2   :  { %v268_v27 = vmul.f32 %v2211_v23, %v267_v25 }
 0x1b3   :  { %v192_v16 = vadd.f32 %v2209_v6, %v191_v14 }
 0x1b4   :  { %v269_v28 = vadd.f32 %v2211_v23, %v268_v27 }
 0x1b5   :  { %v196_v18 = vsel %vm195_vm9, %v2209_v6, %v192_v16  ;;  %vm3768_vm9 = vcmp.lt.s32.totalorder %v2427_v31, 30 }
 0x1b6   :  { %v201_v19 = vsel %vm198_vm10, %v200_v17, %v196_v18  ;;  %v2454_v37 = vsel %vm270_vm11, %v2211_v23, %v269_v28  ;;  %vm3771_vm10 = vcmp.lt.s32.totalorder %v2427_v31, 19  ;;  %vm3772_vm11 = vcmp.lt.s32.totalorder %v2427_v31, 29 }
 0x1b7   :  { %v216_v20 = vperm.slane %v201_v19, 1  ;;  %v203_v21 = vperm.slane %v201_v19, 0 }
 0x1b9   :  { %221 = vperm.xlu1 %2202, %v216_v20   ;;  %214 = vperm.xlu0 %2201, %v203_v21  }
 0x1ba   :  { %208 = vperm.xlu2 %2200, %v203_v21  }
 0x1c2   :  { %2203 = vset.pattern.permute.xlu2 %v212_v61 }
 0x1ca   :  { %227 = vperm.xlu2 %2203, %v216_v20  }
 0x214   :  { %v209_v26 = vpop.permute.xlu2 %208 }
 0x215   :  { %v2439_v30 = vmul.f32 %v209_v26, %v2393_v2  ;;  %v2446_v34 = vmul.f32 %v209_v26, %v2397_v4 }
 0x217   :  { %3809 = vst [vmem:[#allocation11_spill] sm:$0xff] %v2439_v30 }
 0x218   :  { %3810 = vst [vmem:[#allocation12_spill] sm:$0xff] %v2446_v34 }
 0x224   :  { %v228_v29 = vpop.permute.xlu2 %227 }
 0x225   :  { %v2449_v35 = vmul.f32 %v228_v29, %v2403_v7  ;;  %v2452_v36 = vmul.f32 %v228_v29, %v2405_v8  ;;  %v1185_v7 = vperm.slane %v2441_v32, 0  ;;  %v1186_v8 = vperm.slane %v2441_v32, 1 }
 0x227   :  { %3811 = vst [vmem:[#allocation13_spill] sm:$0xff] %v2449_v35 }
 0x228   :  { %3812 = vst [vmem:[#allocation14_spill] sm:$0xff] %v2452_v36 }
 0x22b   :  { %v222_v38 = vpop.permute.xlu1 %221  ;;  %v215_v39 = vpop.permute.xlu0 %214 }
 0x22c   :  { %v2457_v2 = vmul.f32 %v222_v38, %v2389_v0  ;;  %v2460_v40 = vmul.f32 %v222_v38, %v2391_v1  ;;  %v2463_v41 = vmul.f32 %v215_v39, %v2407_v9  ;;  %v2466_v4 = vmul.f32 %v215_v39, %v2409_v10 }
 0x22e   :  { %3813 = vst [vmem:[#allocation15_spill] sm:$0xff] %v2457_v2  ;;  %v251_v0 = vadd.f32 %v2449_v35, %v2457_v2  ;;  %v258_v1 = vadd.f32 %v2452_v36, %v2460_v40  ;;  %v290_v9 = vmax.f32 %v2457_v2, %v2449_v35  ;;  %v297_v10 = vmax.f32 %v2460_v40, %v2452_v36 }
 0x22f   :  { %3814 = vst [vmem:[#allocation16_spill] sm:$0xff] %v2460_v40  ;;  %v237_v44 = vadd.f32 %v2463_v41, %v2439_v30  ;;  %v244_v45 = vadd.f32 %v2466_v4, %v2446_v34  ;;  %v276_v46 = vmax.f32 %v2439_v30, %v2463_v41  ;;  %v283_v47 = vmax.f32 %v2446_v34, %v2466_v4  ;;  %v2754_v40 = vld [vmem:[#allocation5 + $0x67] ss:$8 sm:$0x3] }
 0x230   :  { %3815 = vst [vmem:[#allocation17_spill] sm:$0xff] %v2463_v41  ;;  %v252_v48 = vrot.slane %v251_v0, 4  ;;  %v259_v49 = vrot.slane %v258_v1, 4  ;;  %v291_v50 = vrot.slane %v290_v9, 4  ;;  %v298_v51 = vrot.slane %v297_v10, 4 }
 0x231   :  { %3816 = vst [vmem:[#allocation18_spill] sm:$0xff] %v2466_v4  ;;  %v238_v52 = vrot.slane %v237_v44, 4  ;;  %v245_v53 = vrot.slane %v244_v45, 4  ;;  %v277_v54 = vrot.slane %v276_v46, 4  ;;  %v284_v55 = vrot.slane %v283_v47, 4 }
 0x232   :  { %v253_v56 = vadd.f32 %v252_v48, %v251_v0  ;;  %v260_v57 = vadd.f32 %v259_v49, %v258_v1  ;;  %v292_v58 = vmax.f32 %v290_v9, %v291_v50  ;;  %v299_v59 = vmax.f32 %v297_v10, %v298_v51 }
 0x233   :  { %v239_v60 = vadd.f32 %v238_v52, %v237_v44  ;;  %v246_v61 = vadd.f32 %v245_v53, %v244_v45  ;;  %v278_v62 = vmax.f32 %v276_v46, %v277_v54  ;;  %v285_v63 = vmax.f32 %v283_v47, %v284_v55 }
 0x234   :  { %v254_v3 = vrot.slane %v253_v56, 2  ;;  %v261_v5 = vrot.slane %v260_v57, 2  ;;  %v293_v6 = vrot.slane %v292_v58, 2  ;;  %v300_v11 = vrot.slane %v299_v59, 2 }
 0x235   :  { %v240_v12 = vrot.slane %v239_v60, 2  ;;  %v247_v13 = vrot.slane %v246_v61, 2  ;;  %v279_v14 = vrot.slane %v278_v62, 2  ;;  %v286_v15 = vrot.slane %v285_v63, 2 }
 0x236   :  { %v255_v16 = vadd.f32 %v254_v3, %v253_v56  ;;  %v262_v17 = vadd.f32 %v261_v5, %v260_v57  ;;  %v294_v18 = vmax.f32 %v292_v58, %v293_v6  ;;  %v301_v19 = vmax.f32 %v299_v59, %v300_v11 }
 0x237   :  { %v241_v20 = vadd.f32 %v240_v12, %v239_v60  ;;  %v248_v21 = vadd.f32 %v247_v13, %v246_v61  ;;  %v280_v22 = vmax.f32 %v278_v62, %v279_v14  ;;  %v287_v23 = vmax.f32 %v285_v63, %v286_v15 }
 0x238   :  { %v256_v24 = vrot.slane %v255_v16, 1  ;;  %v263_v25 = vrot.slane %v262_v17, 1  ;;  %v295_v26 = vrot.slane %v294_v18, 1  ;;  %v302_v27 = vrot.slane %v301_v19, 1 }
 0x239   :  { %v242_v28 = vrot.slane %v241_v20, 1  ;;  %v249_v29 = vrot.slane %v248_v21, 1  ;;  %v281_v38 = vrot.slane %v280_v22, 1  ;;  %v288_v39 = vrot.slane %v287_v23, 1 }
 0x23a   :  { %v257_v0 = vadd.f32 %v256_v24, %v255_v16  ;;  %v264_v1 = vadd.f32 %v263_v25, %v262_v17  ;;  %v296_v9 = vmax.f32 %v294_v18, %v295_v26  ;;  %v303_v10 = vmax.f32 %v301_v19, %v302_v27 }
 0x23b   :  { %v243_v44 = vadd.f32 %v242_v28, %v241_v20  ;;  %v250_v45 = vadd.f32 %v249_v29, %v248_v21  ;;  %v282_v46 = vmax.f32 %v280_v22, %v281_v38  ;;  %v289_v47 = vmax.f32 %v287_v23, %v288_v39 }
 0x23c   :  { %v2489_v48 = vmul.f32 %v2454_v37, %v257_v0  ;;  %v2492_v49 = vmul.f32 %v2454_v37, %v264_v1  ;;  %v1191_v50 = vmul.f32 %v1185_v7, %v296_v9  ;;  %v1192_v51 = vmul.f32 %v1186_v8, %v303_v10 }
 0x23d   :  { %v2499_v52 = vmul.f32 %v2454_v37, %v243_v44  ;;  %v2502_v53 = vmul.f32 %v2454_v37, %v250_v45  ;;  %v2505_v54 = vsel %vm3790_vm2, %v296_v9, %v282_v46  ;;  %v2508_v55 = vsel %vm3790_vm2, %v303_v10, %v289_v47  ;;  %v335_v45 = vld [vmem:[#allocation5 + $0x61] ss:$8 sm:$0x3] }
 0x23e   :  { %3817 = vst [vmem:[#allocation19_spill] sm:$0xff] %v2489_v48  ;;  %363 = vrot.lane.b32.xlu0 %v2508_v55, %s2304_s2  ;;  %329 = vrot.lane.b32.xlu1 %v2508_v55, %s2305_s30  ;;  %v1189_v56 = vmul.f32 %v1185_v7, %v282_v46  ;;  %v1190_v37 = vmul.f32 %v1186_v8, %v289_v47  ;;  %v1197_v57 = vrot.slane %v1191_v50, 7  ;;  %v1199_v58 = vrot.slane %v1192_v51, 7  ;;  %v405_v46 = vld [vmem:[#allocation5 + $0x63] ss:$8 sm:$0x3] }
 0x23f   :  { %3818 = vst [vmem:[#allocation20_spill] sm:$0xff] %v2492_v49  ;;  %327 = vrot.lane.b32.xlu2 %v2505_v54, %s2305_s30  ;;  %v1170_v61 = vmul.f32 %v1164_v42, %v2489_v48  ;;  %v1171_v32 = vmul.f32 %v1165_v43, %v2492_v49  ;;  %v1168_v7 = vmul.f32 %v1164_v42, %v2499_v52  ;;  %v370_v47 = vld [vmem:[#allocation5 + $0x62] ss:$8 sm:$0x3] }
 0x240   :  { %3819 = vst [vmem:[#allocation21_spill] sm:$0xff] %v2499_v52  ;;  %v2521_v59 = vsel %vm3790_vm2, %v1197_v57, %v1189_v56  ;;  %v2524_v60 = vsel %vm3790_vm2, %v1199_v58, %v1190_v37  ;;  %v1169_v8 = vmul.f32 %v1165_v43, %v2502_v53  ;;  %v346_v56 = vperm.slane %v335_v45, 0  ;;  %v440_v57 = vld [vmem:[#allocation5 + $0x64] ss:$8 sm:$0x3] }
 0x241   :  { %3820 = vst [vmem:[#allocation22_spill] sm:$0xff] %v2502_v53  ;;  %v1176_v62 = vrot.slane %v1170_v61, 7  ;;  %v1178_v63 = vrot.slane %v1171_v32, 7  ;;  %v347_v37 = vperm.slane %v335_v45, 1  ;;  %v416_v61 = vperm.slane %v405_v46, 0 }
 0x242   :  { %v417_v32 = vperm.slane %v405_v46, 1  ;;  %v451_v36 = vperm.slane %v440_v57, 0  ;;  %v452_v35 = vperm.slane %v440_v57, 1 }
 0x243   :  { %v2539_v3 = vsel %vm3790_vm2, %v1176_v62, %v1168_v7  ;;  %v2542_v5 = vsel %vm3790_vm2, %v1178_v63, %v1169_v8  ;;  %v2750_v7 = vld [vmem:[#allocation5 + $0x66] ss:$8 sm:$0x3]  ;;  %v381_v8 = vperm.slane %v370_v47, 0  ;;  %v382_v62 = vperm.slane %v370_v47, 1 }
 0x244   :  { %3821 = vst [vmem:[#allocation23_spill] sm:$0xff] %v2539_v3  ;;  %v475_v63 = vld [vmem:[#allocation5 + $0x65] ss:$8 sm:$0x3] }
 0x245   :  { %3822 = vst [vmem:[#allocation24_spill] sm:$0xff] %v2542_v5  ;;  %v486_v4 = vperm.slane %v475_v63, 0  ;;  %v487_v46 = vperm.slane %v475_v63, 1  ;;  %v2795_v63 = vld [vmem:[#allocation5 + $0x70] ss:$8 sm:$0x3] }
 0x246   :  { %396 = vrot.lane.b32.xlu0 %v2505_v54, %s2306_s5  ;;  %361 = vrot.lane.b32.xlu1 %v2505_v54, %s2304_s2 }
 0x247   :  { %398 = vrot.lane.b32.xlu2 %v2508_v55, %s2306_s5 }
 0x24e   :  { %468 = vrot.lane.b32.xlu0 %v2508_v55, %s2307_s6  ;;  %433 = vrot.lane.b32.xlu1 %v2508_v55, %s2308_s7 }
 0x24f   :  { %431 = vrot.lane.b32.xlu2 %v2505_v54, %s2308_s7 }
 0x256   :  { %501 = vrot.lane.b32.xlu0 %v2505_v54, %s2309_s8  ;;  %466 = vrot.lane.b32.xlu1 %v2505_v54, %s2307_s6 }
 0x257   :  { %503 = vrot.lane.b32.xlu2 %v2508_v55, %s2309_s8 }
 0x25e   :  { %573 = vrot.lane.b32.xlu0 %v2508_v55, %s2310_s9  ;;  %538 = vrot.lane.b32.xlu1 %v2508_v55, %s2311_s10 }
 0x25f   :  { %536 = vrot.lane.b32.xlu2 %v2505_v54, %s2311_s10 }
 0x266   :  { %606 = vrot.lane.b32.xlu0 %v2505_v54, %s2312_s11  ;;  %571 = vrot.lane.b32.xlu1 %v2505_v54, %s2310_s9 }
 0x267   :  { %608 = vrot.lane.b32.xlu2 %v2508_v55, %s2312_s11 }
 0x26e   :  { %678 = vrot.lane.b32.xlu0 %v2508_v55, %s2313_s12  ;;  %643 = vrot.lane.b32.xlu1 %v2508_v55, %s2314_s13 }
 0x26f   :  { %641 = vrot.lane.b32.xlu2 %v2505_v54, %s2314_s13 }
 0x276   :  { %711 = vrot.lane.b32.xlu0 %v2505_v54, %s2315_s14  ;;  %676 = vrot.lane.b32.xlu1 %v2505_v54, %s2313_s12 }
 0x277   :  { %713 = vrot.lane.b32.xlu2 %v2508_v55, %s2315_s14 }
 0x27e   :  { %783 = vrot.lane.b32.xlu0 %v2508_v55, %s2316_s15  ;;  %748 = vrot.lane.b32.xlu1 %v2508_v55, %s2317_s16 }
 0x27f   :  { %746 = vrot.lane.b32.xlu2 %v2505_v54, %s2317_s16 }
 0x286   :  { %816 = vrot.lane.b32.xlu0 %v2505_v54, %s2318_s17  ;;  %781 = vrot.lane.b32.xlu1 %v2505_v54, %s2316_s15 }
 0x287   :  { %818 = vrot.lane.b32.xlu2 %v2508_v55, %s2318_s17 }
 0x28e   :  { %888 = vrot.lane.b32.xlu0 %v2508_v55, %s2319_s18  ;;  %853 = vrot.lane.b32.xlu1 %v2508_v55, %s2320_s19 }
 0x28f   :  { %851 = vrot.lane.b32.xlu2 %v2505_v54, %s2320_s19 }
 0x296   :  { %921 = vrot.lane.b32.xlu0 %v2505_v54, %s2300_s24  ;;  %886 = vrot.lane.b32.xlu1 %v2505_v54, %s2319_s18 }
 0x297   :  { %923 = vrot.lane.b32.xlu2 %v2508_v55, %s2300_s24 }
 0x299   :  { %v2610_v33 = vpop.permute.xlu2 %327 }
 0x29e   :  { %993 = vrot.lane.b32.xlu0 %v2508_v55, %s2321_s20  ;;  %958 = vrot.lane.b32.xlu1 %v2508_v55, %s2322_s21 }
 0x29f   :  { %956 = vrot.lane.b32.xlu2 %v2505_v54, %s2322_s21 }
 0x2a1   :  { %v2618_v42 = vpop.permute.xlu2 %398 }
 0x2a6   :  { %1026 = vrot.lane.b32.xlu0 %v2505_v54, %s2323_s22  ;;  %991 = vrot.lane.b32.xlu1 %v2505_v54, %s2321_s20 }
 0x2a7   :  { %1028 = vrot.lane.b32.xlu2 %v2508_v55, %s2323_s22 }
 0x2a9   :  { %v2626_v43 = vpop.permute.xlu2 %431 }
 0x2ae   :  { %1098 = vrot.lane.b32.xlu0 %v2508_v55, %s2324_s25  ;;  %1063 = vrot.lane.b32.xlu1 %v2508_v55, %s2325_s26 }
 0x2af   :  { %1061 = vrot.lane.b32.xlu2 %v2505_v54, %s2325_s26 }
 0x2b0   :  { %v2634_v6 = vpop.permute.xlu0 %363  ;;  %v2636_v11 = vpop.permute.xlu1 %329 }
 0x2b1   :  { %v2638_v12 = vpop.permute.xlu2 %503  ;;  %v332_v45 = vsel %vm316_vm12, %v2636_v11, %v2610_v33  ;;  %v331_v2 = vsel %vm316_vm12, %v2610_v33, %v2636_v11  ;;  %v557_v11 = vperm.slane %v2754_v40, 1 }
 0x2b2   :  { %v350_v41 = vmul.f32 %v346_v56, %v332_v45 }
 0x2b6   :  { %1131 = vrot.lane.b32.xlu0 %v2505_v54, %s2326_s0  ;;  %1096 = vrot.lane.b32.xlu1 %v2505_v54, %s2324_s25 }
 0x2b7   :  { %1133 = vrot.lane.b32.xlu2 %v2508_v55, %s2326_s0 }
 0x2b8   :  { %v2646_v13 = vpop.permute.xlu0 %396  ;;  %v2648_v14 = vpop.permute.xlu1 %361 }
 0x2b9   :  { %v2650_v15 = vpop.permute.xlu2 %536  ;;  %v400_v47 = vsel %vm393_vm13, %v2646_v13, %v2618_v42  ;;  %v401_v57 = vsel %vm393_vm13, %v2618_v42, %v2646_v13  ;;  %v556_v42 = vperm.slane %v2754_v40, 0  ;;  %v2782_v13 = vld [vmem:[#allocation5 + $0x71] ss:$8 sm:$0x3]  ;;  %v365_v34 = vsel %vm358_vm14, %v2648_v14, %v2634_v6 }
 0x2ba   :  { %v366_v33 = vsel %vm358_vm14, %v2634_v6, %v2648_v14  ;;  %v420_v3 = vmul.f32 %v416_v61, %v401_v57  ;;  %v421_v56 = vmul.f32 %v417_v32, %v400_v47  ;;  %v351_v40 = vmul.f32 %v347_v37, %v331_v2 }
 0x2bb   :  { %v626_v49 = vperm.slane %v2782_v13, 0  ;;  %v627_v61 = vperm.slane %v2782_v13, 1  ;;  %v385_v32 = vmul.f32 %v381_v8, %v366_v33  ;;  %v386_v47 = vmul.f32 %v382_v62, %v365_v34  ;;  %v2831_v8 = vld [vmem:[#allocation5 + $0x74] ss:$8 sm:$0x3] }
 0x2bc   :  { %v591_v57 = vperm.slane %v2795_v63, 0  ;;  %v422_v37 = vadd.f32 %v420_v3, %v350_v41  ;;  %v423_v34 = vadd.f32 %v421_v56, %v351_v40  ;;  %v2852_v13 = vld [vmem:[#allocation5 + $0x73] ss:$8 sm:$0x3]  ;;  %v731_v33 = vperm.slane %v2831_v8, 0 }
 0x2be   :  { %1249 = vrot.lane.b32.xlu0 %v2508_v55, %s2327_s3  ;;  %1214 = vrot.lane.b32.xlu1 %v2508_v55, %s2328_s27 }
 0x2bf   :  { %1212 = vrot.lane.b32.xlu2 %v2505_v54, %s2328_s27 }
 0x2c0   :  { %v2658_v16 = vpop.permute.xlu0 %468  ;;  %v2660_v17 = vpop.permute.xlu1 %433 }
 0x2c1   :  { %v2662_v18 = vpop.permute.xlu2 %608  ;;  %v435_v45 = vsel %vm428_vm15, %v2626_v43, %v2660_v17  ;;  %v436_v6 = vsel %vm428_vm15, %v2660_v17, %v2626_v43  ;;  %v2824_v17 = vld [vmem:[#allocation5 + $0x72] ss:$8 sm:$0x3] }
 0x2c2   :  { %v455_v53 = vmul.f32 %v451_v36, %v436_v6  ;;  %v456_v48 = vmul.f32 %v452_v35, %v435_v45  ;;  %v592_v35 = vperm.slane %v2795_v63, 1  ;;  %v3824_v45 = vperm.slane %v2750_v7, 1 }
 0x2c6   :  { %1282 = vrot.lane.b32.xlu0 %v2505_v54, %s3731_s28  ;;  %1247 = vrot.lane.b32.xlu1 %v2505_v54, %s2327_s3 }
 0x2c7   :  { %1284 = vrot.lane.b32.xlu2 %v2508_v55, %s3731_s28  ;;  %s2333_s28 = smov 111  }
 0x2c8   :  { %v2670_v19 = vpop.permute.xlu0 %501  ;;  %v2672_v20 = vpop.permute.xlu1 %466 }
 0x2c9   :  { %v2674_v21 = vpop.permute.xlu2 %641  ;;  %v470_v43 = vsel %vm463_vm1, %v2672_v20, %v2658_v16  ;;  %v471_v2 = vsel %vm463_vm1, %v2658_v16, %v2672_v20  ;;  %v505_v36 = vsel %vm498_vm0, %v2670_v19, %v2638_v12  ;;  %v506_v62 = vsel %vm498_vm0, %v2638_v12, %v2670_v19 }
 0x2ca   :  { %v490_v12 = vmul.f32 %v486_v4, %v471_v2  ;;  %v491_v16 = vmul.f32 %v487_v46, %v470_v43  ;;  %v661_v19 = vperm.slane %v2824_v17, 0  ;;  %v662_v20 = vperm.slane %v2824_v17, 1  ;;  %v2866_v2 = vld [vmem:[#allocation5 + $0x75] ss:$8 sm:$0x3] }
 0x2cb   :  { %v3823_v4 = vperm.slane %v2750_v7, 0  ;;  %v526_v6 = vmul.f32 %v3824_v45, %v505_v36 }
 0x2cc   :  { %v492_v17 = vadd.f32 %v490_v12, %v422_v37  ;;  %v493_v52 = vadd.f32 %v491_v16, %v423_v34  ;;  %v766_v34 = vperm.slane %v2866_v2, 0 }
 0x2cd   :  { %v525_v46 = vmul.f32 %v3823_v4, %v506_v62 }
 0x2ce   :  { %1354 = vrot.lane.b32.xlu0 %v2508_v55, %s3739_s1  ;;  %1319 = vrot.lane.b32.xlu1 %v2508_v55, %s3733_s29 }
 0x2cf   :  { %1317 = vrot.lane.b32.xlu2 %v2505_v54, %s3733_s29  ;;  %s3737_s29 = smov 112  }
 0x2d0   :  { %v2682_v22 = vpop.permute.xlu0 %573  ;;  %v2684_v23 = vpop.permute.xlu1 %538 }
 0x2d1   :  { %v2686_v24 = vpop.permute.xlu2 %713  ;;  %v540_v41 = vsel %vm533_vm3, %v2650_v15, %v2684_v23  ;;  %v541_v3 = vsel %vm533_vm3, %v2684_v23, %v2650_v15  ;;  %v457_v15 = vadd.f32 %v455_v53, %v385_v32  ;;  %v458_v23 = vadd.f32 %v456_v48, %v386_v47 }
 0x2d2   :  { %v560_v40 = vmul.f32 %v556_v42, %v541_v3  ;;  %v561_v43 = vmul.f32 %v557_v11, %v540_v41  ;;  %v732_v48 = vperm.slane %v2831_v8, 1  ;;  %v696_v32 = vperm.slane %v2852_v13, 0  ;;  %v2892_v3 = vld [vmem:[#allocation5 + $0x77] ss:$8 sm:$0x3] }
 0x2d3   :  { %v697_v47 = vperm.slane %v2852_v13, 1  ;;  %v527_v36 = vadd.f32 %v525_v46, %v457_v15  ;;  %v528_v8 = vadd.f32 %v526_v6, %v458_v23  ;;  %v837_v13 = vperm.slane %v2892_v3, 1 }
 0x2d4   :  { %v562_v62 = vadd.f32 %v560_v40, %v492_v17  ;;  %v563_v41 = vadd.f32 %v561_v43, %v493_v52  ;;  %v2935_v43 = vld [vmem:[#allocation5 + $0x80] ss:$8 sm:$0x3] }
 0x2d6   :  { %1387 = vrot.lane.b32.xlu0 %v2505_v54, %s3735_s23  ;;  %1352 = vrot.lane.b32.xlu1 %v2505_v54, %s3739_s1  ;;  %s2337_s1 = smov 109  }
 0x2d7   :  { %1389 = vrot.lane.b32.xlu2 %v2508_v55, %s3735_s23  ;;  %s3741_s23 = smov 110  }
 0x2d8   :  { %v2694_v25 = vpop.permute.xlu0 %606  ;;  %v2696_v26 = vpop.permute.xlu1 %571 }
 0x2d9   :  { %v2698_v27 = vpop.permute.xlu2 %746  ;;  %v610_v7 = vsel %vm603_vm4, %v2694_v25, %v2662_v18  ;;  %v611_v42 = vsel %vm603_vm4, %v2662_v18, %v2694_v25  ;;  %v575_v11 = vsel %vm568_vm5, %v2696_v26, %v2682_v22  ;;  %v576_v37 = vsel %vm568_vm5, %v2682_v22, %v2696_v26  ;;  %v2894_v18 = vld [vmem:[#allocation5 + $0x76] ss:$8 sm:$0x3] }
 0x2da   :  { %v630_v25 = vmul.f32 %v626_v49, %v611_v42  ;;  %v631_v12 = vmul.f32 %v627_v61, %v610_v7  ;;  %v767_v22 = vperm.slane %v2866_v2, 1  ;;  %v595_v52 = vmul.f32 %v591_v57, %v576_v37  ;;  %v2942_v42 = vld [vmem:[#allocation5 + $0x82] ss:$8 sm:$0x3] }
 0x2db   :  { %v596_v26 = vmul.f32 %v592_v35, %v575_v11  ;;  %v836_v61 = vperm.slane %v2892_v3, 0  ;;  %v801_v15 = vperm.slane %v2894_v18, 0  ;;  %v802_v4 = vperm.slane %v2894_v18, 1  ;;  %v2952_v37 = vld [vmem:[#allocation5 + $0x81] ss:$8 sm:$0x3] }
 0x2dc   :  { %v632_v45 = vadd.f32 %v630_v25, %v562_v62  ;;  %v633_v6 = vadd.f32 %v631_v12, %v563_v41  ;;  %v597_v2 = vadd.f32 %v595_v52, %v527_v36  ;;  %v941_v62 = vperm.slane %v2942_v42, 0  ;;  %v2964_v25 = vld [vmem:[#allocation5 + $0x83] ss:$8 sm:$0x3] }
 0x2dd   :  { %v598_v17 = vadd.f32 %v596_v26, %v528_v8  ;;  %v872_v8 = vperm.slane %v2935_v43, 1  ;;  %v942_v41 = vperm.slane %v2942_v42, 1 }
 0x2de   :  { %1459 = vrot.lane.b32.xlu0 %v2508_v55, %s2333_s28  ;;  %1424 = vrot.lane.b32.xlu1 %v2508_v55, %s3737_s29 }
 0x2df   :  { %1422 = vrot.lane.b32.xlu2 %v2505_v54, %s3737_s29  ;;  %s3750_s29 = smov 99  }
 0x2e0   :  { %v2706_v28 = vpop.permute.xlu0 %678  ;;  %v2708_v29 = vpop.permute.xlu1 %643 }
 0x2e1   :  { %v2710_v38 = vpop.permute.xlu2 %818  ;;  %v646_v16 = vsel %vm3765_vm6, %v2708_v29, %v2674_v21  ;;  %v645_v49 = vsel %vm3765_vm6, %v2674_v21, %v2708_v29  ;;  %vm3777_vm6 = vcmp.lt.s32.totalorder %v2427_v31, 18 }
 0x2e2   :  { %v665_v23 = vmul.f32 %v661_v19, %v646_v16  ;;  %v666_v40 = vmul.f32 %v662_v20, %v645_v49 }
 0x2e4   :  { %v667_v36 = vadd.f32 %v665_v23, %v597_v2 }
 0x2e6   :  { %1492 = vrot.lane.b32.xlu0 %v2505_v54, %s3741_s23  ;;  %1457 = vrot.lane.b32.xlu1 %v2505_v54, %s2333_s28 }
 0x2e7   :  { %1494 = vrot.lane.b32.xlu2 %v2508_v55, %s3741_s23  ;;  %s3748_s23 = smov 98  }
 0x2e8   :  { %v2718_v39 = vpop.permute.xlu0 %711  ;;  %v2720_v0 = vpop.permute.xlu1 %676 }
 0x2e9   :  { %v2722_v1 = vpop.permute.xlu2 %851  ;;  %v716_v21 = vsel %vm3769_vm7, %v2686_v24, %v2718_v39  ;;  %v681_v29 = vsel %vm3770_vm8, %v2706_v28, %v2720_v0  ;;  %v680_v19 = vsel %vm3770_vm8, %v2720_v0, %v2706_v28  ;;  %v715_v7 = vsel %vm3769_vm7, %v2718_v39, %v2686_v24 }
 0x2ea   :  { %v735_v11 = vmul.f32 %v731_v33, %v716_v21  ;;  %v700_v20 = vmul.f32 %v696_v32, %v681_v29  ;;  %v701_v24 = vmul.f32 %v697_v47, %v680_v19  ;;  %v871_v39 = vperm.slane %v2935_v43, 0 }
 0x2eb   :  { %v668_v33 = vadd.f32 %v666_v40, %v598_v17  ;;  %v736_v32 = vmul.f32 %v732_v48, %v715_v7  ;;  %v906_v47 = vperm.slane %v2952_v37, 0  ;;  %vm918_vm7 = vcmp.lt.s32.totalorder %v2427_v31, 16  ;;  %v2997_v17 = vld [vmem:[#allocation5 + $0x84] ss:$8 sm:$0x3] }
 0x2ec   :  { %v737_v48 = vadd.f32 %v735_v11, %v667_v36  ;;  %v702_v12 = vadd.f32 %v700_v20, %v632_v45  ;;  %v703_v26 = vadd.f32 %v701_v24, %v633_v6  ;;  %vm3778_vm8 = vcmp.lt.s32.totalorder %v2427_v31, 15 }
 0x2ed   :  { %v738_v45 = vadd.f32 %v736_v32, %v668_v33  ;;  %v976_v6 = vperm.slane %v2964_v25, 0  ;;  %v977_v40 = vperm.slane %v2964_v25, 1  ;;  %v1011_v18 = vperm.slane %v2997_v17, 0 }
 0x2ee   :  { %1564 = vrot.lane.b32.xlu0 %v2508_v55, %s3750_s29  ;;  %1529 = vrot.lane.b32.xlu1 %v2508_v55, %s2337_s1 }
 0x2ef   :  { %1527 = vrot.lane.b32.xlu2 %v2505_v54, %s2337_s1 }
 0x2f0   :  { %v2730_v9 = vpop.permute.xlu0 %783  ;;  %v2732_v10 = vpop.permute.xlu1 %748 }
 0x2f1   :  { %v2734_v44 = vpop.permute.xlu2 %923  ;;  %v750_v28 = vsel %vm3768_vm9, %v2698_v27, %v2732_v10  ;;  %v751_v0 = vsel %vm3768_vm9, %v2732_v10, %v2698_v27  ;;  %vm883_vm9 = vcmp.lt.s32.totalorder %v2427_v31, 17 }
 0x2f2   :  { %v770_v27 = vmul.f32 %v766_v34, %v751_v0  ;;  %v771_v10 = vmul.f32 %v767_v22, %v750_v28  ;;  %v907_v34 = vperm.slane %v2952_v37, 1 }
 0x2f4   :  { %v773_v19 = vadd.f32 %v771_v10, %v703_v26 }
 0x2f6   :  { %1597 = vrot.lane.b32.xlu0 %v2505_v54, %s3748_s23  ;;  %1562 = vrot.lane.b32.xlu1 %v2505_v54, %s3750_s29  ;;  %s3758_s29 = smov 97  }
 0x2f7   :  { %1599 = vrot.lane.b32.xlu2 %v2508_v55, %s3748_s23  ;;  %s3763_s23 = smov 96  }
 0x2f8   :  { %v2742_v50 = vpop.permute.xlu0 %816  ;;  %v2744_v51 = vpop.permute.xlu1 %781 }
 0x2f9   :  { %v2747_v58 = vpop.permute.xlu2 %956  ;;  %v821_v16 = vsel %vm3771_vm10, %v2710_v38, %v2742_v50  ;;  %v820_v49 = vsel %vm3771_vm10, %v2742_v50, %v2710_v38  ;;  %v785_v23 = vsel %vm3772_vm11, %v2744_v51, %v2730_v9  ;;  %v786_v21 = vsel %vm3772_vm11, %v2730_v9, %v2744_v51  ;;  %v1035_v38 = vld [vmem:[#allocation5 + $0x85] ss:$8 sm:$0x3] }
 0x2fa   :  { %v772_v50 = vadd.f32 %v770_v27, %v702_v12  ;;  %v840_v43 = vmul.f32 %v836_v61, %v821_v16  ;;  %v841_v9 = vmul.f32 %v837_v13, %v820_v49  ;;  %v805_v51 = vmul.f32 %v801_v15, %v786_v21  ;;  %v1105_v12 = vld [vmem:[#allocation5 + $0x87] ss:$8 sm:$0x3]  ;;  %v1140_v21 = vld [vmem:[#allocation5 + $0x90] ss:$8 sm:$0x3] }
 0x2fb   :  { %v806_v7 = vmul.f32 %v802_v4, %v785_v23  ;;  %vm3779_vm10 = vcmp.lt.s32.totalorder %v2427_v31, 13  ;;  %v1046_v20 = vperm.slane %v1035_v38, 0  ;;  %v1047_v28 = vperm.slane %v1035_v38, 1 }
 0x2fc   :  { %vm988_vm11 = vcmp.lt.s32.totalorder %v2427_v31, 14  ;;  %v1012_v13 = vperm.slane %v2997_v17, 1  ;;  %v843_v37 = vadd.f32 %v841_v9, %v773_v19  ;;  %v807_v36 = vadd.f32 %v805_v51, %v737_v48 }
 0x2fd   :  { %v808_v24 = vadd.f32 %v806_v7, %v738_v45 }
 0x2fe   :  { %1669 = vrot.lane.b32.xlu0 %v2508_v55, %s3763_s23  ;;  %1634 = vrot.lane.b32.xlu1 %v2508_v55, %s3758_s29 }
 0x2ff   :  { %1632 = vrot.lane.b32.xlu2 %v2505_v54, %s3758_s29  ;;  %s3761_s29 = smov 95  }
 0x300   :  { %v2797_v30 = vpop.permute.xlu0 %888  ;;  %v2799_v5 = vpop.permute.xlu1 %853 }
 0x301   :  { %v2809_v14 = vpop.permute.xlu2 %1028  ;;  %v856_v2 = vsel %vm3777_vm6, %v2799_v5, %v2722_v1  ;;  %v855_v11 = vsel %vm3777_vm6, %v2722_v1, %v2799_v5  ;;  %v3019_v5 = vld [vmem:[#allocation5 + $0x86] ss:$8 sm:$0x3]  ;;  %v842_v1 = vadd.f32 %v840_v43, %v772_v50  ;;  %vm3782_vm6 = vcmp.lt.s32.totalorder %v2427_v31, 3 }
 0x302   :  { %v875_v3 = vmul.f32 %v871_v39, %v856_v2  ;;  %v876_v15 = vmul.f32 %v872_v8, %v855_v11  ;;  %v1082_v48 = vperm.slane %v3019_v5, 1  ;;  %v1152_v50 = vperm.slane %v1140_v21, 1 }
 0x304   :  { %v877_v10 = vadd.f32 %v875_v3, %v807_v36  ;;  %v878_v16 = vadd.f32 %v876_v15, %v808_v24 }
 0x306   :  { %1702 = vrot.lane.b32.xlu0 %v2505_v54, %s3761_s29  ;;  %1667 = vrot.lane.b32.xlu1 %v2505_v54, %s3763_s23  ;;  %s3766_s23 = smov 94  }
 0x307   :  { %1704 = vrot.lane.b32.xlu2 %v2508_v55, %s3761_s29  ;;  %s3775_s29 = smov 93  }
 0x308   :  { %v2858_v63 = vpop.permute.xlu0 %921  ;;  %v2860_v56 = vpop.permute.xlu1 %886 }
 0x309   :  { %v2868_v53 = vpop.permute.xlu2 %1061  ;;  %v891_v61 = vsel %vm883_vm9, %v2797_v30, %v2860_v56  ;;  %v890_v4 = vsel %vm883_vm9, %v2860_v56, %v2797_v30  ;;  %v1081_v56 = vperm.slane %v3019_v5, 0 }
 0x30a   :  { %v910_v39 = vmul.f32 %v906_v47, %v891_v61  ;;  %v911_v25 = vmul.f32 %v907_v34, %v890_v4  ;;  %v926_v34 = vsel %vm918_vm7, %v2734_v44, %v2858_v63 }
 0x30c   :  { %v912_v26 = vadd.f32 %v910_v39, %v842_v1 }
 0x30e   :  { %1774 = vrot.lane.b32.xlu0 %v2508_v55, %s3775_s29  ;;  %1739 = vrot.lane.b32.xlu1 %v2508_v55, %s3766_s23 }
 0x30f   :  { %1737 = vrot.lane.b32.xlu2 %v2505_v54, %s3766_s23  ;;  %s3773_s23 = smov 83  }
 0x310   :  { %v2916_v57 = vpop.permute.xlu0 %993  ;;  %v2918_v35 = vpop.permute.xlu1 %958 }
 0x311   :  { %v2929_v46 = vpop.permute.xlu2 %1133  ;;  %v961_v0 = vsel %vm3778_vm8, %v2918_v35, %v2747_v58  ;;  %v960_v8 = vsel %vm3778_vm8, %v2747_v58, %v2918_v35  ;;  %v925_v58 = vsel %vm918_vm7, %v2858_v63, %v2734_v44  ;;  %vm3787_vm8 = vcmp.lt.s32.totalorder %v2427_v31, 1 }
 0x312   :  { %v980_v47 = vmul.f32 %v976_v6, %v961_v0  ;;  %v981_v49 = vmul.f32 %v977_v40, %v960_v8  ;;  %v913_v6 = vadd.f32 %v911_v25, %v843_v37  ;;  %v1117_v63 = vperm.slane %v1105_v12, 1 }
 0x313   :  { %v945_v40 = vmul.f32 %v941_v62, %v926_v34  ;;  %v1256_v34 = vld [vmem:[#allocation5 + $0x93] ss:$8 sm:$0x3] }
 0x314   :  { %v982_v38 = vadd.f32 %v980_v47, %v912_v26  ;;  %v983_v19 = vadd.f32 %v981_v49, %v913_v6  ;;  %v1268_v6 = vperm.slane %v1256_v34, 1 }
 0x316   :  { %1807 = vrot.lane.b32.xlu0 %v2505_v54, %s3773_s23  ;;  %1772 = vrot.lane.b32.xlu1 %v2505_v54, %s3775_s29  ;;  %s3780_s29 = smov 82  }
 0x317   :  { %1809 = vrot.lane.b32.xlu2 %v2508_v55, %s3773_s23  ;;  %s3785_s23 = smov 81  }
 0x318   :  { %v1027_v22 = vpop.permute.xlu0 %1026  ;;  %v2974_v52 = vpop.permute.xlu1 %991 }
 0x319   :  { %v2988_v29 = vpop.permute.xlu2 %1212  ;;  %v1031_v30 = vsel %vm3779_vm10, %v2809_v14, %v1027_v22  ;;  %v1030_v35 = vsel %vm3779_vm10, %v1027_v22, %v2809_v14  ;;  %v995_v45 = vsel %vm988_vm11, %v2974_v52, %v2916_v57  ;;  %v996_v14 = vsel %vm988_vm11, %v2916_v57, %v2974_v52 }
 0x31a   :  { %v1050_v23 = vmul.f32 %v1046_v20, %v1031_v30  ;;  %vm1093_vm10 = vcmp.lt.s32.totalorder %v2427_v31, 2  ;;  %v1116_v22 = vperm.slane %v1105_v12, 0  ;;  %v1051_v44 = vmul.f32 %v1047_v28, %v1030_v35  ;;  %v1291_v35 = vld [vmem:[#allocation5 + $0x94] ss:$8 sm:$0x3] }
 0x31b   :  { %v946_v57 = vmul.f32 %v942_v41, %v925_v58  ;;  %v1151_v52 = vperm.slane %v1140_v21, 0  ;;  %v1015_v2 = vmul.f32 %v1011_v18, %v996_v14  ;;  %v1016_v17 = vmul.f32 %v1012_v13, %v995_v45  ;;  %v1221_v18 = vld [vmem:[#allocation5 + $0x92] ss:$8 sm:$0x3] }
 0x31c   :  { %v1052_v43 = vadd.f32 %v1050_v23, %v982_v38  ;;  %v1053_v61 = vadd.f32 %v1051_v44, %v983_v19  ;;  %v947_v13 = vadd.f32 %v945_v40, %v877_v10  ;;  %v1232_v39 = vperm.slane %v1221_v18, 0  ;;  %v3825_v23 = vld [vmem:[#allocation21_spill] sm:$0xff]  ;;  %v3826_v21 = vld [vmem:[#allocation19_spill] sm:$0xff] }
 0x31d   :  { %v948_v5 = vadd.f32 %v946_v57, %v878_v16  ;;  %v3112_v45 = vsel %vm3790_vm2, %v3826_v21, %v3825_v23  ;;  %v1302_v14 = vperm.slane %v1291_v35, 0 }
 0x31e   :  { %1879 = vrot.lane.b32.xlu0 %v2508_v55, %s3785_s23  ;;  %1844 = vrot.lane.b32.xlu1 %v2508_v55, %s3780_s29  ;;  %v1017_v37 = vadd.f32 %v1015_v2, %v947_v13 }
 0x31f   :  { %1842 = vrot.lane.b32.xlu2 %v2505_v54, %s3780_s29  ;;  %s3783_s29 = smov 80   ;;  %v1018_v36 = vadd.f32 %v1016_v17, %v948_v5 }
 0x320   :  { %v1099_v33 = vpop.permute.xlu0 %1098  ;;  %v1064_v32 = vpop.permute.xlu1 %1063 }
 0x321   :  { %v3040_v27 = vpop.permute.xlu2 %1284  ;;  %v1065_v7 = vsel %vm3782_vm6, %v2868_v53, %v1064_v32  ;;  %v1066_v42 = vsel %vm3782_vm6, %v1064_v32, %v2868_v53  ;;  %vm3788_vm6 = vcmp.lt.s32.totalorder %v2427_v31, 127 }
 0x322   :  { %v1085_v1 = vmul.f32 %v1081_v56, %v1066_v42  ;;  %v1086_v15 = vmul.f32 %v1082_v48, %v1065_v7 }
 0x324   :  { %v1087_v30 = vadd.f32 %v1085_v1, %v1017_v37  ;;  %v1088_v56 = vadd.f32 %v1086_v15, %v1018_v36 }
 0x326   :  { %1912 = vrot.lane.b32.xlu0 %v2505_v54, %s3783_s29  ;;  %1877 = vrot.lane.b32.xlu1 %v2505_v54, %s3785_s23  ;;  %s2349_s23 = smov 79  }
 0x327   :  { %1914 = vrot.lane.b32.xlu2 %v2508_v55, %s3783_s29  ;;  %s2348_s29 = smov 78  }
 0x328   :  { %v1132_v9 = vpop.permute.xlu0 %1131  ;;  %v1097_v51 = vpop.permute.xlu1 %1096 }
 0x329   :  { %v1100_v62 = vsel %vm1093_vm10, %v1097_v51, %v1099_v33  ;;  %v1101_v41 = vsel %vm1093_vm10, %v1099_v33, %v1097_v51  ;;  %v3084_v11 = vpop.permute.xlu2 %1317  ;;  %v1136_v20 = vsel %vm3787_vm8, %v2929_v46, %v1132_v9  ;;  %v1135_v53 = vsel %vm3787_vm8, %v1132_v9, %v2929_v46  ;;  %v1326_v9 = vld [vmem:[#allocation5 + $0x95] ss:$8 sm:$0x3] }
 0x32a   :  { %v1120_v28 = vmul.f32 %v1116_v22, %v1101_v41  ;;  %v1121_v3 = vmul.f32 %v1117_v63, %v1100_v62  ;;  %v1155_v24 = vmul.f32 %v1151_v52, %v1136_v20  ;;  %v1156_v33 = vmul.f32 %v1152_v50, %v1135_v53  ;;  %v3827_v41 = vld [vmem:[#allocation22_spill] sm:$0xff] }
 0x32b   :  { %v1233_v46 = vperm.slane %v1221_v18, 1  ;;  %vm3789_vm8 = vcmp.lt.s32.totalorder %v2427_v31, 125  ;;  %v1267_v22 = vperm.slane %v1256_v34, 0  ;;  %v1337_v20 = vperm.slane %v1326_v9, 0 }
 0x32c   :  { %v1122_v4 = vadd.f32 %v1120_v28, %v1052_v43  ;;  %v1123_v0 = vadd.f32 %v1121_v3, %v1053_v61  ;;  %v1158_v16 = vadd.f32 %v1156_v33, %v1088_v56  ;;  %v3828_v61 = vld [vmem:[#allocation20_spill] sm:$0xff]  ;;  %v1338_v28 = vperm.slane %v1326_v9, 1 }
 0x32e   :  { %1984 = vrot.lane.b32.xlu0 %v2508_v55, %s2348_s29  ;;  %1949 = vrot.lane.b32.xlu1 %v2508_v55, %s2349_s23  ;;  %v1203_v32 = vadd.f32 %v2521_v59, %v1122_v4  ;;  %v1204_v8 = vadd.f32 %v2524_v60, %v1123_v0  ;;  %v1157_v59 = vadd.f32 %v1155_v24, %v1087_v30  ;;  %v1396_v4 = vld [vmem:[#allocation5 + $0x97] ss:$8 sm:$0x3]  ;;  %v1361_v0 = vld [vmem:[#allocation5 + $0x96] ss:$8 sm:$0x3] }
 0x32f   :  { %1947 = vrot.lane.b32.xlu2 %v2505_v54, %s2349_s23  ;;  %v1407_v24 = vperm.slane %v1396_v4, 0  ;;  %v1373_v33 = vperm.slane %v1361_v0, 1 }
 0x330   :  { %v1250_v10 = vpop.permute.xlu0 %1249  ;;  %v1215_v25 = vpop.permute.xlu1 %1214 }
 0x331   :  { %v1216_v47 = vsel %vm3788_vm6, %v2988_v29, %v1215_v25  ;;  %v1217_v48 = vsel %vm3788_vm6, %v1215_v25, %v2988_v29  ;;  %v3107_v12 = vpop.permute.xlu2 %1389  ;;  %v1303_v29 = vperm.slane %v1291_v35, 1  ;;  %vm3791_vm6 = vcmp.lt.s32.totalorder %v2427_v31, 126 }
 0x332   :  { %v1236_v60 = vmul.f32 %v1232_v39, %v1216_v47  ;;  %v1237_v58 = vmul.f32 %v1233_v46, %v1217_v48  ;;  %v1408_v39 = vperm.slane %v1396_v4, 1 }
 0x334   :  { %v1238_v26 = vadd.f32 %v1236_v60, %v1157_v59  ;;  %v1239_v49 = vadd.f32 %v1237_v58, %v1158_v16  ;;  %v1431_v60 = vld [vmem:[#allocation5 + $0xa0] ss:$8 sm:$0x3] }
 0x336   :  { %1982 = vrot.lane.b32.xlu1 %v2505_v54, %s2348_s29  ;;  %354 = vrot.lane.b32.xlu0 %v3112_v45, %s2304_s2 }
 0x337   :  { %312 = vrot.lane.b32.xlu2 %v3112_v45, %s2305_s30 }
 0x338   :  { %v1283_v38 = vpop.permute.xlu0 %1282  ;;  %v1248_v44 = vpop.permute.xlu1 %1247 }
 0x339   :  { %v1286_v63 = vsel %vm3789_vm8, %v1283_v38, %v3040_v27  ;;  %v1287_v40 = vsel %vm3789_vm8, %v3040_v27, %v1283_v38  ;;  %v1251_v57 = vsel %vm3791_vm6, %v1248_v44, %v1250_v10  ;;  %v1252_v52 = vsel %vm3791_vm6, %v1250_v10, %v1248_v44  ;;  %v3132_v50 = vpop.permute.xlu2 %1422  ;;  %v1501_v44 = vld [vmem:[#allocation5 + $0xa2] ss:$8 sm:$0x3] }
 0x33a   :  { %v1306_v19 = vmul.f32 %v1302_v14, %v1286_v63  ;;  %v1307_v43 = vmul.f32 %v1303_v29, %v1287_v40  ;;  %v1271_v2 = vmul.f32 %v1267_v22, %v1251_v57  ;;  %v1272_v17 = vmul.f32 %v1268_v6, %v1252_v52  ;;  %v1466_v63 = vld [vmem:[#allocation5 + $0xa1] ss:$8 sm:$0x3] }
 0x33b   :  { %v3137_v27 = vsel %vm3790_vm2, %v3828_v61, %v3827_v41  ;;  %vm3793_vm8 = vcmp.lt.s32.totalorder %v2427_v31, 115  ;;  %vm3792_vm2 = vcmp.lt.s32.totalorder %v2427_v31, 113  ;;  %vm3794_vm6 = vcmp.lt.s32.totalorder %v2427_v31, 114 }
 0x33c   :  { %v1308_v51 = vadd.f32 %v1306_v19, %v1238_v26  ;;  %v1309_v7 = vadd.f32 %v1307_v43, %v1239_v49  ;;  %v1273_v42 = vadd.f32 %v1271_v2, %v1203_v32  ;;  %v1274_v62 = vadd.f32 %v1272_v17, %v1204_v8 }
 0x33d   :  { %v1443_v49 = vperm.slane %v1431_v60, 1  ;;  %v1512_v52 = vperm.slane %v1501_v44, 0  ;;  %v1513_v19 = vperm.slane %v1501_v44, 1  ;;  %v1478_v43 = vperm.slane %v1466_v63, 1 }
 0x33e   :  { %314 = vrot.lane.b32.xlu1 %v3137_v27, %s2305_s30  ;;  %426 = vrot.lane.b32.xlu0 %v3137_v27, %s2308_s7  ;;  %s3830_s30 = smov 125  }
 0x33f   :  { %356 = vrot.lane.b32.xlu2 %v3137_v27, %s2304_s2  ;;  %s3829_s2 = smov 115  }
 0x340   :  { %v1355_v3 = vpop.permute.xlu0 %1354  ;;  %v1320_v18 = vpop.permute.xlu1 %1319 }
 0x341   :  { %v1321_v13 = vsel %vm3793_vm8, %v3084_v11, %v1320_v18  ;;  %v1322_v5 = vsel %vm3793_vm8, %v1320_v18, %v3084_v11  ;;  %v1495_v53 = vpop.permute.xlu2 %1494  ;;  %v1372_v11 = vperm.slane %v1361_v0, 0  ;;  %vm3795_vm8 = vcmp.lt.s32.totalorder %v2427_v31, 110 }
 0x342   :  { %v1341_v1 = vmul.f32 %v1337_v20, %v1321_v13  ;;  %v1342_v15 = vmul.f32 %v1338_v28, %v1322_v5 }
 0x344   :  { %v1343_v37 = vadd.f32 %v1341_v1, %v1273_v42  ;;  %v1344_v36 = vadd.f32 %v1342_v15, %v1274_v62 }
 0x346   :  { %391 = vrot.lane.b32.xlu1 %v3137_v27, %s2306_s5  ;;  %459 = vrot.lane.b32.xlu0 %v3112_v45, %s2307_s6 }
 0x347   :  { %389 = vrot.lane.b32.xlu2 %v3112_v45, %s2306_s5  ;;  %s3831_s5 = smov 114  }
 0x348   :  { %v1388_v46 = vpop.permute.xlu0 %1387  ;;  %v1353_v32 = vpop.permute.xlu1 %1352 }
 0x349   :  { %v1391_v8 = vsel %vm3792_vm2, %v1388_v46, %v3107_v12  ;;  %v1392_v30 = vsel %vm3792_vm2, %v3107_v12, %v1388_v46  ;;  %v1356_v56 = vsel %vm3794_vm6, %v1353_v32, %v1355_v3  ;;  %v1357_v10 = vsel %vm3794_vm6, %v1355_v3, %v1353_v32  ;;  %v1528_v25 = vpop.permute.xlu2 %1527  ;;  %v1536_v3 = vld [vmem:[#allocation5 + $0xa3] ss:$8 sm:$0x3]  ;;  %v1571_v46 = vld [vmem:[#allocation5 + $0xa4] ss:$8 sm:$0x3] }
 0x34a   :  { %v1411_v47 = vmul.f32 %v1407_v24, %v1391_v8  ;;  %v1412_v48 = vmul.f32 %v1408_v39, %v1392_v30  ;;  %v1376_v59 = vmul.f32 %v1372_v11, %v1356_v56  ;;  %v1377_v16 = vmul.f32 %v1373_v33, %v1357_v10  ;;  %v1606_v33 = vld [vmem:[#allocation5 + $0xa5] ss:$8 sm:$0x3] }
 0x34b   :  { %vm3796_vm2 = vcmp.lt.s32.totalorder %v2427_v31, 112  ;;  %v1442_v12 = vperm.slane %v1431_v60, 0  ;;  %vm3797_vm6 = vcmp.lt.s32.totalorder %v2427_v31, 111  ;;  %v1548_v15 = vperm.slane %v1536_v3, 1 }
 0x34c   :  { %v1413_v58 = vadd.f32 %v1411_v47, %v1343_v37  ;;  %v1414_v35 = vadd.f32 %v1412_v48, %v1344_v36  ;;  %v1378_v34 = vadd.f32 %v1376_v59, %v1308_v51  ;;  %v1379_v26 = vadd.f32 %v1377_v16, %v1309_v7 }
 0x34d   :  { %v1617_v30 = vperm.slane %v1606_v33, 0  ;;  %v1618_v56 = vperm.slane %v1606_v33, 1  ;;  %v1582_v10 = vperm.slane %v1571_v46, 0 }
 0x34e   :  { %424 = vrot.lane.b32.xlu1 %v3112_v45, %s2308_s7  ;;  %531 = vrot.lane.b32.xlu0 %v3137_v27, %s2311_s10  ;;  %s3833_s7 = smov 113  }
 0x34f   :  { %461 = vrot.lane.b32.xlu2 %v3137_v27, %s2307_s6  ;;  %s3832_s6 = smov 112  }
 0x350   :  { %v1460_v23 = vpop.permute.xlu0 %1459  ;;  %v1425_v21 = vpop.permute.xlu1 %1424 }
 0x351   :  { %v1426_v14 = vsel %vm3796_vm2, %v3132_v50, %v1425_v21  ;;  %v1427_v29 = vsel %vm3796_vm2, %v1425_v21, %v3132_v50  ;;  %v1600_v22 = vpop.permute.xlu2 %1599  ;;  %v1477_v50 = vperm.slane %v1466_v63, 0  ;;  %vm3798_vm2 = vcmp.lt.s32.totalorder %v2427_v31, 98 }
 0x352   :  { %v1446_v6 = vmul.f32 %v1442_v12, %v1426_v14  ;;  %v1447_v38 = vmul.f32 %v1443_v49, %v1427_v29 }
 0x354   :  { %v1448_v40 = vadd.f32 %v1446_v6, %v1378_v34  ;;  %v1449_v57 = vadd.f32 %v1447_v38, %v1379_v26 }
 0x356   :  { %496 = vrot.lane.b32.xlu1 %v3137_v27, %s2309_s8  ;;  %564 = vrot.lane.b32.xlu0 %v3112_v45, %s2310_s9 }
 0x357   :  { %494 = vrot.lane.b32.xlu2 %v3112_v45, %s2309_s8  ;;  %s3838_s8 = smov 110  }
 0x358   :  { %v1493_v2 = vpop.permute.xlu0 %1492  ;;  %v1458_v17 = vpop.permute.xlu1 %1457 }
 0x359   :  { %v1496_v9 = vsel %vm3795_vm8, %v1493_v2, %v1495_v53  ;;  %v1497_v51 = vsel %vm3795_vm8, %v1495_v53, %v1493_v2  ;;  %v1461_v7 = vsel %vm3797_vm6, %v1458_v17, %v1460_v23  ;;  %v1462_v42 = vsel %vm3797_vm6, %v1460_v23, %v1458_v17  ;;  %v1633_v62 = vpop.permute.xlu2 %1632  ;;  %v1641_v23 = vld [vmem:[#allocation5 + $0xa6] ss:$8 sm:$0x3]  ;;  %v1676_v2 = vld [vmem:[#allocation5 + $0xa7] ss:$8 sm:$0x3] }
 0x35a   :  { %v1516_v41 = vmul.f32 %v1512_v52, %v1496_v9  ;;  %v1517_v61 = vmul.f32 %v1513_v19, %v1497_v51  ;;  %v1481_v20 = vmul.f32 %v1477_v50, %v1461_v7  ;;  %v1482_v28 = vmul.f32 %v1478_v43, %v1462_v42  ;;  %v1711_v43 = vld [vmem:[#allocation5 + $0xb0] ss:$8 sm:$0x3] }
 0x35b   :  { %vm3799_vm8 = vcmp.lt.s32.totalorder %v2427_v31, 109  ;;  %v1547_v53 = vperm.slane %v1536_v3, 0  ;;  %vm3800_vm6 = vcmp.lt.s32.totalorder %v2427_v31, 99  ;;  %v1653_v38 = vperm.slane %v1641_v23, 1 }
 0x35c   :  { %v1518_v18 = vadd.f32 %v1516_v41, %v1448_v40  ;;  %v1519_v13 = vadd.f32 %v1517_v61, %v1449_v57  ;;  %v1483_v5 = vadd.f32 %v1481_v20, %v1413_v58  ;;  %v1484_v1 = vadd.f32 %v1482_v28, %v1414_v35 }
 0x35d   :  { %v1722_v51 = vperm.slane %v1711_v43, 0  ;;  %v1723_v7 = vperm.slane %v1711_v43, 1  ;;  %v1687_v42 = vperm.slane %v1676_v2, 0 }
 0x35e   :  { %529 = vrot.lane.b32.xlu1 %v3112_v45, %s2311_s10  ;;  %636 = vrot.lane.b32.xlu0 %v3137_v27, %s2314_s13  ;;  %s3844_s10 = smov 97  }
 0x35f   :  { %566 = vrot.lane.b32.xlu2 %v3137_v27, %s2310_s9  ;;  %s3839_s9 = smov 99  }
 0x360   :  { %v1565_v4 = vpop.permute.xlu0 %1564  ;;  %v1530_v0 = vpop.permute.xlu1 %1529 }
 0x361   :  { %v1531_v37 = vsel %vm3799_vm8, %v1528_v25, %v1530_v0  ;;  %v1532_v36 = vsel %vm3799_vm8, %v1530_v0, %v1528_v25  ;;  %v1705_v24 = vpop.permute.xlu2 %1704  ;;  %v1583_v25 = vperm.slane %v1571_v46, 1  ;;  %vm3801_vm8 = vcmp.lt.s32.totalorder %v2427_v31, 95 }
 0x362   :  { %v1551_v39 = vmul.f32 %v1547_v53, %v1531_v37  ;;  %v1552_v11 = vmul.f32 %v1548_v15, %v1532_v36 }
 0x364   :  { %v1553_v32 = vadd.f32 %v1551_v39, %v1483_v5  ;;  %v1554_v8 = vadd.f32 %v1552_v11, %v1484_v1 }
 0x366   :  { %601 = vrot.lane.b32.xlu1 %v3137_v27, %s2312_s11  ;;  %669 = vrot.lane.b32.xlu0 %v3112_v45, %s2313_s12 }
 0x367   :  { %599 = vrot.lane.b32.xlu2 %v3112_v45, %s2312_s11  ;;  %s3847_s11 = smov 98  }
 0x368   :  { %v1598_v47 = vpop.permute.xlu0 %1597  ;;  %v1563_v48 = vpop.permute.xlu1 %1562 }
 0x369   :  { %v1601_v59 = vsel %vm3798_vm2, %v1598_v47, %v1600_v22  ;;  %v1602_v16 = vsel %vm3798_vm2, %v1600_v22, %v1598_v47  ;;  %v1566_v60 = vsel %vm3800_vm6, %v1563_v48, %v1565_v4  ;;  %v1567_v58 = vsel %vm3800_vm6, %v1565_v4, %v1563_v48  ;;  %v1738_v35 = vpop.permute.xlu2 %1737  ;;  %v1746_v4 = vld [vmem:[#allocation5 + $0xb1] ss:$8 sm:$0x3]  ;;  %v1781_v47 = vld [vmem:[#allocation5 + $0xb2] ss:$8 sm:$0x3] }
 0x36a   :  { %v1621_v34 = vmul.f32 %v1617_v30, %v1601_v59  ;;  %v1622_v26 = vmul.f32 %v1618_v56, %v1602_v16  ;;  %v1586_v12 = vmul.f32 %v1582_v10, %v1566_v60  ;;  %v1587_v49 = vmul.f32 %v1583_v25, %v1567_v58  ;;  %v1816_v25 = vld [vmem:[#allocation5 + $0xb3] ss:$8 sm:$0x3] }
 0x36b   :  { %vm3803_vm2 = vcmp.lt.s32.totalorder %v2427_v31, 97  ;;  %v1652_v22 = vperm.slane %v1641_v23, 0  ;;  %vm3802_vm6 = vcmp.lt.s32.totalorder %v2427_v31, 96  ;;  %v1758_v11 = vperm.slane %v1746_v4, 1 }
 0x36c   :  { %v1623_v21 = vadd.f32 %v1621_v34, %v1553_v32  ;;  %v1624_v14 = vadd.f32 %v1622_v26, %v1554_v8  ;;  %v1588_v29 = vadd.f32 %v1586_v12, %v1518_v18  ;;  %v1589_v6 = vadd.f32 %v1587_v49, %v1519_v13 }
 0x36d   :  { %v1827_v16 = vperm.slane %v1816_v25, 0  ;;  %v1828_v60 = vperm.slane %v1816_v25, 1  ;;  %v1792_v58 = vperm.slane %v1781_v47, 0 }
 0x36e   :  { %634 = vrot.lane.b32.xlu1 %v3112_v45, %s2314_s13  ;;  %741 = vrot.lane.b32.xlu0 %v3137_v27, %s2317_s16  ;;  %s3851_s13 = smov 94  }
 0x36f   :  { %671 = vrot.lane.b32.xlu2 %v3137_v27, %s2313_s12  ;;  %s3848_s12 = smov 96  }
 0x370   :  { %v1670_v44 = vpop.permute.xlu0 %1669  ;;  %v1635_v63 = vpop.permute.xlu1 %1634 }
 0x371   :  { %v1636_v40 = vsel %vm3803_vm2, %v1633_v62, %v1635_v63  ;;  %v1637_v57 = vsel %vm3803_vm2, %v1635_v63, %v1633_v62  ;;  %v1810_v52 = vpop.permute.xlu2 %1809  ;;  %v1688_v62 = vperm.slane %v1676_v2, 1  ;;  %vm1769_vm2 = vcmp.lt.s32.totalorder %v2427_v31, 93 }
 0x372   :  { %v1656_v19 = vmul.f32 %v1652_v22, %v1636_v40  ;;  %v1657_v50 = vmul.f32 %v1653_v38, %v1637_v57 }
 0x374   :  { %v1658_v17 = vadd.f32 %v1656_v19, %v1588_v29  ;;  %v1659_v9 = vadd.f32 %v1657_v50, %v1589_v6 }
 0x376   :  { %706 = vrot.lane.b32.xlu1 %v3137_v27, %s2315_s14  ;;  %774 = vrot.lane.b32.xlu0 %v3112_v45, %s2316_s15 }
 0x377   :  { %704 = vrot.lane.b32.xlu2 %v3112_v45, %s2315_s14  ;;  %s3854_s14 = smov 95  }
 0x378   :  { %v1703_v41 = vpop.permute.xlu0 %1702  ;;  %v1668_v61 = vpop.permute.xlu1 %1667 }
 0x379   :  { %v1706_v20 = vsel %vm3801_vm8, %v1703_v41, %v1705_v24  ;;  %v1707_v28 = vsel %vm3801_vm8, %v1705_v24, %v1703_v41  ;;  %v1671_v3 = vsel %vm3802_vm6, %v1668_v61, %v1670_v44  ;;  %v1672_v18 = vsel %vm3802_vm6, %v1670_v44, %v1668_v61  ;;  %v1843_v13 = vpop.permute.xlu2 %1842  ;;  %v1851_v44 = vld [vmem:[#allocation5 + $0xb4] ss:$8 sm:$0x3]  ;;  %v1886_v41 = vld [vmem:[#allocation5 + $0xb5] ss:$8 sm:$0x3] }
 0x37a   :  { %v1726_v5 = vmul.f32 %v1722_v51, %v1706_v20  ;;  %v1727_v1 = vmul.f32 %v1723_v7, %v1707_v28  ;;  %v1691_v53 = vmul.f32 %v1687_v42, %v1671_v3  ;;  %v1692_v15 = vmul.f32 %v1688_v62, %v1672_v18  ;;  %v1921_v62 = vld [vmem:[#allocation5 + $0xb6] ss:$8 sm:$0x3] }
 0x37b   :  { %vm3805_vm8 = vcmp.lt.s32.totalorder %v2427_v31, 94  ;;  %v1757_v24 = vperm.slane %v1746_v4, 0  ;;  %vm3804_vm6 = vcmp.lt.s32.totalorder %v2427_v31, 83  ;;  %v1863_v50 = vperm.slane %v1851_v44, 1 }
 0x37c   :  { %v1728_v0 = vadd.f32 %v1726_v5, %v1658_v17  ;;  %v1729_v37 = vadd.f32 %v1727_v1, %v1659_v9  ;;  %v1693_v36 = vadd.f32 %v1691_v53, %v1623_v21  ;;  %v1694_v39 = vadd.f32 %v1692_v15, %v1624_v14 }
 0x37d   :  { %v1932_v28 = vperm.slane %v1921_v62, 0  ;;  %v1933_v3 = vperm.slane %v1921_v62, 1  ;;  %v1897_v18 = vperm.slane %v1886_v41, 0 }
 0x37e   :  { %739 = vrot.lane.b32.xlu1 %v3112_v45, %s2317_s16  ;;  %846 = vrot.lane.b32.xlu0 %v3137_v27, %s2320_s19  ;;  %s3856_s16 = smov 82  }
 0x37f   :  { %776 = vrot.lane.b32.xlu2 %v3137_v27, %s2316_s15  ;;  %s3855_s15 = smov 93  }
 0x380   :  { %v1775_v33 = vpop.permute.xlu0 %1774  ;;  %v1740_v46 = vpop.permute.xlu1 %1739 }
 0x381   :  { %v1741_v32 = vsel %vm3805_vm8, %v1738_v35, %v1740_v46  ;;  %v1742_v8 = vsel %vm3805_vm8, %v1740_v46, %v1738_v35  ;;  %v1915_v30 = vpop.permute.xlu2 %1914  ;;  %v1793_v35 = vperm.slane %v1781_v47, 1  ;;  %vm3807_vm8 = vcmp.lt.s32.totalorder %v2427_v31, 80 }
 0x382   :  { %v1761_v56 = vmul.f32 %v1757_v24, %v1741_v32  ;;  %v1762_v10 = vmul.f32 %v1758_v11, %v1742_v8 }
 0x384   :  { %v1763_v48 = vadd.f32 %v1761_v56, %v1693_v36  ;;  %v1764_v59 = vadd.f32 %v1762_v10, %v1694_v39 }
 0x386   :  { %811 = vrot.lane.b32.xlu1 %v3137_v27, %s2318_s17  ;;  %879 = vrot.lane.b32.xlu0 %v3112_v45, %s2319_s18 }
 0x387   :  { %809 = vrot.lane.b32.xlu2 %v3112_v45, %s2318_s17  ;;  %s3859_s17 = smov 83  }
 0x388   :  { %v1808_v34 = vpop.permute.xlu0 %1807  ;;  %v1773_v26 = vpop.permute.xlu1 %1772 }
 0x389   :  { %v1811_v12 = vsel %vm3804_vm6, %v1808_v34, %v1810_v52  ;;  %v1812_v49 = vsel %vm3804_vm6, %v1810_v52, %v1808_v34  ;;  %v1776_v23 = vsel %vm1769_vm2, %v1773_v26, %v1775_v33  ;;  %v1777_v21 = vsel %vm1769_vm2, %v1775_v33, %v1773_v26  ;;  %v1948_v14 = vpop.permute.xlu2 %1947  ;;  %v1956_v33 = vld [vmem:[#allocation5 + $0xb7] ss:$8 sm:$0x3] }
 0x38a   :  { %v1831_v29 = vmul.f32 %v1827_v16, %v1811_v12  ;;  %v1832_v6 = vmul.f32 %v1828_v60, %v1812_v49  ;;  %v1796_v22 = vmul.f32 %v1792_v58, %v1776_v23  ;;  %v1797_v38 = vmul.f32 %v1793_v35, %v1777_v21  ;;  %v1991_v35 = vld [vmem:[#allocation5 + $0xc0] ss:$8 sm:$0x3] }
 0x38b   :  { %vm3806_vm6 = vcmp.lt.s32.totalorder %v2427_v31, 82  ;;  %v1862_v52 = vperm.slane %v1851_v44, 0  ;;  %v1968_v10 = vperm.slane %v1956_v33, 1  ;;  %v2002_v12 = vperm.slane %v1991_v35, 0 }
 0x38c   :  { %v1833_v63 = vadd.f32 %v1831_v29, %v1763_v48  ;;  %v1834_v40 = vadd.f32 %v1832_v6, %v1764_v59  ;;  %v1798_v57 = vadd.f32 %v1796_v22, %v1728_v0  ;;  %v1799_v19 = vadd.f32 %v1797_v38, %v1729_v37 }
 0x38d   :  { %v2003_v49 = vperm.slane %v1991_v35, 1 }
 0x38e   :  { %844 = vrot.lane.b32.xlu1 %v3112_v45, %s2320_s19  ;;  %951 = vrot.lane.b32.xlu0 %v3137_v27, %s2322_s21  ;;  %s3867_s19 = smov 80  }
 0x38f   :  { %881 = vrot.lane.b32.xlu2 %v3137_v27, %s2319_s18  ;;  %s3860_s18 = smov 81  }
 0x390   :  { %v1880_v43 = vpop.permute.xlu0 %1879  ;;  %v1845_v2 = vpop.permute.xlu1 %1844 }
 0x391   :  { %v1846_v17 = vsel %vm3806_vm6, %v1843_v13, %v1845_v2  ;;  %v1847_v9 = vsel %vm3806_vm6, %v1845_v2, %v1843_v13  ;;  %v3291_v51 = vpop.permute.xlu2 %312  ;;  %vm3808_vm6 = vcmp.lt.s32.totalorder %v2427_v31, 81  ;;  %v1898_v13 = vperm.slane %v1886_v41, 1 }
 0x392   :  { %v1866_v7 = vmul.f32 %v1862_v52, %v1846_v17  ;;  %v1867_v42 = vmul.f32 %v1863_v50, %v1847_v9  ;;  %v333_v17 = vld [vmem:[#allocation5] ss:$8 sm:$0x3]  ;;  %v403_v9 = vld [vmem:[#allocation5 + $0x2] ss:$8 sm:$0x3] }
 0x393   :  { %v338_v62 = vperm.slane %v333_v17, 1  ;;  %v407_v41 = vperm.slane %v403_v9, 0 }
 0x394   :  { %v1868_v61 = vadd.f32 %v1866_v7, %v1798_v57  ;;  %v1869_v20 = vadd.f32 %v1867_v42, %v1799_v19  ;;  %v473_v7 = vld [vmem:[#allocation5 + $0x4] ss:$8 sm:$0x3]  ;;  %v337_v42 = vperm.slane %v333_v17, 0 }
 0x396   :  { %916 = vrot.lane.b32.xlu1 %v3137_v27, %s2300_s24  ;;  %984 = vrot.lane.b32.xlu0 %v3112_v45, %s2321_s20 }
 0x397   :  { %914 = vrot.lane.b32.xlu2 %v3112_v45, %s2300_s24 }
 0x398   :  { %v1913_v5 = vpop.permute.xlu0 %1912  ;;  %v1878_v1 = vpop.permute.xlu1 %1877 }
 0x399   :  { %v1916_v53 = vsel %vm3807_vm8, %v1913_v5, %v1915_v30  ;;  %v1917_v15 = vsel %vm3807_vm8, %v1915_v30, %v1913_v5  ;;  %v1881_v4 = vsel %vm3808_vm6, %v1878_v1, %v1880_v43  ;;  %v1882_v0 = vsel %vm3808_vm6, %v1880_v43, %v1878_v1  ;;  %v357_v37 = vpop.permute.xlu2 %356 }
 0x39a   :  { %v1936_v36 = vmul.f32 %v1932_v28, %v1916_v53  ;;  %v1937_v39 = vmul.f32 %v1933_v3, %v1917_v15  ;;  %v1901_v24 = vmul.f32 %v1897_v18, %v1881_v4  ;;  %v1902_v11 = vmul.f32 %v1898_v13, %v1882_v0  ;;  %v368_v15 = vld [vmem:[#allocation5 + $0x1] ss:$8 sm:$0x3] }
 0x39b   :  { %vm1944_vm8 = vcmp.lt.s32.totalorder %v2427_v31, 79  ;;  %v1967_v30 = vperm.slane %v1956_v33, 0  ;;  %vm1979_vm6 = vcmp.lt.s32.totalorder %v2427_v31, 78  ;;  %v478_v28 = vperm.slane %v473_v7, 1 }
 0x39c   :  { %v1938_v46 = vadd.f32 %v1936_v36, %v1868_v61  ;;  %v1939_v32 = vadd.f32 %v1937_v39, %v1869_v20  ;;  %v1903_v8 = vadd.f32 %v1901_v24, %v1833_v63  ;;  %v1904_v56 = vadd.f32 %v1902_v11, %v1834_v40  ;;  %v438_v39 = vld [vmem:[#allocation5 + $0x3] ss:$8 sm:$0x3] }
 0x39d   :  { %v408_v61 = vperm.slane %v403_v9, 1 }
 0x39e   :  { %949 = vrot.lane.b32.xlu1 %v3112_v45, %s2322_s21  ;;  %1056 = vrot.lane.b32.xlu0 %v3137_v27, %s2325_s26 }
 0x39f   :  { %986 = vrot.lane.b32.xlu2 %v3137_v27, %s2321_s20  ;;  %s2350_s20 = smov 77  }
 0x3a0   :  { %v1985_v25 = vpop.permute.xlu0 %1984  ;;  %v1950_v47 = vpop.permute.xlu1 %1949 }
 0x3a1   :  { %v1951_v48 = vsel %vm1944_vm8, %v1948_v14, %v1950_v47  ;;  %v1952_v59 = vsel %vm1944_vm8, %v1950_v47, %v1948_v14  ;;  %v390_v16 = vpop.permute.xlu2 %389 }
 0x3a2   :  { %v1971_v60 = vmul.f32 %v1967_v30, %v1951_v48  ;;  %v1972_v58 = vmul.f32 %v1968_v10, %v1952_v59  ;;  %v442_v10 = vperm.slane %v438_v39, 0 }
 0x3a4   :  { %v3320_v34 = vadd.f32 %v1971_v60, %v1903_v8  ;;  %v3322_v26 = vadd.f32 %v1972_v58, %v1904_v56  ;;  %v373_v8 = vperm.slane %v368_v15, 1 }
 0x3a6   :  { %1021 = vrot.lane.b32.xlu1 %v3137_v27, %s2323_s22  ;;  %1089 = vrot.lane.b32.xlu0 %v3112_v45, %s2324_s25 }
 0x3a7   :  { %1019 = vrot.lane.b32.xlu2 %v3112_v45, %s2323_s22 }
 0x3a8   :  { %v1983_v23 = vpop.permute.xlu1 %1982  ;;  %v355_v21 = vpop.permute.xlu0 %354 }
 0x3a9   :  { %v1986_v14 = vsel %vm1979_vm6, %v1983_v23, %v1985_v25  ;;  %v1987_v29 = vsel %vm1979_vm6, %v1985_v25, %v1983_v23  ;;  %v359_v6 = vsel %vm358_vm14, %v355_v21, %v357_v37  ;;  %v360_v22 = vsel %vm358_vm14, %v357_v37, %v355_v21  ;;  %v462_v38 = vpop.permute.xlu2 %461  ;;  %v508_v23 = vld [vmem:[#allocation5 + $0x5] ss:$8 sm:$0x3] }
 0x3aa   :  { %v2006_v44 = vmul.f32 %v2002_v12, %v1986_v14  ;;  %v2007_v63 = vmul.f32 %v2003_v49, %v1987_v29  ;;  %v443_v25 = vperm.slane %v438_v39, 1  ;;  %v377_v35 = vmul.f32 %v373_v8, %v359_v6  ;;  %v578_v29 = vld [vmem:[#allocation5 + $0x7] ss:$8 sm:$0x3] }
 0x3ab   :  { %v583_v6 = vperm.slane %v578_v29, 1  ;;  %vm3836_vm14 = vcmp.lt.s32.totalorder %v2427_v31, 33 }
 0x3ac   :  { %v3339_v40 = vadd.f32 %v2006_v44, %v1938_v46  ;;  %v3341_v57 = vadd.f32 %v2007_v63, %v1939_v32  ;;  %v372_v32 = vperm.slane %v368_v15, 0  ;;  %v513_v44 = vperm.slane %v508_v23, 1 }
 0x3ae   :  { %1054 = vrot.lane.b32.xlu1 %v3112_v45, %s2325_s26  ;;  %1207 = vrot.lane.b32.xlu0 %v3137_v27, %s2328_s27  ;;  %v376_v58 = vmul.f32 %v372_v32, %v360_v22  ;;  %v582_v22 = vperm.slane %v578_v29, 0  ;;  %s2126_s26 = sshll.u32 %s3729_s4, 4  ;;  %s2127_s26 = int_to_ptr.hbm [resolvable:$true] %s2126_s26 }
 0x3af   :  { %1091 = vrot.lane.b32.xlu2 %v3137_v27, %s2324_s25 }
 0x3b0   :  { %v315_v19 = vpop.permute.xlu1 %314  ;;  %v427_v52 = vpop.permute.xlu0 %426 }
 0x3b1   :  { %v317_v50 = vsel %vm316_vm12, %v3291_v51, %v315_v19  ;;  %v318_v43 = vsel %vm316_vm12, %v315_v19, %v3291_v51  ;;  %v3355_v2 = vpop.permute.xlu2 %494  ;;  %v477_v51 = vperm.slane %v473_v7, 0  ;;  %vm3834_vm12 = vcmp.lt.s32.totalorder %v2427_v31, 32 }
 0x3b2   :  { %v341_v4 = vmul.f32 %v337_v42, %v318_v43  ;;  %v342_v0 = vmul.f32 %v338_v62, %v317_v50  ;;  %v543_v62 = vld [vmem:[#allocation5 + $0x6] ss:$8 sm:$0x3] }
 0x3b6   :  { %1126 = vrot.lane.b32.xlu1 %v3137_v27, %s2326_s0  ;;  %1240 = vrot.lane.b32.xlu0 %v3112_v45, %s2327_s3 }
 0x3b7   :  { %1124 = vrot.lane.b32.xlu2 %v3112_v45, %s2326_s0  ;;  %s3919_s0 = smov 256  }
 0x3b8   :  { %v392_v20 = vpop.permute.xlu1 %391  ;;  %v460_v3 = vpop.permute.xlu0 %459 }
 0x3b9   :  { %v394_v18 = vsel %vm393_vm13, %v390_v16, %v392_v20  ;;  %v395_v13 = vsel %vm393_vm13, %v392_v20, %v390_v16  ;;  %v464_v5 = vsel %vm463_vm1, %v460_v3, %v462_v38  ;;  %v465_v1 = vsel %vm463_vm1, %v462_v38, %v460_v3  ;;  %v567_v53 = vpop.permute.xlu2 %566  ;;  %vm3835_vm13 = vmmov %vm3834_vm12 }
 0x3ba   :  { %v411_v37 = vmul.f32 %v407_v41, %v395_v13  ;;  %v412_v36 = vmul.f32 %v408_v61, %v394_v18  ;;  %v481_v33 = vmul.f32 %v477_v51, %v465_v1  ;;  %v482_v46 = vmul.f32 %v478_v28, %v464_v5 }
 0x3bb   :  { %v512_v38 = vperm.slane %v508_v23, 0  ;;  %v548_v18 = vperm.slane %v543_v62, 1 }
 0x3bc   :  { %v413_v24 = vadd.f32 %v411_v37, %v341_v4  ;;  %v414_v11 = vadd.f32 %v412_v36, %v342_v0  ;;  %v613_v37 = vld [vmem:[#allocation5 + $0x10] ss:$8 sm:$0x3] }
 0x3be   :  { %v483_v56 = vadd.f32 %v481_v33, %v413_v24  ;;  %v484_v30 = vadd.f32 %v482_v46, %v414_v11  ;;  %1205 = vrot.lane.b32.xlu1 %v3112_v45, %s2328_s27  ;;  %1312 = vrot.lane.b32.xlu0 %v3137_v27, %s3829_s2  ;;  %v683_v24 = vld [vmem:[#allocation5 + $0x12] ss:$8 sm:$0x3]  ;;  %v617_v11 = vperm.slane %v613_v37, 0  ;;  %v618_v33 = vperm.slane %v613_v37, 1 }
 0x3bf   :  { %1242 = vrot.lane.b32.xlu2 %v3137_v27, %s2327_s3  ;;  %v687_v32 = vperm.slane %v683_v24, 0  ;;  %v688_v8 = vperm.slane %v683_v24, 1 }
 0x3c0   :  { %v425_v47 = vpop.permute.xlu1 %424  ;;  %v532_v48 = vpop.permute.xlu0 %531 }
 0x3c1   :  { %v429_v59 = vsel %vm428_vm15, %v425_v47, %v427_v52  ;;  %v430_v16 = vsel %vm428_vm15, %v427_v52, %v425_v47  ;;  %v600_v60 = vpop.permute.xlu2 %599  ;;  %vm3837_vm15 = vmmov %vm3836_vm14 }
 0x3c2   :  { %v446_v12 = vmul.f32 %v442_v10, %v430_v16  ;;  %v447_v49 = vmul.f32 %v443_v25, %v429_v59 }
 0x3c4   :  { %v448_v21 = vadd.f32 %v446_v12, %v376_v58  ;;  %v449_v14 = vadd.f32 %v447_v49, %v377_v35  ;;  %v648_v58 = vld [vmem:[#allocation5 + $0x11] ss:$8 sm:$0x3] }
 0x3c5   :  { %v653_v29 = vperm.slane %v648_v58, 1 }
 0x3c6   :  { %1277 = vrot.lane.b32.xlu1 %v3137_v27, %s3830_s30  ;;  %1345 = vrot.lane.b32.xlu0 %v3112_v45, %s3831_s5 }
 0x3c7   :  { %1275 = vrot.lane.b32.xlu2 %v3112_v45, %s3830_s30 }
 0x3c8   :  { %v497_v63 = vpop.permute.xlu1 %496  ;;  %v565_v19 = vpop.permute.xlu0 %564 }
 0x3c9   :  { %v499_v52 = vsel %vm498_vm0, %v3355_v2, %v497_v63  ;;  %v500_v50 = vsel %vm498_vm0, %v497_v63, %v3355_v2  ;;  %v569_v43 = vsel %vm568_vm5, %v565_v19, %v567_v53  ;;  %v570_v17 = vsel %vm568_vm5, %v567_v53, %v565_v19  ;;  %v672_v9 = vpop.permute.xlu2 %671 }
 0x3ca   :  { %v516_v7 = vmul.f32 %v512_v38, %v500_v50  ;;  %v517_v42 = vmul.f32 %v513_v44, %v499_v52  ;;  %v586_v20 = vmul.f32 %v582_v22, %v570_v17  ;;  %v587_v51 = vmul.f32 %v583_v6, %v569_v43  ;;  %v718_v50 = vld [vmem:[#allocation5 + $0x13] ss:$8 sm:$0x3] }
 0x3cb   :  { %v547_v2 = vperm.slane %v543_v62, 0  ;;  %vm3840_vm0 = vcmp.lt.s32.totalorder %v2427_v31, 31  ;;  %vm3845_vm5 = vcmp.lt.s32.totalorder %v2427_v31, 30 }
 0x3cc   :  { %v518_v41 = vadd.f32 %v516_v7, %v448_v21  ;;  %v519_v61 = vadd.f32 %v517_v42, %v449_v14  ;;  %v722_v7 = vperm.slane %v718_v50, 0  ;;  %v723_v42 = vperm.slane %v718_v50, 1  ;;  %vm3841_vm1 = vmmov %vm3840_vm0 }
 0x3ce   :  { %v588_v28 = vadd.f32 %v586_v20, %v518_v41  ;;  %v589_v3 = vadd.f32 %v587_v51, %v519_v61  ;;  %1310 = vrot.lane.b32.xlu1 %v3112_v45, %s3829_s2  ;;  %1417 = vrot.lane.b32.xlu0 %v3137_v27, %s3832_s6 }
 0x3cf   :  { %1347 = vrot.lane.b32.xlu2 %v3137_v27, %s3831_s5 }
 0x3d0   :  { %v530_v13 = vpop.permute.xlu1 %529  ;;  %v637_v5 = vpop.permute.xlu0 %636 }
 0x3d1   :  { %v534_v1 = vsel %vm533_vm3, %v530_v13, %v532_v48  ;;  %v535_v53 = vsel %vm533_vm3, %v532_v48, %v530_v13  ;;  %v705_v15 = vpop.permute.xlu2 %704  ;;  %vm3842_vm3 = vcmp.lt.s32.totalorder %v2427_v31, 29 }
 0x3d2   :  { %v551_v4 = vmul.f32 %v547_v2, %v535_v53  ;;  %v552_v0 = vmul.f32 %v548_v18, %v534_v1  ;;  %v753_v1 = vld [vmem:[#allocation5 + $0x14] ss:$8 sm:$0x3] }
 0x3d3   :  { %v758_v24 = vperm.slane %v753_v1, 1 }
 0x3d4   :  { %v553_v36 = vadd.f32 %v551_v4, %v483_v56  ;;  %v554_v39 = vadd.f32 %v552_v0, %v484_v30 }
 0x3d6   :  { %1382 = vrot.lane.b32.xlu1 %v3137_v27, %s3833_s7  ;;  %1450 = vrot.lane.b32.xlu0 %v3112_v45, %s2333_s28 }
 0x3d7   :  { %1380 = vrot.lane.b32.xlu2 %v3112_v45, %s3833_s7 }
 0x3d8   :  { %v602_v46 = vpop.permute.xlu1 %601  ;;  %v670_v10 = vpop.permute.xlu0 %669 }
 0x3d9   :  { %v604_v56 = vsel %vm603_vm4, %v600_v60, %v602_v46  ;;  %v605_v30 = vsel %vm603_vm4, %v602_v46, %v600_v60  ;;  %v674_v25 = vsel %vm3834_vm12, %v670_v10, %v672_v9  ;;  %v675_v47 = vsel %vm3835_vm13, %v672_v9, %v670_v10  ;;  %v777_v48 = vpop.permute.xlu2 %776  ;;  %v788_v9 = vld [vmem:[#allocation5 + $0x15] ss:$8 sm:$0x3]  ;;  %vm3843_vm4 = vmmov %vm3842_vm3 }
 0x3da   :  { %v621_v59 = vmul.f32 %v617_v11, %v605_v30  ;;  %v622_v16 = vmul.f32 %v618_v33, %v604_v56  ;;  %v691_v49 = vmul.f32 %v687_v32, %v675_v47  ;;  %v692_v23 = vmul.f32 %v688_v8, %v674_v25  ;;  %vm3846_vm12 = vmmov %vm3845_vm5  ;;  %v823_v30 = vld [vmem:[#allocation5 + $0x16] ss:$8 sm:$0x3] }
 0x3db   :  { %v652_v60 = vperm.slane %v648_v58, 0  ;;  %v792_v41 = vperm.slane %v788_v9, 0  ;;  %v793_v61 = vperm.slane %v788_v9, 1  ;;  %vm3849_vm13 = vcmp.lt.s32.totalorder %v2427_v31, 19 }
 0x3dc   :  { %v623_v35 = vadd.f32 %v621_v59, %v553_v36  ;;  %v624_v12 = vadd.f32 %v622_v16, %v554_v39  ;;  %v827_v59 = vperm.slane %v823_v30, 0  ;;  %v828_v16 = vperm.slane %v823_v30, 1 }
 0x3de   :  { %v693_v21 = vadd.f32 %v691_v49, %v623_v35  ;;  %v694_v14 = vadd.f32 %v692_v23, %v624_v12  ;;  %1415 = vrot.lane.b32.xlu1 %v3112_v45, %s3832_s6  ;;  %1522 = vrot.lane.b32.xlu0 %v3137_v27, %s2337_s1 }
 0x3df   :  { %1452 = vrot.lane.b32.xlu2 %v3137_v27, %s2333_s28 }
 0x3e0   :  { %v635_v38 = vpop.permute.xlu1 %634  ;;  %v742_v44 = vpop.permute.xlu0 %741 }
 0x3e1   :  { %v639_v63 = vsel %vm3836_vm14, %v635_v38, %v637_v5  ;;  %v640_v22 = vsel %vm3837_vm15, %v637_v5, %v635_v38  ;;  %v810_v6 = vpop.permute.xlu2 %809  ;;  %vm3850_vm14 = vmmov %vm3849_vm13 }
 0x3e2   :  { %v656_v19 = vmul.f32 %v652_v60, %v640_v22  ;;  %v657_v52 = vmul.f32 %v653_v29, %v639_v63  ;;  %v858_v63 = vld [vmem:[#allocation5 + $0x17] ss:$8 sm:$0x3] }
 0x3e3   :  { %v863_v9 = vperm.slane %v858_v63, 1 }
 0x3e4   :  { %v658_v43 = vadd.f32 %v656_v19, %v588_v28  ;;  %v659_v17 = vadd.f32 %v657_v52, %v589_v3 }
 0x3e6   :  { %1487 = vrot.lane.b32.xlu1 %v3137_v27, %s3838_s8  ;;  %1555 = vrot.lane.b32.xlu0 %v3112_v45, %s3839_s9 }
 0x3e7   :  { %1485 = vrot.lane.b32.xlu2 %v3112_v45, %s3838_s8 }
 0x3e8   :  { %v707_v62 = vpop.permute.xlu1 %706  ;;  %v775_v20 = vpop.permute.xlu0 %774 }
 0x3e9   :  { %v709_v51 = vsel %vm3840_vm0, %v705_v15, %v707_v62  ;;  %v710_v28 = vsel %vm3841_vm1, %v707_v62, %v705_v15  ;;  %v779_v3 = vsel %vm3842_vm3, %v775_v20, %v777_v48  ;;  %v780_v2 = vsel %vm3843_vm4, %v777_v48, %v775_v20  ;;  %v882_v18 = vpop.permute.xlu2 %881  ;;  %v893_v48 = vld [vmem:[#allocation5 + $0x20] ss:$8 sm:$0x3] }
 0x3ea   :  { %v726_v13 = vmul.f32 %v722_v7, %v710_v28  ;;  %v727_v5 = vmul.f32 %v723_v42, %v709_v51  ;;  %v796_v0 = vmul.f32 %v792_v41, %v780_v2  ;;  %v797_v37 = vmul.f32 %v793_v61, %v779_v3  ;;  %v928_v28 = vld [vmem:[#allocation5 + $0x21] ss:$8 sm:$0x3] }
 0x3eb   :  { %v757_v15 = vperm.slane %v753_v1, 0  ;;  %v897_v35 = vperm.slane %v893_v48, 0  ;;  %v898_v12 = vperm.slane %v893_v48, 1  ;;  %vm3861_vm0 = vcmp.lt.s32.totalorder %v2427_v31, 13 }
 0x3ec   :  { %v728_v53 = vadd.f32 %v726_v13, %v658_v43  ;;  %v729_v4 = vadd.f32 %v727_v5, %v659_v17  ;;  %v932_v13 = vperm.slane %v928_v28, 0  ;;  %v933_v5 = vperm.slane %v928_v28, 1  ;;  %vm3862_vm1 = vmmov %vm3861_vm0 }
 0x3ed   :  { %vm3868_vm4 = vcmp.lt.s32.totalorder %v2427_v31, 1 }
 0x3ee   :  { %v798_v36 = vadd.f32 %v796_v0, %v728_v53  ;;  %v799_v39 = vadd.f32 %v797_v37, %v729_v4  ;;  %1520 = vrot.lane.b32.xlu1 %v3112_v45, %s2337_s1  ;;  %1627 = vrot.lane.b32.xlu0 %v3137_v27, %s3844_s10 }
 0x3ef   :  { %1557 = vrot.lane.b32.xlu2 %v3137_v27, %s3839_s9 }
 0x3f0   :  { %v740_v11 = vpop.permute.xlu1 %739  ;;  %v847_v33 = vpop.permute.xlu0 %846 }
 0x3f1   :  { %v744_v46 = vsel %vm3845_vm5, %v740_v11, %v742_v44  ;;  %v745_v32 = vsel %vm3846_vm12, %v742_v44, %v740_v11  ;;  %v915_v8 = vpop.permute.xlu2 %914  ;;  %vm3869_vm5 = vmmov %vm3868_vm4  ;;  %vm3870_vm12 = vcmp.lt.s32.totalorder %v2427_v31, 126 }
 0x3f2   :  { %v761_v10 = vmul.f32 %v757_v15, %v745_v32  ;;  %v762_v56 = vmul.f32 %v758_v24, %v744_v46  ;;  %v963_v46 = vld [vmem:[#allocation5 + $0x22] ss:$8 sm:$0x3] }
 0x3f3   :  { %v968_v48 = vperm.slane %v963_v46, 1 }
 0x3f4   :  { %v763_v25 = vadd.f32 %v761_v10, %v693_v21  ;;  %v764_v47 = vadd.f32 %v762_v56, %v694_v14 }
 0x3f6   :  { %1592 = vrot.lane.b32.xlu1 %v3137_v27, %s3847_s11  ;;  %1660 = vrot.lane.b32.xlu0 %v3112_v45, %s3848_s12 }
 0x3f7   :  { %1590 = vrot.lane.b32.xlu2 %v3112_v45, %s3847_s11 }
 0x3f8   :  { %v812_v58 = vpop.permute.xlu1 %811  ;;  %v880_v49 = vpop.permute.xlu0 %879 }
 0x3f9   :  { %v814_v23 = vsel %vm3849_vm13, %v810_v6, %v812_v58  ;;  %v815_v21 = vsel %vm3850_vm14, %v812_v58, %v810_v6  ;;  %v884_v14 = vsel %vm883_vm9, %v880_v49, %v882_v18  ;;  %v885_v60 = vsel %vm883_vm9, %v882_v18, %v880_v49  ;;  %v987_v29 = vpop.permute.xlu2 %986  ;;  %v998_v18 = vld [vmem:[#allocation5 + $0x23] ss:$8 sm:$0x3]  ;;  %vm3871_vm13 = vmmov %vm3870_vm12 }
 0x3fa   :  { %v831_v38 = vmul.f32 %v827_v59, %v815_v21  ;;  %v832_v44 = vmul.f32 %v828_v16, %v814_v23  ;;  %v901_v52 = vmul.f32 %v897_v35, %v885_v60  ;;  %v902_v50 = vmul.f32 %v898_v12, %v884_v14  ;;  %v1033_v21 = vld [vmem:[#allocation5 + $0x24] ss:$8 sm:$0x3] }
 0x3fb   :  { %v862_v6 = vperm.slane %v858_v63, 0  ;;  %vm3852_vm9 = vcmp.lt.s32.totalorder %v2427_v31, 18  ;;  %v1002_v53 = vperm.slane %v998_v18, 0  ;;  %v1003_v4 = vperm.slane %v998_v18, 1 }
 0x3fc   :  { %v833_v22 = vadd.f32 %v831_v38, %v763_v25  ;;  %v834_v19 = vadd.f32 %v832_v44, %v764_v47  ;;  %vm3853_vm15 = vmmov %vm3852_vm9  ;;  %v1037_v38 = vperm.slane %v1033_v21, 0  ;;  %v1038_v44 = vperm.slane %v1033_v21, 1 }
 0x3fd   :  { %vm3872_vm14 = vcmp.lt.s32.totalorder %v2427_v31, 127 }
 0x3fe   :  { %v903_v43 = vadd.f32 %v901_v52, %v833_v22  ;;  %v904_v17 = vadd.f32 %v902_v50, %v834_v19  ;;  %1625 = vrot.lane.b32.xlu1 %v3112_v45, %s3844_s10  ;;  %1732 = vrot.lane.b32.xlu0 %v3137_v27, %s3851_s13 }
 0x3ff   :  { %1662 = vrot.lane.b32.xlu2 %v3137_v27, %s3848_s12 }
 0x400   :  { %v845_v7 = vpop.permute.xlu1 %844  ;;  %v952_v42 = vpop.permute.xlu0 %951 }
 0x401   :  { %v849_v62 = vsel %vm3852_vm9, %v845_v7, %v847_v33  ;;  %v850_v41 = vsel %vm3853_vm15, %v847_v33, %v845_v7  ;;  %v1020_v61 = vpop.permute.xlu2 %1019  ;;  %vm3873_vm9 = vmmov %vm3872_vm14  ;;  %vm3874_vm15 = vcmp.lt.s32.totalorder %v2427_v31, 125 }
 0x402   :  { %v866_v20 = vmul.f32 %v862_v6, %v850_v41  ;;  %v867_v51 = vmul.f32 %v863_v9, %v849_v62  ;;  %v1068_v62 = vld [vmem:[#allocation5 + $0x25] ss:$8 sm:$0x3] }
 0x403   :  { %v1073_v18 = vperm.slane %v1068_v62, 1 }
 0x404   :  { %v868_v3 = vadd.f32 %v866_v20, %v798_v36  ;;  %v869_v2 = vadd.f32 %v867_v51, %v799_v39 }
 0x406   :  { %1697 = vrot.lane.b32.xlu1 %v3137_v27, %s3854_s14  ;;  %1765 = vrot.lane.b32.xlu0 %v3112_v45, %s3855_s15 }
 0x407   :  { %1695 = vrot.lane.b32.xlu2 %v3112_v45, %s3854_s14 }
 0x408   :  { %v917_v1 = vpop.permute.xlu1 %916  ;;  %v985_v0 = vpop.permute.xlu0 %984 }
 0x409   :  { %v919_v37 = vsel %vm918_vm7, %v915_v8, %v917_v1  ;;  %v920_v36 = vsel %vm918_vm7, %v917_v1, %v915_v8  ;;  %v989_v39 = vsel %vm988_vm11, %v985_v0, %v987_v29  ;;  %v990_v15 = vsel %vm988_vm11, %v987_v29, %v985_v0  ;;  %v1092_v24 = vpop.permute.xlu2 %1091  ;;  %v1103_v29 = vld [vmem:[#allocation5 + $0x26] ss:$8 sm:$0x3]  ;;  %v3863_v1 = vld [vmem:[#allocation23_spill] sm:$0xff] }
 0x40a   :  { %v936_v11 = vmul.f32 %v932_v13, %v920_v36  ;;  %v937_v33 = vmul.f32 %v933_v5, %v919_v37  ;;  %v1006_v56 = vmul.f32 %v1002_v53, %v990_v15  ;;  %v1007_v30 = vmul.f32 %v1003_v4, %v989_v39  ;;  %v3864_v4 = vld [vmem:[#allocation24_spill] sm:$0xff] }
 0x40b   :  { %v967_v8 = vperm.slane %v963_v46, 0  ;;  %vm3857_vm7 = vcmp.lt.s32.totalorder %v2427_v31, 15  ;;  %v1107_v22 = vperm.slane %v1103_v29, 0  ;;  %v1108_v19 = vperm.slane %v1103_v29, 1 }
 0x40c   :  { %v938_v32 = vadd.f32 %v936_v11, %v868_v3  ;;  %v939_v10 = vadd.f32 %v937_v33, %v869_v2  ;;  %vm3858_vm11 = vmmov %vm3857_vm7  ;;  %v1138_v11 = vld [vmem:[#allocation5 + $0x27] ss:$8 sm:$0x3]  ;;  %v1254_v33 = vld [vmem:[#allocation5 + $0x32] ss:$8 sm:$0x3] }
 0x40e   :  { %v1008_v25 = vadd.f32 %v1006_v56, %v938_v32  ;;  %v1009_v47 = vadd.f32 %v1007_v30, %v939_v10  ;;  %1730 = vrot.lane.b32.xlu1 %v3112_v45, %s3851_s13  ;;  %1837 = vrot.lane.b32.xlu0 %v3137_v27, %s3856_s16  ;;  %v1142_v10 = vperm.slane %v1138_v11, 0  ;;  %v1143_v56 = vperm.slane %v1138_v11, 1 }
 0x40f   :  { %1767 = vrot.lane.b32.xlu2 %v3137_v27, %s3855_s15  ;;  %v1258_v30 = vperm.slane %v1254_v33, 0 }
 0x410   :  { %v950_v59 = vpop.permute.xlu1 %949  ;;  %v1057_v16 = vpop.permute.xlu0 %1056 }
 0x411   :  { %v954_v58 = vsel %vm3857_vm7, %v950_v59, %v952_v42  ;;  %v955_v35 = vsel %vm3858_vm11, %v952_v42, %v950_v59  ;;  %v1125_v12 = vpop.permute.xlu2 %1124  ;;  %vm3875_vm7 = vmmov %vm3874_vm15  ;;  %vm3876_vm11 = vcmp.lt.s32.totalorder %v2427_v31, 114 }
 0x412   :  { %v971_v49 = vmul.f32 %v967_v8, %v955_v35  ;;  %v972_v23 = vmul.f32 %v968_v48, %v954_v58  ;;  %v1259_v8 = vperm.slane %v1254_v33, 1 }
 0x414   :  { %v973_v14 = vadd.f32 %v971_v49, %v903_v43  ;;  %v974_v60 = vadd.f32 %v972_v23, %v904_v17 }
 0x416   :  { %1802 = vrot.lane.b32.xlu1 %v3137_v27, %s3859_s17  ;;  %1870 = vrot.lane.b32.xlu0 %v3112_v45, %s3860_s18 }
 0x417   :  { %1800 = vrot.lane.b32.xlu2 %v3112_v45, %s3859_s17 }
 0x418   :  { %v1022_v63 = vpop.permute.xlu1 %1021  ;;  %v1090_v52 = vpop.permute.xlu0 %1089 }
 0x419   :  { %v1024_v50 = vsel %vm3861_vm0, %v1020_v61, %v1022_v63  ;;  %v1025_v43 = vsel %vm3862_vm1, %v1022_v63, %v1020_v61  ;;  %v1094_v17 = vsel %vm1093_vm10, %v1090_v52, %v1092_v24  ;;  %v1095_v6 = vsel %vm1093_vm10, %v1092_v24, %v1090_v52  ;;  %v1243_v9 = vpop.permute.xlu2 %1242  ;;  %vm3877_vm0 = vmmov %vm3876_vm11 }
 0x41a   :  { %v1041_v7 = vmul.f32 %v1037_v38, %v1025_v43  ;;  %v1042_v42 = vmul.f32 %v1038_v44, %v1024_v50  ;;  %v1111_v51 = vmul.f32 %v1107_v22, %v1095_v6  ;;  %v1112_v28 = vmul.f32 %v1108_v19, %v1094_v17 }
 0x41b   :  { %v1072_v61 = vperm.slane %v1068_v62, 0  ;;  %vm3865_vm10 = vcmp.lt.s32.totalorder %v2427_v31, 3  ;;  %vm3878_vm1 = vcmp.lt.s32.totalorder %v2427_v31, 115 }
 0x41c   :  { %v1043_v41 = vadd.f32 %v1041_v7, %v973_v14  ;;  %v1044_v20 = vadd.f32 %v1042_v42, %v974_v60  ;;  %vm3866_vm3 = vmmov %vm3865_vm10  ;;  %v1219_v60 = vld [vmem:[#allocation5 + $0x31] ss:$8 sm:$0x3]  ;;  %v1289_v7 = vld [vmem:[#allocation5 + $0x33] ss:$8 sm:$0x3] }
 0x41d   :  { %v1224_v22 = vperm.slane %v1219_v60, 1 }
 0x41e   :  { %v1113_v3 = vadd.f32 %v1111_v51, %v1043_v41  ;;  %v1114_v2 = vadd.f32 %v1112_v28, %v1044_v20  ;;  %1835 = vrot.lane.b32.xlu1 %v3112_v45, %s3856_s16  ;;  %1942 = vrot.lane.b32.xlu0 %v3137_v27, %s2349_s23  ;;  %v1293_v41 = vperm.slane %v1289_v7, 0  ;;  %v1294_v20 = vperm.slane %v1289_v7, 1 }
 0x41f   :  { %1872 = vrot.lane.b32.xlu2 %v3137_v27, %s3860_s18 }
 0x420   :  { %v1055_v13 = vpop.permute.xlu1 %1054  ;;  %v1208_v5 = vpop.permute.xlu0 %1207  ;;  %v1182_v53 = vadd.f32 %v3863_v1, %v1113_v3  ;;  %v1183_v0 = vadd.f32 %v3864_v4, %v1114_v2 }
 0x421   :  { %v1059_v37 = vsel %vm3865_vm10, %v1055_v13, %v1057_v16  ;;  %v1060_v36 = vsel %vm3866_vm3, %v1057_v16, %v1055_v13  ;;  %v1276_v39 = vpop.permute.xlu2 %1275  ;;  %vm3879_vm10 = vmmov %vm3878_vm1  ;;  %vm3880_vm3 = vcmp.lt.s32.totalorder %v2427_v31, 113 }
 0x422   :  { %v1076_v15 = vmul.f32 %v1072_v61, %v1060_v36  ;;  %v1077_v24 = vmul.f32 %v1073_v18, %v1059_v37 }
 0x424   :  { %v1078_v46 = vadd.f32 %v1076_v15, %v1008_v25  ;;  %v1079_v32 = vadd.f32 %v1077_v24, %v1009_v47 }
 0x426   :  { %1907 = vrot.lane.b32.xlu1 %v3137_v27, %s3867_s19  ;;  %1975 = vrot.lane.b32.xlu0 %v3112_v45, %s2348_s29 }
 0x427   :  { %1905 = vrot.lane.b32.xlu2 %v3112_v45, %s3867_s19 }
 0x428   :  { %v1127_v48 = vpop.permute.xlu1 %1126  ;;  %v1241_v59 = vpop.permute.xlu0 %1240 }
 0x429   :  { %v1129_v16 = vsel %vm3868_vm4, %v1125_v12, %v1127_v48  ;;  %v1130_v25 = vsel %vm3869_vm5, %v1127_v48, %v1125_v12  ;;  %v1245_v47 = vsel %vm3870_vm12, %v1241_v59, %v1243_v9  ;;  %v1246_v58 = vsel %vm3871_vm13, %v1243_v9, %v1241_v59  ;;  %v1348_v35 = vpop.permute.xlu2 %1347  ;;  %v1394_v48 = vld [vmem:[#allocation5 + $0x36] ss:$8 sm:$0x3]  ;;  %vm3881_vm4 = vmmov %vm3880_vm3 }
 0x42a   :  { %v1146_v49 = vmul.f32 %v1142_v10, %v1130_v25  ;;  %v1147_v23 = vmul.f32 %v1143_v56, %v1129_v16  ;;  %v1262_v21 = vmul.f32 %v1258_v30, %v1245_v47  ;;  %v1263_v14 = vmul.f32 %v1259_v8, %v1246_v58  ;;  %v1464_v25 = vld [vmem:[#allocation5 + $0x40] ss:$8 sm:$0x3] }
 0x42b   :  { %v1223_v12 = vperm.slane %v1219_v60, 0  ;;  %v1398_v47 = vperm.slane %v1394_v48, 0  ;;  %v1399_v58 = vperm.slane %v1394_v48, 1  ;;  %vm3882_vm5 = vcmp.lt.s32.totalorder %v2427_v31, 111 }
 0x42c   :  { %v1148_v29 = vadd.f32 %v1146_v49, %v1078_v46  ;;  %v1149_v38 = vadd.f32 %v1147_v23, %v1079_v32  ;;  %v1264_v44 = vadd.f32 %v1262_v21, %v1182_v53  ;;  %v1265_v63 = vadd.f32 %v1263_v14, %v1183_v0  ;;  %vm3883_vm12 = vmmov %vm3882_vm5 }
 0x42d   :  { %v1468_v49 = vperm.slane %v1464_v25, 0  ;;  %vm3884_vm13 = vcmp.lt.s32.totalorder %v2427_v31, 112 }
 0x42e   :  { %1940 = vrot.lane.b32.xlu1 %v3112_v45, %s2349_s23  ;;  %2017 = vrot.lane.b32.xlu0 %v2505_v54, %s2350_s20  ;;  %v1359_v54 = vld [vmem:[#allocation5 + $0x35] ss:$8 sm:$0x3]  ;;  %s2351_s23 = smov [#allocation7]  }
 0x42f   :  { %1977 = vrot.lane.b32.xlu2 %v3137_v27, %s2348_s29  ;;  %v1363_v28 = vperm.slane %v1359_v54, 0  ;;  %v1364_v3 = vperm.slane %v1359_v54, 1  ;;  %s2124_s21 = sshll.u32 %s2351_s23, 4  ;;  %s2125_s21 = int_to_ptr.vmem [resolvable:$true] %s2124_s21 }
 0x430   :  { %v1206_v19 = vpop.permute.xlu1 %1205  ;;  %v1313_v52 = vpop.permute.xlu0 %1312 }
 0x431   :  { %v1210_v50 = vsel %vm3872_vm14, %v1206_v19, %v1208_v5  ;;  %v1211_v43 = vsel %vm3873_vm9, %v1208_v5, %v1206_v19  ;;  %v1381_v17 = vpop.permute.xlu2 %1380  ;;  %vm3885_vm14 = vmmov %vm3884_vm13  ;;  %vm3886_vm9 = vcmp.lt.s32.totalorder %v2427_v31, 110 }
 0x432   :  { %v1227_v6 = vmul.f32 %v1223_v12, %v1210_v50  ;;  %v1228_v9 = vmul.f32 %v1224_v22, %v1211_v43  ;;  %v1429_v12 = vld [vmem:[#allocation5 + $0x37] ss:$8 sm:$0x3] }
 0x433   :  { %v1434_v7 = vperm.slane %v1429_v12, 1 }
 0x434   :  { %v1229_v42 = vadd.f32 %v1227_v6, %v1148_v29  ;;  %v1230_v62 = vadd.f32 %v1228_v9, %v1149_v38  ;;  %v1433_v9 = vperm.slane %v1429_v12, 0 }
 0x436   :  { %2012 = vrot.lane.b32.xlu1 %v3137_v27, %s2350_s20 }
 0x437   :  { %2010 = vrot.lane.b32.xlu2 %v3112_v45, %s2350_s20  ;;  %v1324_v45 = vld [vmem:[#allocation5 + $0x34] ss:$8 sm:$0x3] }
 0x438   :  { %v1278_v51 = vpop.permute.xlu1 %1277  ;;  %v1346_v2 = vpop.permute.xlu0 %1345  ;;  %v1328_v11 = vperm.slane %v1324_v45, 0  ;;  %v1329_v33 = vperm.slane %v1324_v45, 1 }
 0x439   :  { %v1280_v61 = vsel %vm3874_vm15, %v1276_v39, %v1278_v51  ;;  %v1281_v18 = vsel %vm3875_vm7, %v1278_v51, %v1276_v39  ;;  %v1350_v13 = vsel %vm3876_vm11, %v1346_v2, %v1348_v35  ;;  %v1351_v27 = vsel %vm3877_vm0, %v1348_v35, %v1346_v2  ;;  %v1453_v5 = vpop.permute.xlu2 %1452  ;;  %vm3887_vm15 = vmmov %vm3886_vm9 }
 0x43a   :  { %v1297_v1 = vmul.f32 %v1293_v41, %v1280_v61  ;;  %v1298_v53 = vmul.f32 %v1294_v20, %v1281_v18  ;;  %v1367_v37 = vmul.f32 %v1363_v28, %v1350_v13  ;;  %v1368_v36 = vmul.f32 %v1364_v3, %v1351_v27  ;;  %v1499_v28 = vld [vmem:[#allocation5 + $0x41] ss:$8 sm:$0x3]  ;;  %v1569_v61 = vld [vmem:[#allocation5 + $0x43] ss:$8 sm:$0x3] }
 0x43b   :  { %v1503_v18 = vperm.slane %v1499_v28, 0  ;;  %v1504_v13 = vperm.slane %v1499_v28, 1  ;;  %vm3888_vm7 = vcmp.lt.s32.totalorder %v2427_v31, 99  ;;  %vm3890_vm0 = vcmp.lt.s32.totalorder %v2427_v31, 109 }
 0x43c   :  { %v1299_v4 = vadd.f32 %v1297_v1, %v1229_v42  ;;  %v1300_v0 = vadd.f32 %v1298_v53, %v1230_v62  ;;  %v1574_v1 = vperm.slane %v1569_v61, 1  ;;  %vm3889_vm11 = vmmov %vm3888_vm7  ;;  %v1674_v28 = vld [vmem:[#allocation5 + $0x46] ss:$8 sm:$0x3] }
 0x43e   :  { %v1369_v15 = vadd.f32 %v1367_v37, %v1299_v4  ;;  %v1370_v24 = vadd.f32 %v1368_v36, %v1300_v0 }
 0x43f   :  { %2019 = vrot.lane.b32.xlu2 %v2508_v55, %s2350_s20  ;;  %v1469_v55 = vperm.slane %v1464_v25, 1 }
 0x440   :  { %v1311_v39 = vpop.permute.xlu1 %1310  ;;  %v1418_v46 = vpop.permute.xlu0 %1417 }
 0x441   :  { %v1315_v32 = vsel %vm3878_vm1, %v1311_v39, %v1313_v52  ;;  %v1316_v10 = vsel %vm3879_vm10, %v1313_v52, %v1311_v39  ;;  %v1486_v56 = vpop.permute.xlu2 %1485  ;;  %vm3891_vm1 = vmmov %vm3890_vm0  ;;  %vm3892_vm10 = vcmp.lt.s32.totalorder %v2427_v31, 98 }
 0x442   :  { %v1332_v30 = vmul.f32 %v1328_v11, %v1315_v32  ;;  %v1333_v8 = vmul.f32 %v1329_v33, %v1316_v10  ;;  %v1534_v11 = vld [vmem:[#allocation5 + $0x42] ss:$8 sm:$0x3] }
 0x444   :  { %v1334_v59 = vadd.f32 %v1332_v30, %v1264_v44  ;;  %v1335_v16 = vadd.f32 %v1333_v8, %v1265_v63  ;;  %v1539_v8 = vperm.slane %v1534_v11, 1 }
 0x448   :  { %v1383_v35 = vpop.permute.xlu1 %1382  ;;  %v1451_v23 = vpop.permute.xlu0 %1450 }
 0x449   :  { %v1385_v21 = vsel %vm3880_vm3, %v1381_v17, %v1383_v35  ;;  %v1386_v14 = vsel %vm3881_vm4, %v1383_v35, %v1381_v17  ;;  %v1455_v60 = vsel %vm3882_vm5, %v1451_v23, %v1453_v5  ;;  %v1456_v29 = vsel %vm3883_vm12, %v1453_v5, %v1451_v23  ;;  %v1558_v38 = vpop.permute.xlu2 %1557  ;;  %vm3893_vm3 = vmmov %vm3892_vm10 }
 0x44a   :  { %v1402_v44 = vmul.f32 %v1398_v47, %v1385_v21  ;;  %v1403_v63 = vmul.f32 %v1399_v58, %v1386_v14  ;;  %v1472_v52 = vmul.f32 %v1468_v49, %v1455_v60  ;;  %v1473_v50 = vmul.f32 %v1469_v55, %v1456_v29 }
 0x44b   :  { %v1573_v5 = vperm.slane %v1569_v61, 0  ;;  %vm3894_vm4 = vcmp.lt.s32.totalorder %v2427_v31, 97  ;;  %vm3896_vm12 = vcmp.lt.s32.totalorder %v2427_v31, 95 }
 0x44c   :  { %v1404_v22 = vadd.f32 %v1402_v44, %v1334_v59  ;;  %v1405_v19 = vadd.f32 %v1403_v63, %v1335_v16  ;;  %vm3895_vm5 = vmmov %vm3894_vm4 }
 0x44e   :  { %v1474_v43 = vadd.f32 %v1472_v52, %v1404_v22  ;;  %v1475_v6 = vadd.f32 %v1473_v50, %v1405_v19 }
 0x450   :  { %v1416_v42 = vpop.permute.xlu1 %1415  ;;  %v1523_v17 = vpop.permute.xlu0 %1522 }
 0x451   :  { %v1420_v62 = vsel %vm3884_vm13, %v1416_v42, %v1418_v46  ;;  %v1421_v54 = vsel %vm3885_vm14, %v1418_v46, %v1416_v42  ;;  %v1591_v41 = vpop.permute.xlu2 %1590  ;;  %vm3897_vm13 = vmmov %vm3896_vm12  ;;  %vm3898_vm14 = vcmp.lt.s32.totalorder %v2427_v31, 96 }
 0x452   :  { %v1437_v20 = vmul.f32 %v1433_v9, %v1420_v62  ;;  %v1438_v51 = vmul.f32 %v1434_v7, %v1421_v54  ;;  %v1639_v9 = vld [vmem:[#allocation5 + $0x45] ss:$8 sm:$0x3] }
 0x454   :  { %v1439_v3 = vadd.f32 %v1437_v20, %v1369_v15  ;;  %v1440_v2 = vadd.f32 %v1438_v51, %v1370_v24  ;;  %v1643_v20 = vperm.slane %v1639_v9, 0 }
 0x458   :  { %v1488_v27 = vpop.permute.xlu1 %1487  ;;  %v1556_v53 = vpop.permute.xlu0 %1555 }
 0x459   :  { %v1490_v45 = vsel %vm3886_vm9, %v1486_v56, %v1488_v27  ;;  %v1491_v4 = vsel %vm3887_vm15, %v1488_v27, %v1486_v56  ;;  %v1560_v0 = vsel %vm3888_vm7, %v1556_v53, %v1558_v38  ;;  %v1561_v37 = vsel %vm3889_vm11, %v1558_v38, %v1556_v53  ;;  %v3591_v36 = vpop.permute.xlu2 %1662  ;;  %vm3899_vm9 = vmmov %vm3898_vm14 }
 0x45a   :  { %v1507_v15 = vmul.f32 %v1503_v18, %v1490_v45  ;;  %v1508_v24 = vmul.f32 %v1504_v13, %v1491_v4  ;;  %v1577_v46 = vmul.f32 %v1573_v5, %v1560_v0  ;;  %v1578_v32 = vmul.f32 %v1574_v1, %v1561_v37  ;;  %v1779_v13 = vld [vmem:[#allocation5 + $0x51] ss:$8 sm:$0x3]  ;;  %v1744_v37 = vld [vmem:[#allocation5 + $0x50] ss:$8 sm:$0x3] }
 0x45b   :  { %v1538_v56 = vperm.slane %v1534_v11, 0  ;;  %vm3900_vm15 = vcmp.lt.s32.totalorder %v2427_v31, 94 }
 0x45c   :  { %v1509_v33 = vadd.f32 %v1507_v15, %v1439_v3  ;;  %v1510_v39 = vadd.f32 %v1508_v24, %v1440_v2  ;;  %v1644_v3 = vperm.slane %v1639_v9, 1  ;;  %v1678_v15 = vperm.slane %v1674_v28, 0  ;;  %vm3901_vm7 = vmmov %vm3900_vm15 }
 0x45d   :  { %v1679_v24 = vperm.slane %v1674_v28, 1 }
 0x45e   :  { %v3593_v10 = vadd.f32 %v1577_v46, %v1509_v33  ;;  %v3595_v30 = vadd.f32 %v1578_v32, %v1510_v39  ;;  %v1783_v33 = vperm.slane %v1779_v13, 0  ;;  %v1814_v39 = vld [vmem:[#allocation5 + $0x52] ss:$8 sm:$0x3] }
 0x460   :  { %v1521_v48 = vpop.permute.xlu1 %1520  ;;  %v1628_v59 = vpop.permute.xlu0 %1627 }
 0x461   :  { %v1525_v16 = vsel %vm3890_vm0, %v1521_v48, %v1523_v17  ;;  %v1526_v25 = vsel %vm3891_vm1, %v1523_v17, %v1521_v48  ;;  %v1696_v47 = vpop.permute.xlu2 %1695  ;;  %v1709_v17 = vld [vmem:[#allocation5 + $0x47] ss:$8 sm:$0x3]  ;;  %vm3904_vm0 = vcmp.lt.s32.totalorder %v2427_v31, 82 }
 0x462   :  { %v1542_v58 = vmul.f32 %v1538_v56, %v1525_v16  ;;  %v1543_v35 = vmul.f32 %v1539_v8, %v1526_v25  ;;  %v1713_v18 = vperm.slane %v1709_v17, 0  ;;  %v1714_v5 = vperm.slane %v1709_v17, 1  ;;  %vm3905_vm1 = vmmov %vm3904_vm0 }
 0x463   :  { %v1784_v8 = vperm.slane %v1779_v13, 1  ;;  %v1748_v16 = vperm.slane %v1744_v37, 0  ;;  %v1749_v25 = vperm.slane %v1744_v37, 1  ;;  %v1954_v13 = vld [vmem:[#allocation5 + $0x56] ss:$8 sm:$0x3] }
 0x464   :  { %v1544_v49 = vadd.f32 %v1542_v58, %v1474_v43  ;;  %v1545_v55 = vadd.f32 %v1543_v35, %v1475_v6  ;;  %v1604_v6 = vld [vmem:[#allocation5 + $0x44] ss:$8 sm:$0x3]  ;;  %v1818_v35 = vperm.slane %v1814_v39, 0 }
 0x465   :  { %v1608_v42 = vperm.slane %v1604_v6, 0  ;;  %v1609_v62 = vperm.slane %v1604_v6, 1  ;;  %v2026_v37 = vld [vmem:[#allocation5 + $0xc1] ss:$8 sm:$0x3] }
 0x468   :  { %v1593_v23 = vpop.permute.xlu1 %1592  ;;  %v1661_v21 = vpop.permute.xlu0 %1660 }
 0x469   :  { %v1768_v14 = vpop.permute.xlu2 %1767  ;;  %v1595_v54 = vsel %vm3892_vm10, %v1591_v41, %v1593_v23  ;;  %v1596_v51 = vsel %vm3893_vm3, %v1593_v23, %v1591_v41  ;;  %v1665_v46 = vsel %vm3898_vm14, %v1661_v21, %v3591_v36  ;;  %v1666_v32 = vsel %vm3899_vm9, %v3591_v36, %v1661_v21 }
 0x46a   :  { %v1612_v27 = vmul.f32 %v1608_v42, %v1595_v54  ;;  %v1613_v4 = vmul.f32 %v1609_v62, %v1596_v51  ;;  %v1819_v23 = vperm.slane %v1814_v39, 1  ;;  %v1682_v6 = vmul.f32 %v1678_v15, %v1665_v46  ;;  %v1919_v62 = vld [vmem:[#allocation5 + $0x55] ss:$8 sm:$0x3] }
 0x46b   :  { %v1683_v9 = vmul.f32 %v1679_v24, %v1666_v32  ;;  %v1959_v32 = vperm.slane %v1954_v13, 1  ;;  %vm2014_vm10 = vcmp.lt.s32.totalorder %v2427_v31, 77  ;;  %vm3906_vm3 = vcmp.lt.s32.totalorder %v2427_v31, 81 }
 0x46c   :  { %v1614_v48 = vadd.f32 %v1612_v27, %v1544_v49  ;;  %v1849_v49 = vld [vmem:[#allocation5 + $0x53] ss:$8 sm:$0x3] }
 0x46e   :  { %v1684_v54 = vadd.f32 %v1682_v6, %v1614_v48 }
 0x470   :  { %v1626_v60 = vpop.permute.xlu1 %1625  ;;  %v1733_v29 = vpop.permute.xlu0 %1732 }
 0x471   :  { %v3601_v38 = vpop.permute.xlu2 %1800  ;;  %v1630_v2 = vsel %vm3894_vm4, %v1626_v60, %v1628_v59  ;;  %v1631_v61 = vsel %vm3895_vm5, %v1628_v59, %v1626_v60  ;;  %v3636_v60 = vld [vmem:[#allocation5 + $0x54] ss:$8 sm:$0x3]  ;;  %vm3907_vm4 = vmmov %vm3906_vm3  ;;  %vm3908_vm5 = vcmp.lt.s32.totalorder %v2427_v31, 80 }
 0x472   :  { %v1647_v41 = vmul.f32 %v1643_v20, %v1630_v2  ;;  %v1648_v11 = vmul.f32 %v1644_v3, %v1631_v61  ;;  %v1888_v51 = vperm.slane %v3636_v60, 0  ;;  %v3651_v3 = vld [vmem:[#allocation5 + $0x57] ss:$8 sm:$0x3] }
 0x474   :  { %v1649_v58 = vadd.f32 %v1647_v41, %v3593_v10  ;;  %v1650_v42 = vadd.f32 %v1648_v11, %v3595_v30  ;;  %v1889_v30 = vperm.slane %v3636_v60, 1  ;;  %v1993_v41 = vperm.slane %v3651_v3, 0 }
 0x478   :  { %v1698_v44 = vpop.permute.xlu1 %1697  ;;  %v1766_v63 = vpop.permute.xlu0 %1765 }
 0x479   :  { %v3603_v12 = vpop.permute.xlu2 %1872  ;;  %v1700_v1 = vsel %vm3896_vm12, %v1696_v47, %v1698_v44  ;;  %v1701_v0 = vsel %vm3897_vm13, %v1698_v44, %v1696_v47  ;;  %v1615_v47 = vadd.f32 %v1613_v4, %v1545_v55  ;;  %v1770_v36 = vsel %vm1769_vm2, %v1766_v63, %v1768_v14  ;;  %vm3909_vm12 = vmmov %vm3908_vm5 }
 0x47a   :  { %v1717_v56 = vmul.f32 %v1713_v18, %v1700_v1  ;;  %v1718_v59 = vmul.f32 %v1714_v5, %v1701_v0  ;;  %v1771_v55 = vsel %vm1769_vm2, %v1768_v14, %v1766_v63  ;;  %v1787_v18 = vmul.f32 %v1783_v33, %v1770_v36 }
 0x47b   :  { %v1685_v61 = vadd.f32 %v1683_v9, %v1615_v47  ;;  %v1853_v14 = vperm.slane %v1849_v49, 0  ;;  %v1854_v63 = vperm.slane %v1849_v49, 1  ;;  %v1788_v27 = vmul.f32 %v1784_v8, %v1771_v55 }
 0x47c   :  { %v1719_v21 = vadd.f32 %v1717_v56, %v1649_v58  ;;  %v1720_v20 = vadd.f32 %v1718_v59, %v1650_v42  ;;  %v1924_v4 = vperm.slane %v1919_v62, 1  ;;  %v1994_v0 = vperm.slane %v3651_v3, 1  ;;  %v2024_v56 = vld [vmem:[#allocation5 + $0x60] ss:$8 sm:$0x3] }
 0x47d   :  { %vm3902_vm2 = vcmp.lt.s32.totalorder %v2427_v31, 83  ;;  %v1958_v33 = vperm.slane %v1954_v13, 0  ;;  %v2037_v59 = vperm.slane %v2026_v37, 0  ;;  %v2028_v9 = vperm.slane %v2024_v56, 0 }
 0x47e   :  { %v1790_v15 = vadd.f32 %v1788_v27, %v1720_v20  ;;  %vm3903_vm11 = vmmov %vm3902_vm2  ;;  %v2029_v42 = vperm.slane %v2024_v56, 1 }
 0x480   :  { %v1731_v22 = vpop.permute.xlu1 %1730  ;;  %v3605_v19 = vpop.permute.xlu0 %1837 }
 0x481   :  { %v3607_v52 = vpop.permute.xlu2 %1905  ;;  %v1735_v10 = vsel %vm3900_vm15, %v1731_v22, %v1733_v29  ;;  %v1736_v17 = vsel %vm3901_vm7, %v1733_v29, %v1731_v22  ;;  %v1923_v29 = vperm.slane %v1919_v62, 0  ;;  %v1789_v22 = vadd.f32 %v1787_v18, %v1719_v21 }
 0x482   :  { %v1752_v5 = vmul.f32 %v1748_v16, %v1735_v10  ;;  %v1753_v1 = vmul.f32 %v1749_v25, %v1736_v17  ;;  %v2038_v16 = vperm.slane %v2026_v37, 1 }
 0x484   :  { %v1754_v8 = vadd.f32 %v1752_v5, %v1684_v54  ;;  %v1755_v48 = vadd.f32 %v1753_v1, %v1685_v61 }
 0x488   :  { %v3609_v50 = vpop.permute.xlu1 %1802  ;;  %v3611_v43 = vpop.permute.xlu0 %1870 }
 0x489   :  { %v3613_v7 = vpop.permute.xlu2 %1977  ;;  %v1805_v24 = vsel %vm3902_vm2, %v3601_v38, %v3609_v50  ;;  %v1806_v11 = vsel %vm3903_vm11, %v3609_v50, %v3601_v38  ;;  %v1875_v38 = vsel %vm3906_vm3, %v3611_v43, %v3603_v12  ;;  %vm2092_vm2 = vcmask 1040384  }
 0x48a   :  { %v1822_v25 = vmul.f32 %v1818_v35, %v1805_v24  ;;  %v1823_v47 = vmul.f32 %v1819_v23, %v1806_v11 }
 0x48c   :  { %v1824_v10 = vadd.f32 %v1822_v25, %v1754_v8  ;;  %v1825_v17 = vadd.f32 %v1823_v47, %v1755_v48 }
 0x490   :  { %v1836_v53 = vpop.permute.xlu1 %1835  ;;  %v3625_v45 = vpop.permute.xlu0 %1942 }
 0x491   :  { %v3638_v44 = vpop.permute.xlu2 %2010  ;;  %v1840_v39 = vsel %vm3904_vm0, %v1836_v53, %v3605_v19  ;;  %v1841_v46 = vsel %vm3905_vm1, %v3605_v19, %v1836_v53  ;;  %v1876_v19 = vsel %vm3907_vm4, %v3603_v12, %v3611_v43  ;;  %v1892_v43 = vmul.f32 %v1888_v51, %v1875_v38 }
 0x492   :  { %v1857_v53 = vmul.f32 %v1853_v14, %v1840_v39  ;;  %v1858_v58 = vmul.f32 %v1854_v63, %v1841_v46  ;;  %v1893_v49 = vmul.f32 %v1889_v30, %v1876_v19  ;;  %vm3910_vm0 = vcmask 1041409  }
 0x493   :  { %v1894_v27 = vadd.f32 %v1892_v43, %v1824_v10 }
 0x494   :  { %v1859_v51 = vadd.f32 %v1857_v53, %v1789_v22  ;;  %v1860_v30 = vadd.f32 %v1858_v58, %v1790_v15 }
 0x498   :  { %v1908_v28 = vpop.permute.xlu1 %1907  ;;  %v1976_v2 = vpop.permute.xlu0 %1975 }
 0x499   :  { %v2020_v50 = vpop.permute.xlu2 %2019  ;;  %v1910_v35 = vsel %vm3908_vm5, %v3607_v52, %v1908_v28  ;;  %v1911_v23 = vsel %vm3909_vm12, %v1908_v28, %v3607_v52  ;;  %v1980_v61 = vsel %vm1979_vm6, %v1976_v2, %v3613_v7  ;;  %v1981_v18 = vsel %vm1979_vm6, %v3613_v7, %v1976_v2 }
 0x49a   :  { %v1927_v54 = vmul.f32 %v1923_v29, %v1910_v35  ;;  %v1928_v20 = vmul.f32 %v1924_v4, %v1911_v23  ;;  %v1997_v29 = vmul.f32 %v1993_v41, %v1980_v61  ;;  %v1998_v22 = vmul.f32 %v1994_v0, %v1981_v18  ;;  %v3913_v18 = vld [vmem:[#allocation17_spill] sm:$0xff] }
 0x49c   :  { %v1929_v5 = vadd.f32 %v1927_v54, %v1859_v51 }
 0x4a0   :  { %v1941_v60 = vpop.permute.xlu1 %1940  ;;  %v2018_v6 = vpop.permute.xlu0 %2017 }
 0x4a1   :  { %v2021_v36 = vsel %vm2014_vm10, %v2018_v6, %v2020_v50  ;;  %v2022_v12 = vsel %vm2014_vm10, %v2020_v50, %v2018_v6  ;;  %v1945_v62 = vsel %vm1944_vm8, %v1941_v60, %v3625_v45  ;;  %v1946_v52 = vsel %vm1944_vm8, %v3625_v45, %v1941_v60 }
 0x4a2   :  { %v2041_v21 = vmul.f32 %v2037_v59, %v2021_v36  ;;  %v2042_v55 = vmul.f32 %v2038_v16, %v2022_v12  ;;  %v1962_v14 = vmul.f32 %v1958_v33, %v1945_v62  ;;  %v1963_v63 = vmul.f32 %v1959_v32, %v1946_v52 }
 0x4a4   :  { %v2043_v28 = vadd.f32 %v2041_v21, %v3320_v34  ;;  %v2044_v3 = vadd.f32 %v2042_v55, %v3322_v26  ;;  %v1895_v34 = vadd.f32 %v1893_v49, %v1825_v17  ;;  %v1930_v26 = vadd.f32 %v1928_v20, %v1860_v30  ;;  %v3912_v30 = vld [vmem:[#allocation12_spill] sm:$0xff] }
 0x4a5   :  { %v1964_v2 = vadd.f32 %v1962_v14, %v1894_v27 }
 0x4a6   :  { %v2047_v45 = vadd.f32 %v2043_v28, %v3339_v40  ;;  %v2048_v13 = vadd.f32 %v2044_v3, %v3341_v57  ;;  %v1965_v37 = vadd.f32 %v1963_v63, %v1895_v34  ;;  %v1999_v57 = vadd.f32 %v1997_v29, %v1929_v5  ;;  %v3911_v3 = vld [vmem:[#allocation11_spill] sm:$0xff]  ;;  %v3914_v63 = vld [vmem:[#allocation18_spill] sm:$0xff]  ;;  %v3916_v34 = vld [vmem:[#allocation16_spill] sm:$0xff] }
 0x4a7   :  { %v2000_v24 = vadd.f32 %v1998_v22, %v1930_v26  ;;  %v3917_v26 = vld [vmem:[#allocation13_spill] sm:$0xff]  ;;  %v3918_v29 = vld [vmem:[#allocation14_spill] sm:$0xff] }
 0x4a8   :  { %v2013_v1 = vpop.permute.xlu1 %2012 }
 0x4a9   :  { %v2015_v4 = vsel %vm2014_vm10, %v3638_v44, %v2013_v1  ;;  %v2016_v7 = vsel %vm2014_vm10, %v2013_v1, %v3638_v44 }
 0x4aa   :  { %v2032_v40 = vmul.f32 %v2028_v9, %v2015_v4  ;;  %v2033_v15 = vmul.f32 %v2029_v42, %v2016_v7 }
 0x4ac   :  { %v2034_v11 = vadd.f32 %v2032_v40, %v1964_v2  ;;  %v2035_v33 = vadd.f32 %v2033_v15, %v1965_v37 }
 0x4ae   :  { %v2045_v39 = vadd.f32 %v2034_v11, %v1999_v57  ;;  %v2046_v46 = vadd.f32 %v2035_v33, %v2000_v24 }
 0x4b0   :  { %v2049_v41 = vadd.f32 %v2047_v45, %v2045_v39  ;;  %v2050_v0 = vadd.f32 %v2048_v13, %v2046_v46  ;;  %v3915_v13 = vld [vmem:[#allocation15_spill] sm:$0xff] }
 0x4b2   :  { %v2144_v32 = vmul.f32 -1.442695, %v2049_v41  ;;  %v2145_v56 = vmul.f32 -1.442695, %v2050_v0 }
 0x4b4   :  { %2212 = vpow2.f32 %v2144_v32 }
 0x4b5   :  { %2214 = vpow2.f32 %v2145_v56 }
 0x4ba   :  { %v2213_v8 = vpop.eup %2212 }
 0x4bb   :  { %v2215_v48 = vpop.eup %2214  ;;  %v2057_v31 = vadd.f32 1.0, %v2213_v8 }
 0x4bc   :  { %v2058_v44 = vadd.f32 1.0, %v2215_v48 }
 0x4bd   :  { %2216 = vrcp.f32 %v2057_v31  ;;  %vm2064_vm13 = vweird.f32 %v2057_v31  ;;  %v2070_v9 = vand.u32 2147483648, %v2057_v31  ;;  %v2068_v42 = vand.u32 2147483647, %v2057_v31 }
 0x4be   :  { %2218 = vrcp.f32 %v2058_v44  ;;  %v2085_v53 = vand.u32 2147483648, %v2058_v44  ;;  %v2083_v60 = vand.u32 2147483647, %v2058_v44  ;;  %vm2079_vm9 = vweird.f32 %v2058_v44 }
 0x4bf   :  { %v2071_v43 = vor.u32 1.1754944e-38, %v2070_v9  ;;  %vm2069_vm11 = vcmp.eq.f32.partialorder %v2068_v42, 8.507059e+37 }
 0x4c0   :  { %v2086_v23 = vor.u32 1.1754944e-38, %v2085_v53  ;;  %vm2084_vm7 = vcmp.eq.f32.partialorder %v2083_v60, 8.507059e+37 }
 0x4c3   :  { %v2217_v59 = vpop.eup %2216 }
 0x4c4   :  { %v2219_v16 = vpop.eup %2218  ;;  %v2060_v25 = vmul.f32 %v2217_v59, %v2057_v31  ;;  %vm2065_vm6 = vweird.f32 %v2217_v59 }
 0x4c5   :  { %v2075_v47 = vmul.f32 %v2219_v16, %v2058_v44  ;;  %vm2080_vm8 = vweird.f32 %v2219_v16  ;;  %vm2066_vm14 = vmor %vm2064_vm13, %vm2065_vm6 }
 0x4c6   :  { %v2061_v38 = vsub.f32 1.0, %v2060_v25  ;;  %vm2081_vm15 = vmor %vm2079_vm9, %vm2080_vm8 }
 0x4c7   :  { %v2076_v19 = vsub.f32 1.0, %v2075_v47 }
 0x4c8   :  { %v2062_v50 = vmul.f32 %v2217_v59, %v2061_v38 }
 0x4c9   :  { %v2077_v58 = vmul.f32 %v2219_v16, %v2076_v19 }
 0x4ca   :  { %v2063_v6 = vadd.f32 %v2217_v59, %v2062_v50 }
 0x4cb   :  { %v2078_v35 = vadd.f32 %v2219_v16, %v2077_v58 }
 0x4cc   :  { %v2067_v36 = vsel %vm2066_vm14, %v2217_v59, %v2063_v6 }
 0x4cd   :  { %v2082_v12 = vsel %vm2081_vm15, %v2219_v16, %v2078_v35  ;;  %v2072_v55 = vsel %vm2069_vm11, %v2071_v43, %v2067_v36 }
 0x4ce   :  { %v2087_v49 = vsel %vm2084_vm7, %v2086_v23, %v2082_v12 }
 0x4cf   :  { %v2091_v21 = vrot.slane %v2087_v49, 7 }
 0x4d1   :  { %v2093_v10 = vsel %vm2092_vm2, %v2072_v55, %v2091_v21  ;;  %v2094_v17 = vsel %vm3910_vm0, %v2072_v55, %v2091_v21 }
 0x4d2   :  { %v2095_v62 = vrot.slane %v2094_v17, 1  ;;  %v2096_v52 = vperm.slane %v2093_v10, 0  ;;  %v2097_v54 = vperm.slane %v2093_v10, 1 }
 0x4d4   :  { %v2098_v20 = vperm.slane %v2095_v62, 0  ;;  %v2099_v28 = vperm.slane %v2095_v62, 1  ;;  %v2104_v51 = vmul.f32 %v2096_v52, %v3911_v3  ;;  %v2105_v61 = vmul.f32 %v2097_v54, %v3912_v30 }
 0x4d5   :  { %v2106_v14 = vmul.f32 %v2096_v52, %v3913_v18  ;;  %v2107_v45 = vmul.f32 %v2097_v54, %v3914_v63 }
 0x4d6   :  { %v2108_v27 = vmul.f32 %v2098_v20, %v3915_v13  ;;  %2112 = vst [vmem:[#allocation7] sm:$0xff] %v2104_v51  ;;  %v2109_v5 = vmul.f32 %v2099_v28, %v3916_v34  ;;  %v2110_v1 = vmul.f32 %v2098_v20, %v3917_v26  ;;  %v2111_v22 = vmul.f32 %v2099_v28, %v3918_v29 }
 0x4d7   :  { %2113 = vst [vmem:[#allocation7 + $0x8] sm:$0xff] %v2105_v61 }
 0x4d8   :  { %2114 = vst [vmem:[#allocation7 + $0x10] sm:$0xff] %v2106_v14 }
 0x4d9   :  { %2115 = vst [vmem:[#allocation7 + $0x18] sm:$0xff] %v2107_v45 }
 0x4da   :  { %2116 = vst [vmem:[#allocation7 + $0x20] sm:$0xff] %v2108_v27 }
 0x4db   :  { %2117 = vst [vmem:[#allocation7 + $0x28] sm:$0xff] %v2109_v5 }
 0x4dc   :  { %2118 = vst [vmem:[#allocation7 + $0x30] sm:$0xff] %v2110_v1 }
 0x4dd   :  { %2119 = vst [vmem:[#allocation7 + $0x38] sm:$0xff] %v2111_v22 }
 0x4de   :  { %2132 = dma.vmem_to_hbm [thread:$0]  %s2125_s21, 1024, %s2127_s26, [#allocation4], %s3919_s0, %s3919_s0, %s2300_s24  }
 0x4df   :  { %2296 = dma.done.wait [#allocation4], 1024  }
 0x4e0   :  { %2297 = vsyncadd [#allocation4], 4294966272 }
 0x4e1   :  { %2137 = vsyncpa [#allocation3], 1 }
 0x4e2   :  { %2138 = vsyncpa [#allocation6], 1 }
 0x4e3   :  { %2139 = vsyncpa [#allocation4], 1 }

</bundles_post_ra>
